<compile_context>
chip_gen: v7x
topology: tpu7x:2x2x1
jax: 0.10.0
libtpu: 0.0.40
codegen_flags: <defaults>
</compile_context>

<pallas_src>
import functools

import jax
import jax.numpy as jnp
from jax.experimental import pallas as pl
from jax.experimental.pallas import tpu as pltpu

BN_EPS = 1e-5


# ----------------------------------------------------------------------------
# Fused Pallas kernel: one batch element per grid step, everything in VMEM.
# ----------------------------------------------------------------------------
def _dfa_edge_fused_kernel(x_ref, hidx_ref, widx_ref,
                           w0_ref, b0_ref,
                           w1_ref, b1_ref,
                           w2_ref, b2_ref,
                           wq_ref, bq_ref, wk_ref, bk_ref, wv_ref, bv_ref,
                           w3_ref, b3_ref,
                           g_ref, o_ref, *, H, W, r):
    N = H * W
    h_idx = hidx_ref[...]            # (1, N) int32, row index of each lane
    w_idx = widx_ref[...]            # (1, N) int32, col index of each lane

    def shift(a, dy, dx):
        """a[:, h*W+w] -> a[:, (h+dy)*W + (w+dx)], zero outside the image."""
        if dy == 0 and dx == 0:
            return a
        rolled = jnp.roll(a, -(dy * W + dx), axis=-1)
        ok = ((h_idx + dy >= 0) & (h_idx + dy < H)
              & (w_idx + dx >= 0) & (w_idx + dx < W))
        return jnp.where(ok, rolled, 0.0)

    def tap_conv(a, w_taps_ref, b_ref, offsets):
        """relu( sum_t W_t[C,C] @ shift(a, dy_t, dx_t) + b )  — f32 MXU accum."""
        acc = None
        for t, (dy, dx) in enumerate(offsets):
            contrib = jnp.dot(w_taps_ref[t], shift(a, dy, dx),
                              preferred_element_type=jnp.float32)
            acc = contrib if acc is None else acc + contrib
        return jnp.maximum(acc + b_ref[...], 0.0)

    # ---- conv0: 1x1 (BN folded) ----
    y = jnp.dot(w0_ref[...], x_ref[...], preferred_element_type=jnp.float32)
    y = jnp.maximum(y + b0_ref[...], 0.0)                       # (C, N)

    c = r // 2
    off1 = [(0, j - c) for j in range(r)]                       # (1, r) conv
    off2 = [(i - c, 0) for i in range(r)]                       # (r, 1) conv
    off3 = [((i - 1) * r, (j - 1) * r)                          # 3x3, dil=r
            for i in range(3) for j in range(3)]

    y = tap_conv(y, w1_ref, b1_ref, off1)                        # conv1
    y = tap_conv(y, w2_ref, b2_ref, off2)                        # conv2

    # ---- DFA 'B' attention (position + channel), all lane-dense on N ----
    q = jnp.dot(wq_ref[...], y, preferred_element_type=jnp.float32) + bq_ref[...]
    k = jnp.dot(wk_ref[...], y, preferred_element_type=jnp.float32) + bk_ref[...]
    v = jnp.dot(wv_ref[...], y, preferred_element_type=jnp.float32) + bv_ref[...]

    # energy[i, j] = sum_c q[c, i] * k[c, j]   (contract channel axis, no x^T)
    energy = jax.lax.dot_general(q, k, (((0,), (0,)), ((), ())),
                                 preferred_element_type=jnp.float32)   # (N, N)
    m = jnp.max(energy, axis=-1, keepdims=True)
    p = jnp.exp(energy - m)                                            # unnormalized

    # Deferred softmax normalization: apply p to V, then rescale rows.
    pam = jax.lax.dot_general(v, p, (((1,), (1,)), ((), ())),
                              preferred_element_type=jnp.float32)      # (C, N)
    row_sum = jax.lax.dot_general(jnp.ones((1, N), jnp.float32), p,
                                  (((1,), (1,)), ((), ())),
                                  preferred_element_type=jnp.float32)  # (1, N)
    pam = pam / row_sum

    # Channel attention (CAM).
    energy_c = jax.lax.dot_general(y, y, (((1,), (1,)), ((), ())),
                                   preferred_element_type=jnp.float32)  # (C, C)
    energy_new = jnp.max(energy_c, axis=-1, keepdims=True) - energy_c
    pc = jnp.exp(energy_new - jnp.max(energy_new, axis=-1, keepdims=True))
    attn_c = pc / jnp.sum(pc, axis=-1, keepdims=True)
    cam = jnp.dot(attn_c, y, preferred_element_type=jnp.float32)        # (C, N)

    gp = g_ref[0]
    gc = g_ref[1]
    att = gp * pam + gc * cam + 2.0 * y      # (gp*pam + x) + (gc*cam + x)

    # ---- conv3: 3x3 dilated (dil = r), then lane-dense (C, N) store ----
    o_ref[...] = tap_conv(att, w3_ref, b3_ref, off3)


# ----------------------------------------------------------------------------
# Wrapper: BN folding, tap-matrix packing, one pallas_call for the whole chain
# ----------------------------------------------------------------------------
def _fold_bn(w, bn):
    scale = bn["gamma"] * jax.lax.rsqrt(bn["var"] + BN_EPS)
    bias = bn["beta"] - bn["mean"] * scale
    return w * scale[:, None, None, None], bias


def _taps(w):
    """(Cout, Cin, kh, kw) -> (kh*kw, Cout, Cin), tap index = kh-major."""
    cout, cin, kh, kw = w.shape
    return jnp.transpose(w.reshape(cout, cin, kh * kw), (2, 0, 1))


def dfa_kernel_edge_forward(x_nchw, params):
    """Matches DFA_kernel_edge.forward; input/output NCHW, single fused kernel."""
    B, Cin, H, W = x_nchw.shape
    r = int(params["receptive_size"])
    N = H * W
    C = params["conv0_w"].shape[0]
    C8 = params["q_w"].shape[0]
    C8p = max(8, ((C8 + 7) // 8) * 8)          # pad q/k channels to a sublane

    xb = x_nchw.reshape(B, Cin, N).astype(jnp.float32)

    w0, b0 = _fold_bn(params["conv0_w"], params["conv0_bn"])
    w1, b1 = _fold_bn(params["conv1_w"], params["conv1_bn"])
    w2, b2 = _fold_bn(params["conv2_w"], params["conv2_bn"])
    w3, b3 = _fold_bn(params["conv3_w"], params["conv3_bn"])

    w0m = w0.reshape(C, Cin)
    w1m = _taps(w1)            # (r, C, C)
    w2m = _taps(w2)            # (r, C, C)
    w3m = _taps(w3)            # (9, C, C)

    wq = params["q_w"].reshape(C8, C)
    wk = params["k_w"].reshape(C8, C)
    wv = params["v_w"].reshape(C, C)
    wq_p = jnp.zeros((C8p, C), jnp.float32).at[:C8].set(wq)
    wk_p = jnp.zeros((C8p, C), jnp.float32).at[:C8].set(wk)
    bq_p = jnp.zeros((C8p, 1), jnp.float32).at[:C8, 0].set(params["q_b"])
    bk_p = jnp.zeros((C8p, 1), jnp.float32).at[:C8, 0].set(params["k_b"])
    gammas = jnp.stack([params["gamma_p"], params["gamma_c"]]).astype(jnp.float32)

    n_iota = jnp.arange(N, dtype=jnp.int32).reshape(1, N)
    h_idx = n_iota // W
    w_idx = n_iota % W

    # Advisory cost hint so XLA overlaps the tiny BN-fold/reshape glue.
    flops_per_b = (2 * C * Cin * N + 2 * (2 * r + 9) * C * C * N
                   + 2 * (2 * C8p + C) * C * N
                   + 2 * (C8p + C + 1) * N * N
                   + 2 * 2 * C * C * N)
    bytes_per_b = 4 * (Cin * N + C * N
                       + C * Cin + (2 * r + 9) * C * C + 2 * C8p * C + C * C)
    cost = pl.CostEstimate(flops=B * flops_per_b,
                           transcendentals=B * (N * N + C * C),
                           bytes_accessed=B * bytes_per_b)

    def rep(shape):
        nd = len(shape)
        return pl.BlockSpec(shape, lambda b, nd=nd: (0,) * nd)

    out = pl.pallas_call(
        functools.partial(_dfa_edge_fused_kernel, H=H, W=W, r=r),
        out_shape=jax.ShapeDtypeStruct((B, C, N), jnp.float32),
        grid=(B,),
        in_specs=[
            pl.BlockSpec((None, Cin, N), lambda b: (b, 0, 0)),   # x
            rep((1, N)), rep((1, N)),                            # h_idx, w_idx
            rep((C, Cin)), rep((C, 1)),                          # conv0
            rep((r, C, C)), rep((C, 1)),                         # conv1 taps
            rep((r, C, C)), rep((C, 1)),                         # conv2 taps
            rep((C8p, C)), rep((C8p, 1)),                        # Wq, bq
            rep((C8p, C)), rep((C8p, 1)),                        # Wk, bk
            rep((C, C)), rep((C, 1)),                            # Wv, bv
            rep((9, C, C)), rep((C, 1)),                         # conv3 taps
            pl.BlockSpec(memory_space=pltpu.MemorySpace.SMEM),   # gammas
        ],
        out_specs=pl.BlockSpec((None, C, N), lambda b: (b, 0, 0)),
        compiler_params=pltpu.CompilerParams(dimension_semantics=("parallel",)),
        cost_estimate=cost,
    )(xb,
      h_idx, w_idx,
      w0m, b0.reshape(C, 1),
      w1m, b1.reshape(C, 1),
      w2m, b2.reshape(C, 1),
      wq_p, bq_p,
      wk_p, bk_p,
      wv, params["v_b"].reshape(C, 1),
      w3m, b3.reshape(C, 1),
      gammas)
    return out.reshape(B, C, H, W)


# ----------------------------------------------------------------------------
# Deterministic parameter init (fresh PyTorch module: BN identity stats,
# attention gammas = 0).
# ----------------------------------------------------------------------------
def _bn_init(c):
    return {"gamma": jnp.ones((c,), jnp.float32),
            "beta": jnp.zeros((c,), jnp.float32),
            "mean": jnp.zeros((c,), jnp.float32),
            "var": jnp.ones((c,), jnp.float32)}


def init_params(key, in_channel, out_channel, receptive_size):
    r = receptive_size
    c8 = max(out_channel // 8, 1)
    ks = jax.random.split(key, 8)

    def w(k, shape):
        return 0.1 * jax.random.normal(k, shape, jnp.float32)

    return {
        "receptive_size": r,
        "conv0_w": w(ks[0], (out_channel, in_channel, 1, 1)),
        "conv0_bn": _bn_init(out_channel),
        "conv1_w": w(ks[1], (out_channel, out_channel, 1, r)),
        "conv1_bn": _bn_init(out_channel),
        "conv2_w": w(ks[2], (out_channel, out_channel, r, 1)),
        "conv2_bn": _bn_init(out_channel),
        "conv3_w": w(ks[3], (out_channel, out_channel, 3, 3)),
        "conv3_bn": _bn_init(out_channel),
        "q_w": w(ks[4], (c8, out_channel, 1, 1)),
        "q_b": jnp.zeros((c8,), jnp.float32),
        "k_w": w(ks[5], (c8, out_channel, 1, 1)),
        "k_b": jnp.zeros((c8,), jnp.float32),
        "v_w": w(ks[6], (out_channel, out_channel, 1, 1)),
        "v_b": jnp.zeros((out_channel,), jnp.float32),
        # PyTorch DANet initializes the attention gammas to 0.
        "gamma_p": jnp.float32(0.0),
        "gamma_c": jnp.float32(0.0),
    }


# ----------------------------------------------------------------------------
if __name__ == "__main__":
    key = jax.random.PRNGKey(0)
    params = init_params(key, in_channel=4, out_channel=32, receptive_size=3)
    # Use nonzero gammas in the self-test so the PAM/CAM paths are actually
    # exercised numerically (gamma=0 would make attention a no-op).
    params = dict(params, gamma_p=jnp.float32(0.3), gamma_c=jnp.float32(0.2))

    x = jax.random.normal(jax.random.fold_in(key, 99), (2, 4, 16, 16), jnp.float32)

    fwd = jax.jit(lambda inp: dfa_kernel_edge_forward(inp, params))
    y = jax.block_until_ready(fwd(x))

    assert y.shape == (2, 32, 16, 16), y.shape
    assert bool(jnp.all(jnp.isfinite(y)))
    print("KERNEL_OK")
</pallas_src>

<mosaic_0001>
module attributes {stable_mosaic.version = 11 : i64} {
  func.func @_dfa_edge_fused_kernel(%arg0: i32, %arg1: memref<1x4x256xf32, #tpu.memory_space<vmem>>, %arg2: memref<1x256xi32, #tpu.memory_space<vmem>>, %arg3: memref<1x256xi32, #tpu.memory_space<vmem>>, %arg4: memref<32x4xf32, #tpu.memory_space<vmem>>, %arg5: memref<32x1xf32, #tpu.memory_space<vmem>>, %arg6: memref<3x32x32xf32, #tpu.memory_space<vmem>>, %arg7: memref<32x1xf32, #tpu.memory_space<vmem>>, %arg8: memref<3x32x32xf32, #tpu.memory_space<vmem>>, %arg9: memref<32x1xf32, #tpu.memory_space<vmem>>, %arg10: memref<8x32xf32, #tpu.memory_space<vmem>>, %arg11: memref<8x1xf32, #tpu.memory_space<vmem>>, %arg12: memref<8x32xf32, #tpu.memory_space<vmem>>, %arg13: memref<8x1xf32, #tpu.memory_space<vmem>>, %arg14: memref<32x32xf32, #tpu.memory_space<vmem>>, %arg15: memref<32x1xf32, #tpu.memory_space<vmem>>, %arg16: memref<9x32x32xf32, #tpu.memory_space<vmem>>, %arg17: memref<32x1xf32, #tpu.memory_space<vmem>>, %arg18: memref<2xf32, #tpu.memory_space<smem>>, %arg19: memref<1x32x256xf32, #tpu.memory_space<vmem>>) attributes {dimension_semantics = [#tpu.dimension_semantics<parallel>], iteration_bounds = array<i64: 2>, scalar_prefetch = 0 : i64, scratch_operands = 0 : i64, tpu.core_type = #tpu.core_type<tc>, window_params = [{transform_indices = @transform_0, window_bounds = array<i64: 1, 4, 256>}, {pipeline_mode = #tpu.pipeline_mode<synchronous>, transform_indices = @transform_1, window_bounds = array<i64: 1, 256>}, {pipeline_mode = #tpu.pipeline_mode<synchronous>, transform_indices = @transform_2, window_bounds = array<i64: 1, 256>}, {pipeline_mode = #tpu.pipeline_mode<synchronous>, transform_indices = @transform_3, window_bounds = array<i64: 32, 4>}, {pipeline_mode = #tpu.pipeline_mode<synchronous>, transform_indices = @transform_4, window_bounds = array<i64: 32, 1>}, {pipeline_mode = #tpu.pipeline_mode<synchronous>, transform_indices = @transform_5, window_bounds = array<i64: 3, 32, 32>}, {pipeline_mode = #tpu.pipeline_mode<synchronous>, transform_indices = @transform_6, window_bounds = array<i64: 32, 1>}, {pipeline_mode = #tpu.pipeline_mode<synchronous>, transform_indices = @transform_7, window_bounds = array<i64: 3, 32, 32>}, {pipeline_mode = #tpu.pipeline_mode<synchronous>, transform_indices = @transform_8, window_bounds = array<i64: 32, 1>}, {pipeline_mode = #tpu.pipeline_mode<synchronous>, transform_indices = @transform_9, window_bounds = array<i64: 8, 32>}, {pipeline_mode = #tpu.pipeline_mode<synchronous>, transform_indices = @transform_10, window_bounds = array<i64: 8, 1>}, {pipeline_mode = #tpu.pipeline_mode<synchronous>, transform_indices = @transform_11, window_bounds = array<i64: 8, 32>}, {pipeline_mode = #tpu.pipeline_mode<synchronous>, transform_indices = @transform_12, window_bounds = array<i64: 8, 1>}, {pipeline_mode = #tpu.pipeline_mode<synchronous>, transform_indices = @transform_13, window_bounds = array<i64: 32, 32>}, {pipeline_mode = #tpu.pipeline_mode<synchronous>, transform_indices = @transform_14, window_bounds = array<i64: 32, 1>}, {pipeline_mode = #tpu.pipeline_mode<synchronous>, transform_indices = @transform_15, window_bounds = array<i64: 9, 32, 32>}, {pipeline_mode = #tpu.pipeline_mode<synchronous>, transform_indices = @transform_16, window_bounds = array<i64: 32, 1>}, {transform_indices = @transform_17, window_bounds = array<i64: 2>}, {transform_indices = @transform_18, window_bounds = array<i64: 1, 32, 256>}]} {
    %c0 = arith.constant 0 : index
    %c0_0 = arith.constant 0 : index
    %0 = vector.load %arg2[%c0, %c0_0] : memref<1x256xi32, #tpu.memory_space<vmem>>, vector<1x256xi32>
    %c0_1 = arith.constant 0 : index
    %c0_2 = arith.constant 0 : index
    %1 = vector.load %arg3[%c0_1, %c0_2] : memref<1x256xi32, #tpu.memory_space<vmem>>, vector<1x256xi32>
    %c0_3 = arith.constant 0 : index
    %c0_4 = arith.constant 0 : index
    %2 = vector.load %arg4[%c0_3, %c0_4] : memref<32x4xf32, #tpu.memory_space<vmem>>, vector<32x4xf32>
    %c0_5 = arith.constant 0 : index
    %c0_6 = arith.constant 0 : index
    %c0_7 = arith.constant 0 : index
    %3 = vector.load %arg1[%c0_5, %c0_6, %c0_7] : memref<1x4x256xf32, #tpu.memory_space<vmem>>, vector<1x4x256xf32>
    %4 = vector.shape_cast %3 : vector<1x4x256xf32> to vector<4x256xf32>
    %cst = arith.constant dense<0.000000e+00> : vector<32x256xf32>
    %5 = tpu.matmul %2, %4, %cst {dimension_numbers = #tpu.dot_dimension_numbers<[1], [0], [0], [1], [0, 0, 1, 1], [], []>} : vector<32x4xf32>, vector<4x256xf32>, vector<32x256xf32> -> vector<32x256xf32>
    %c0_8 = arith.constant 0 : index
    %c0_9 = arith.constant 0 : index
    %6 = vector.load %arg5[%c0_8, %c0_9] : memref<32x1xf32, #tpu.memory_space<vmem>>, vector<32x1xf32>
    %7 = vector.broadcast %6 : vector<32x1xf32> to vector<32x256xf32>
    %8 = arith.addf %5, %7 : vector<32x256xf32>
    %cst_10 = arith.constant 0.000000e+00 : f32
    %9 = vector.broadcast %cst_10 : f32 to vector<32x256xf32>
    %10 = arith.maximumf %8, %9 : vector<32x256xf32>
    %c0_11 = arith.constant 0 : index
    %c0_12 = arith.constant 0 : index
    %c0_13 = arith.constant 0 : index
    %11 = vector.load %arg6[%c0_11, %c0_12, %c0_13] : memref<3x32x32xf32, #tpu.memory_space<vmem>>, vector<1x32x32xf32>
    %12 = vector.shape_cast %11 : vector<1x32x32xf32> to vector<32x32xf32>
    %13 = vector.extract_strided_slice %10 {offsets = [0, 255], sizes = [32, 1], strides = [1, 1]} : vector<32x256xf32> to vector<32x1xf32>
    %14 = vector.extract_strided_slice %10 {offsets = [0, 0], sizes = [32, 255], strides = [1, 1]} : vector<32x256xf32> to vector<32x255xf32>
    %15 = tpu.concatenate %13, %14 in 1 : vector<32x1xf32>, vector<32x255xf32> -> vector<32x256xf32>
    %c0_i32 = arith.constant 0 : i32
    %16 = vector.broadcast %c0_i32 : i32 to vector<1x256xi32>
    %17 = arith.addi %0, %16 : vector<1x256xi32>
    %c0_i32_14 = arith.constant 0 : i32
    %18 = vector.broadcast %c0_i32_14 : i32 to vector<1x256xi32>
    %19 = arith.cmpi sge, %17, %18 : vector<1x256xi32>
    %c0_i32_15 = arith.constant 0 : i32
    %20 = vector.broadcast %c0_i32_15 : i32 to vector<1x256xi32>
    %21 = arith.addi %0, %20 : vector<1x256xi32>
    %c16_i32 = arith.constant 16 : i32
    %22 = vector.broadcast %c16_i32 : i32 to vector<1x256xi32>
    %23 = arith.cmpi slt, %21, %22 : vector<1x256xi32>
    %24 = arith.andi %19, %23 : vector<1x256xi1>
    %c-1_i32 = arith.constant -1 : i32
    %25 = vector.broadcast %c-1_i32 : i32 to vector<1x256xi32>
    %26 = arith.addi %1, %25 : vector<1x256xi32>
    %c0_i32_16 = arith.constant 0 : i32
    %27 = vector.broadcast %c0_i32_16 : i32 to vector<1x256xi32>
    %28 = arith.cmpi sge, %26, %27 : vector<1x256xi32>
    %29 = arith.andi %24, %28 : vector<1x256xi1>
    %c-1_i32_17 = arith.constant -1 : i32
    %30 = vector.broadcast %c-1_i32_17 : i32 to vector<1x256xi32>
    %31 = arith.addi %1, %30 : vector<1x256xi32>
    %c16_i32_18 = arith.constant 16 : i32
    %32 = vector.broadcast %c16_i32_18 : i32 to vector<1x256xi32>
    %33 = arith.cmpi slt, %31, %32 : vector<1x256xi32>
    %34 = arith.andi %29, %33 : vector<1x256xi1>
    %cst_19 = arith.constant 0.000000e+00 : f32
    %35 = vector.shape_cast %34 : vector<1x256xi1> to vector<1x256xi1>
    %36 = vector.broadcast %35 : vector<1x256xi1> to vector<32x256xi1>
    %37 = vector.broadcast %cst_19 : f32 to vector<32x256xf32>
    %38 = arith.select %36, %15, %37 : vector<32x256xi1>, vector<32x256xf32>
    %cst_20 = arith.constant dense<0.000000e+00> : vector<32x256xf32>
    %39 = tpu.matmul %12, %38, %cst_20 {dimension_numbers = #tpu.dot_dimension_numbers<[1], [0], [0], [1], [0, 0, 1, 1], [], []>} : vector<32x32xf32>, vector<32x256xf32>, vector<32x256xf32> -> vector<32x256xf32>
    %c1 = arith.constant 1 : index
    %c0_21 = arith.constant 0 : index
    %c0_22 = arith.constant 0 : index
    %40 = vector.load %arg6[%c1, %c0_21, %c0_22] : memref<3x32x32xf32, #tpu.memory_space<vmem>>, vector<1x32x32xf32>
    %41 = vector.shape_cast %40 : vector<1x32x32xf32> to vector<32x32xf32>
    %cst_23 = arith.constant dense<0.000000e+00> : vector<32x256xf32>
    %42 = tpu.matmul %41, %10, %cst_23 {dimension_numbers = #tpu.dot_dimension_numbers<[1], [0], [0], [1], [0, 0, 1, 1], [], []>} : vector<32x32xf32>, vector<32x256xf32>, vector<32x256xf32> -> vector<32x256xf32>
    %43 = arith.addf %39, %42 : vector<32x256xf32>
    %c2 = arith.constant 2 : index
    %c0_24 = arith.constant 0 : index
    %c0_25 = arith.constant 0 : index
    %44 = vector.load %arg6[%c2, %c0_24, %c0_25] : memref<3x32x32xf32, #tpu.memory_space<vmem>>, vector<1x32x32xf32>
    %45 = vector.shape_cast %44 : vector<1x32x32xf32> to vector<32x32xf32>
    %46 = vector.extract_strided_slice %10 {offsets = [0, 1], sizes = [32, 255], strides = [1, 1]} : vector<32x256xf32> to vector<32x255xf32>
    %47 = vector.extract_strided_slice %10 {offsets = [0, 0], sizes = [32, 1], strides = [1, 1]} : vector<32x256xf32> to vector<32x1xf32>
    %48 = tpu.concatenate %46, %47 in 1 : vector<32x255xf32>, vector<32x1xf32> -> vector<32x256xf32>
    %c0_i32_26 = arith.constant 0 : i32
    %49 = vector.broadcast %c0_i32_26 : i32 to vector<1x256xi32>
    %50 = arith.addi %0, %49 : vector<1x256xi32>
    %c0_i32_27 = arith.constant 0 : i32
    %51 = vector.broadcast %c0_i32_27 : i32 to vector<1x256xi32>
    %52 = arith.cmpi sge, %50, %51 : vector<1x256xi32>
    %c0_i32_28 = arith.constant 0 : i32
    %53 = vector.broadcast %c0_i32_28 : i32 to vector<1x256xi32>
    %54 = arith.addi %0, %53 : vector<1x256xi32>
    %c16_i32_29 = arith.constant 16 : i32
    %55 = vector.broadcast %c16_i32_29 : i32 to vector<1x256xi32>
    %56 = arith.cmpi slt, %54, %55 : vector<1x256xi32>
    %57 = arith.andi %52, %56 : vector<1x256xi1>
    %c1_i32 = arith.constant 1 : i32
    %58 = vector.broadcast %c1_i32 : i32 to vector<1x256xi32>
    %59 = arith.addi %1, %58 : vector<1x256xi32>
    %c0_i32_30 = arith.constant 0 : i32
    %60 = vector.broadcast %c0_i32_30 : i32 to vector<1x256xi32>
    %61 = arith.cmpi sge, %59, %60 : vector<1x256xi32>
    %62 = arith.andi %57, %61 : vector<1x256xi1>
    %c1_i32_31 = arith.constant 1 : i32
    %63 = vector.broadcast %c1_i32_31 : i32 to vector<1x256xi32>
    %64 = arith.addi %1, %63 : vector<1x256xi32>
    %c16_i32_32 = arith.constant 16 : i32
    %65 = vector.broadcast %c16_i32_32 : i32 to vector<1x256xi32>
    %66 = arith.cmpi slt, %64, %65 : vector<1x256xi32>
    %67 = arith.andi %62, %66 : vector<1x256xi1>
    %cst_33 = arith.constant 0.000000e+00 : f32
    %68 = vector.shape_cast %67 : vector<1x256xi1> to vector<1x256xi1>
    %69 = vector.broadcast %68 : vector<1x256xi1> to vector<32x256xi1>
    %70 = vector.broadcast %cst_33 : f32 to vector<32x256xf32>
    %71 = arith.select %69, %48, %70 : vector<32x256xi1>, vector<32x256xf32>
    %cst_34 = arith.constant dense<0.000000e+00> : vector<32x256xf32>
    %72 = tpu.matmul %45, %71, %cst_34 {dimension_numbers = #tpu.dot_dimension_numbers<[1], [0], [0], [1], [0, 0, 1, 1], [], []>} : vector<32x32xf32>, vector<32x256xf32>, vector<32x256xf32> -> vector<32x256xf32>
    %73 = arith.addf %43, %72 : vector<32x256xf32>
    %c0_35 = arith.constant 0 : index
    %c0_36 = arith.constant 0 : index
    %74 = vector.load %arg7[%c0_35, %c0_36] : memref<32x1xf32, #tpu.memory_space<vmem>>, vector<32x1xf32>
    %75 = vector.broadcast %74 : vector<32x1xf32> to vector<32x256xf32>
    %76 = arith.addf %73, %75 : vector<32x256xf32>
    %cst_37 = arith.constant 0.000000e+00 : f32
    %77 = vector.broadcast %cst_37 : f32 to vector<32x256xf32>
    %78 = arith.maximumf %76, %77 : vector<32x256xf32>
    %c0_38 = arith.constant 0 : index
    %c0_39 = arith.constant 0 : index
    %c0_40 = arith.constant 0 : index
    %79 = vector.load %arg8[%c0_38, %c0_39, %c0_40] : memref<3x32x32xf32, #tpu.memory_space<vmem>>, vector<1x32x32xf32>
    %80 = vector.shape_cast %79 : vector<1x32x32xf32> to vector<32x32xf32>
    %81 = vector.extract_strided_slice %78 {offsets = [0, 240], sizes = [32, 16], strides = [1, 1]} : vector<32x256xf32> to vector<32x16xf32>
    %82 = vector.extract_strided_slice %78 {offsets = [0, 0], sizes = [32, 240], strides = [1, 1]} : vector<32x256xf32> to vector<32x240xf32>
    %83 = tpu.concatenate %81, %82 in 1 : vector<32x16xf32>, vector<32x240xf32> -> vector<32x256xf32>
    %c-1_i32_41 = arith.constant -1 : i32
    %84 = vector.broadcast %c-1_i32_41 : i32 to vector<1x256xi32>
    %85 = arith.addi %0, %84 : vector<1x256xi32>
    %c0_i32_42 = arith.constant 0 : i32
    %86 = vector.broadcast %c0_i32_42 : i32 to vector<1x256xi32>
    %87 = arith.cmpi sge, %85, %86 : vector<1x256xi32>
    %c-1_i32_43 = arith.constant -1 : i32
    %88 = vector.broadcast %c-1_i32_43 : i32 to vector<1x256xi32>
    %89 = arith.addi %0, %88 : vector<1x256xi32>
    %c16_i32_44 = arith.constant 16 : i32
    %90 = vector.broadcast %c16_i32_44 : i32 to vector<1x256xi32>
    %91 = arith.cmpi slt, %89, %90 : vector<1x256xi32>
    %92 = arith.andi %87, %91 : vector<1x256xi1>
    %c0_i32_45 = arith.constant 0 : i32
    %93 = vector.broadcast %c0_i32_45 : i32 to vector<1x256xi32>
    %94 = arith.addi %1, %93 : vector<1x256xi32>
    %c0_i32_46 = arith.constant 0 : i32
    %95 = vector.broadcast %c0_i32_46 : i32 to vector<1x256xi32>
    %96 = arith.cmpi sge, %94, %95 : vector<1x256xi32>
    %97 = arith.andi %92, %96 : vector<1x256xi1>
    %c0_i32_47 = arith.constant 0 : i32
    %98 = vector.broadcast %c0_i32_47 : i32 to vector<1x256xi32>
    %99 = arith.addi %1, %98 : vector<1x256xi32>
    %c16_i32_48 = arith.constant 16 : i32
    %100 = vector.broadcast %c16_i32_48 : i32 to vector<1x256xi32>
    %101 = arith.cmpi slt, %99, %100 : vector<1x256xi32>
    %102 = arith.andi %97, %101 : vector<1x256xi1>
    %cst_49 = arith.constant 0.000000e+00 : f32
    %103 = vector.shape_cast %102 : vector<1x256xi1> to vector<1x256xi1>
    %104 = vector.broadcast %103 : vector<1x256xi1> to vector<32x256xi1>
    %105 = vector.broadcast %cst_49 : f32 to vector<32x256xf32>
    %106 = arith.select %104, %83, %105 : vector<32x256xi1>, vector<32x256xf32>
    %cst_50 = arith.constant dense<0.000000e+00> : vector<32x256xf32>
    %107 = tpu.matmul %80, %106, %cst_50 {dimension_numbers = #tpu.dot_dimension_numbers<[1], [0], [0], [1], [0, 0, 1, 1], [], []>} : vector<32x32xf32>, vector<32x256xf32>, vector<32x256xf32> -> vector<32x256xf32>
    %c1_51 = arith.constant 1 : index
    %c0_52 = arith.constant 0 : index
    %c0_53 = arith.constant 0 : index
    %108 = vector.load %arg8[%c1_51, %c0_52, %c0_53] : memref<3x32x32xf32, #tpu.memory_space<vmem>>, vector<1x32x32xf32>
    %109 = vector.shape_cast %108 : vector<1x32x32xf32> to vector<32x32xf32>
    %cst_54 = arith.constant dense<0.000000e+00> : vector<32x256xf32>
    %110 = tpu.matmul %109, %78, %cst_54 {dimension_numbers = #tpu.dot_dimension_numbers<[1], [0], [0], [1], [0, 0, 1, 1], [], []>} : vector<32x32xf32>, vector<32x256xf32>, vector<32x256xf32> -> vector<32x256xf32>
    %111 = arith.addf %107, %110 : vector<32x256xf32>
    %c2_55 = arith.constant 2 : index
    %c0_56 = arith.constant 0 : index
    %c0_57 = arith.constant 0 : index
    %112 = vector.load %arg8[%c2_55, %c0_56, %c0_57] : memref<3x32x32xf32, #tpu.memory_space<vmem>>, vector<1x32x32xf32>
    %113 = vector.shape_cast %112 : vector<1x32x32xf32> to vector<32x32xf32>
    %114 = vector.extract_strided_slice %78 {offsets = [0, 16], sizes = [32, 240], strides = [1, 1]} : vector<32x256xf32> to vector<32x240xf32>
    %115 = vector.extract_strided_slice %78 {offsets = [0, 0], sizes = [32, 16], strides = [1, 1]} : vector<32x256xf32> to vector<32x16xf32>
    %116 = tpu.concatenate %114, %115 in 1 : vector<32x240xf32>, vector<32x16xf32> -> vector<32x256xf32>
    %c1_i32_58 = arith.constant 1 : i32
    %117 = vector.broadcast %c1_i32_58 : i32 to vector<1x256xi32>
    %118 = arith.addi %0, %117 : vector<1x256xi32>
    %c0_i32_59 = arith.constant 0 : i32
    %119 = vector.broadcast %c0_i32_59 : i32 to vector<1x256xi32>
    %120 = arith.cmpi sge, %118, %119 : vector<1x256xi32>
    %c1_i32_60 = arith.constant 1 : i32
    %121 = vector.broadcast %c1_i32_60 : i32 to vector<1x256xi32>
    %122 = arith.addi %0, %121 : vector<1x256xi32>
    %c16_i32_61 = arith.constant 16 : i32
    %123 = vector.broadcast %c16_i32_61 : i32 to vector<1x256xi32>
    %124 = arith.cmpi slt, %122, %123 : vector<1x256xi32>
    %125 = arith.andi %120, %124 : vector<1x256xi1>
    %c0_i32_62 = arith.constant 0 : i32
    %126 = vector.broadcast %c0_i32_62 : i32 to vector<1x256xi32>
    %127 = arith.addi %1, %126 : vector<1x256xi32>
    %c0_i32_63 = arith.constant 0 : i32
    %128 = vector.broadcast %c0_i32_63 : i32 to vector<1x256xi32>
    %129 = arith.cmpi sge, %127, %128 : vector<1x256xi32>
    %130 = arith.andi %125, %129 : vector<1x256xi1>
    %c0_i32_64 = arith.constant 0 : i32
    %131 = vector.broadcast %c0_i32_64 : i32 to vector<1x256xi32>
    %132 = arith.addi %1, %131 : vector<1x256xi32>
    %c16_i32_65 = arith.constant 16 : i32
    %133 = vector.broadcast %c16_i32_65 : i32 to vector<1x256xi32>
    %134 = arith.cmpi slt, %132, %133 : vector<1x256xi32>
    %135 = arith.andi %130, %134 : vector<1x256xi1>
    %cst_66 = arith.constant 0.000000e+00 : f32
    %136 = vector.shape_cast %135 : vector<1x256xi1> to vector<1x256xi1>
    %137 = vector.broadcast %136 : vector<1x256xi1> to vector<32x256xi1>
    %138 = vector.broadcast %cst_66 : f32 to vector<32x256xf32>
    %139 = arith.select %137, %116, %138 : vector<32x256xi1>, vector<32x256xf32>
    %cst_67 = arith.constant dense<0.000000e+00> : vector<32x256xf32>
    %140 = tpu.matmul %113, %139, %cst_67 {dimension_numbers = #tpu.dot_dimension_numbers<[1], [0], [0], [1], [0, 0, 1, 1], [], []>} : vector<32x32xf32>, vector<32x256xf32>, vector<32x256xf32> -> vector<32x256xf32>
    %141 = arith.addf %111, %140 : vector<32x256xf32>
    %c0_68 = arith.constant 0 : index
    %c0_69 = arith.constant 0 : index
    %142 = vector.load %arg9[%c0_68, %c0_69] : memref<32x1xf32, #tpu.memory_space<vmem>>, vector<32x1xf32>
    %143 = vector.broadcast %142 : vector<32x1xf32> to vector<32x256xf32>
    %144 = arith.addf %141, %143 : vector<32x256xf32>
    %cst_70 = arith.constant 0.000000e+00 : f32
    %145 = vector.broadcast %cst_70 : f32 to vector<32x256xf32>
    %146 = arith.maximumf %144, %145 : vector<32x256xf32>
    %c0_71 = arith.constant 0 : index
    %c0_72 = arith.constant 0 : index
    %147 = vector.load %arg10[%c0_71, %c0_72] : memref<8x32xf32, #tpu.memory_space<vmem>>, vector<8x32xf32>
    %cst_73 = arith.constant dense<0.000000e+00> : vector<8x256xf32>
    %148 = tpu.matmul %147, %146, %cst_73 {dimension_numbers = #tpu.dot_dimension_numbers<[1], [0], [0], [1], [0, 0, 1, 1], [], []>} : vector<8x32xf32>, vector<32x256xf32>, vector<8x256xf32> -> vector<8x256xf32>
    %c0_74 = arith.constant 0 : index
    %c0_75 = arith.constant 0 : index
    %149 = vector.load %arg11[%c0_74, %c0_75] : memref<8x1xf32, #tpu.memory_space<vmem>>, vector<8x1xf32>
    %150 = vector.broadcast %149 : vector<8x1xf32> to vector<8x256xf32>
    %151 = arith.addf %148, %150 : vector<8x256xf32>
    %c0_76 = arith.constant 0 : index
    %c0_77 = arith.constant 0 : index
    %152 = vector.load %arg12[%c0_76, %c0_77] : memref<8x32xf32, #tpu.memory_space<vmem>>, vector<8x32xf32>
    %cst_78 = arith.constant dense<0.000000e+00> : vector<8x256xf32>
    %153 = tpu.matmul %152, %146, %cst_78 {dimension_numbers = #tpu.dot_dimension_numbers<[1], [0], [0], [1], [0, 0, 1, 1], [], []>} : vector<8x32xf32>, vector<32x256xf32>, vector<8x256xf32> -> vector<8x256xf32>
    %c0_79 = arith.constant 0 : index
    %c0_80 = arith.constant 0 : index
    %154 = vector.load %arg13[%c0_79, %c0_80] : memref<8x1xf32, #tpu.memory_space<vmem>>, vector<8x1xf32>
    %155 = vector.broadcast %154 : vector<8x1xf32> to vector<8x256xf32>
    %156 = arith.addf %153, %155 : vector<8x256xf32>
    %c0_81 = arith.constant 0 : index
    %c0_82 = arith.constant 0 : index
    %157 = vector.load %arg14[%c0_81, %c0_82] : memref<32x32xf32, #tpu.memory_space<vmem>>, vector<32x32xf32>
    %cst_83 = arith.constant dense<0.000000e+00> : vector<32x256xf32>
    %158 = tpu.matmul %157, %146, %cst_83 {dimension_numbers = #tpu.dot_dimension_numbers<[1], [0], [0], [1], [0, 0, 1, 1], [], []>} : vector<32x32xf32>, vector<32x256xf32>, vector<32x256xf32> -> vector<32x256xf32>
    %c0_84 = arith.constant 0 : index
    %c0_85 = arith.constant 0 : index
    %159 = vector.load %arg15[%c0_84, %c0_85] : memref<32x1xf32, #tpu.memory_space<vmem>>, vector<32x1xf32>
    %160 = vector.broadcast %159 : vector<32x1xf32> to vector<32x256xf32>
    %161 = arith.addf %158, %160 : vector<32x256xf32>
    %cst_86 = arith.constant dense<0.000000e+00> : vector<256x256xf32>
    %162 = tpu.matmul %151, %156, %cst_86 {dimension_numbers = #tpu.dot_dimension_numbers<[0], [0], [1], [1], [0, 1, 1, 1], [], []>} : vector<8x256xf32>, vector<8x256xf32>, vector<256x256xf32> -> vector<256x256xf32>
    %cst_87 = arith.constant dense<0xFF800000> : vector<256xf32>
    %163 = vector.multi_reduction <maximumf>, %162, %cst_87 [1] : vector<256x256xf32> to vector<256xf32>
    %164 = vector.shape_cast %163 : vector<256xf32> to vector<256x1xf32>
    %165 = vector.broadcast %164 : vector<256x1xf32> to vector<256x256xf32>
    %166 = arith.subf %162, %165 : vector<256x256xf32>
    %167 = math.exp %166 : vector<256x256xf32>
    %cst_88 = arith.constant dense<0.000000e+00> : vector<32x256xf32>
    %168 = tpu.matmul %161, %167, %cst_88 {dimension_numbers = #tpu.dot_dimension_numbers<[1], [1], [0], [0], [0, 0, 1, 0], [], []>} : vector<32x256xf32>, vector<256x256xf32>, vector<32x256xf32> -> vector<32x256xf32>
    %cst_89 = arith.constant 1.000000e+00 : f32
    %169 = vector.broadcast %cst_89 : f32 to vector<1x256xf32>
    %cst_90 = arith.constant dense<0.000000e+00> : vector<1x256xf32>
    %170 = tpu.matmul %169, %167, %cst_90 {dimension_numbers = #tpu.dot_dimension_numbers<[1], [1], [0], [0], [0, 0, 1, 0], [], []>} : vector<1x256xf32>, vector<256x256xf32>, vector<1x256xf32> -> vector<1x256xf32>
    %171 = vector.broadcast %170 : vector<1x256xf32> to vector<32x256xf32>
    %172 = arith.divf %168, %171 : vector<32x256xf32>
    %cst_91 = arith.constant dense<0.000000e+00> : vector<32x32xf32>
    %173 = tpu.matmul %146, %146, %cst_91 {dimension_numbers = #tpu.dot_dimension_numbers<[1], [1], [0], [0], [0, 0, 1, 0], [], []>} : vector<32x256xf32>, vector<32x256xf32>, vector<32x32xf32> -> vector<32x32xf32>
    %cst_92 = arith.constant dense<0xFF800000> : vector<32xf32>
    %174 = vector.multi_reduction <maximumf>, %173, %cst_92 [1] : vector<32x32xf32> to vector<32xf32>
    %175 = vector.shape_cast %174 : vector<32xf32> to vector<32x1xf32>
    %176 = vector.broadcast %175 : vector<32x1xf32> to vector<32x32xf32>
    %177 = arith.subf %176, %173 : vector<32x32xf32>
    %cst_93 = arith.constant dense<0xFF800000> : vector<32xf32>
    %178 = vector.multi_reduction <maximumf>, %177, %cst_93 [1] : vector<32x32xf32> to vector<32xf32>
    %179 = vector.shape_cast %178 : vector<32xf32> to vector<32x1xf32>
    %180 = vector.broadcast %179 : vector<32x1xf32> to vector<32x32xf32>
    %181 = arith.subf %177, %180 : vector<32x32xf32>
    %182 = math.exp %181 : vector<32x32xf32>
    %cst_94 = arith.constant dense<0.000000e+00> : vector<32xf32>
    %183 = vector.multi_reduction <add>, %182, %cst_94 [1] : vector<32x32xf32> to vector<32xf32>
    %184 = vector.shape_cast %183 : vector<32xf32> to vector<32x1xf32>
    %185 = vector.broadcast %184 : vector<32x1xf32> to vector<32x32xf32>
    %186 = arith.divf %182, %185 : vector<32x32xf32>
    %cst_95 = arith.constant dense<0.000000e+00> : vector<32x256xf32>
    %187 = tpu.matmul %186, %146, %cst_95 {dimension_numbers = #tpu.dot_dimension_numbers<[1], [0], [0], [1], [0, 0, 1, 1], [], []>} : vector<32x32xf32>, vector<32x256xf32>, vector<32x256xf32> -> vector<32x256xf32>
    %c0_96 = arith.constant 0 : index
    %188 = memref.load %arg18[%c0_96] : memref<2xf32, #tpu.memory_space<smem>>
    %c1_97 = arith.constant 1 : index
    %189 = memref.load %arg18[%c1_97] : memref<2xf32, #tpu.memory_space<smem>>
    %190 = vector.broadcast %188 : f32 to vector<32x256xf32>
    %191 = arith.mulf %190, %172 : vector<32x256xf32>
    %192 = vector.broadcast %189 : f32 to vector<32x256xf32>
    %193 = arith.mulf %192, %187 : vector<32x256xf32>
    %194 = arith.addf %191, %193 : vector<32x256xf32>
    %cst_98 = arith.constant 2.000000e+00 : f32
    %195 = vector.broadcast %cst_98 : f32 to vector<32x256xf32>
    %196 = arith.mulf %195, %146 : vector<32x256xf32>
    %197 = arith.addf %194, %196 : vector<32x256xf32>
    %c0_99 = arith.constant 0 : index
    %c0_100 = arith.constant 0 : index
    %c0_101 = arith.constant 0 : index
    %198 = vector.load %arg16[%c0_99, %c0_100, %c0_101] : memref<9x32x32xf32, #tpu.memory_space<vmem>>, vector<1x32x32xf32>
    %199 = vector.shape_cast %198 : vector<1x32x32xf32> to vector<32x32xf32>
    %200 = vector.extract_strided_slice %197 {offsets = [0, 205], sizes = [32, 51], strides = [1, 1]} : vector<32x256xf32> to vector<32x51xf32>
    %201 = vector.extract_strided_slice %197 {offsets = [0, 0], sizes = [32, 205], strides = [1, 1]} : vector<32x256xf32> to vector<32x205xf32>
    %202 = tpu.concatenate %200, %201 in 1 : vector<32x51xf32>, vector<32x205xf32> -> vector<32x256xf32>
    %c-3_i32 = arith.constant -3 : i32
    %203 = vector.broadcast %c-3_i32 : i32 to vector<1x256xi32>
    %204 = arith.addi %0, %203 : vector<1x256xi32>
    %c0_i32_102 = arith.constant 0 : i32
    %205 = vector.broadcast %c0_i32_102 : i32 to vector<1x256xi32>
    %206 = arith.cmpi sge, %204, %205 : vector<1x256xi32>
    %c-3_i32_103 = arith.constant -3 : i32
    %207 = vector.broadcast %c-3_i32_103 : i32 to vector<1x256xi32>
    %208 = arith.addi %0, %207 : vector<1x256xi32>
    %c16_i32_104 = arith.constant 16 : i32
    %209 = vector.broadcast %c16_i32_104 : i32 to vector<1x256xi32>
    %210 = arith.cmpi slt, %208, %209 : vector<1x256xi32>
    %211 = arith.andi %206, %210 : vector<1x256xi1>
    %c-3_i32_105 = arith.constant -3 : i32
    %212 = vector.broadcast %c-3_i32_105 : i32 to vector<1x256xi32>
    %213 = arith.addi %1, %212 : vector<1x256xi32>
    %c0_i32_106 = arith.constant 0 : i32
    %214 = vector.broadcast %c0_i32_106 : i32 to vector<1x256xi32>
    %215 = arith.cmpi sge, %213, %214 : vector<1x256xi32>
    %216 = arith.andi %211, %215 : vector<1x256xi1>
    %c-3_i32_107 = arith.constant -3 : i32
    %217 = vector.broadcast %c-3_i32_107 : i32 to vector<1x256xi32>
    %218 = arith.addi %1, %217 : vector<1x256xi32>
    %c16_i32_108 = arith.constant 16 : i32
    %219 = vector.broadcast %c16_i32_108 : i32 to vector<1x256xi32>
    %220 = arith.cmpi slt, %218, %219 : vector<1x256xi32>
    %221 = arith.andi %216, %220 : vector<1x256xi1>
    %cst_109 = arith.constant 0.000000e+00 : f32
    %222 = vector.shape_cast %221 : vector<1x256xi1> to vector<1x256xi1>
    %223 = vector.broadcast %222 : vector<1x256xi1> to vector<32x256xi1>
    %224 = vector.broadcast %cst_109 : f32 to vector<32x256xf32>
    %225 = arith.select %223, %202, %224 : vector<32x256xi1>, vector<32x256xf32>
    %cst_110 = arith.constant dense<0.000000e+00> : vector<32x256xf32>
    %226 = tpu.matmul %199, %225, %cst_110 {dimension_numbers = #tpu.dot_dimension_numbers<[1], [0], [0], [1], [0, 0, 1, 1], [], []>} : vector<32x32xf32>, vector<32x256xf32>, vector<32x256xf32> -> vector<32x256xf32>
    %c1_111 = arith.constant 1 : index
    %c0_112 = arith.constant 0 : index
    %c0_113 = arith.constant 0 : index
    %227 = vector.load %arg16[%c1_111, %c0_112, %c0_113] : memref<9x32x32xf32, #tpu.memory_space<vmem>>, vector<1x32x32xf32>
    %228 = vector.shape_cast %227 : vector<1x32x32xf32> to vector<32x32xf32>
    %229 = vector.extract_strided_slice %197 {offsets = [0, 208], sizes = [32, 48], strides = [1, 1]} : vector<32x256xf32> to vector<32x48xf32>
    %230 = vector.extract_strided_slice %197 {offsets = [0, 0], sizes = [32, 208], strides = [1, 1]} : vector<32x256xf32> to vector<32x208xf32>
    %231 = tpu.concatenate %229, %230 in 1 : vector<32x48xf32>, vector<32x208xf32> -> vector<32x256xf32>
    %c-3_i32_114 = arith.constant -3 : i32
    %232 = vector.broadcast %c-3_i32_114 : i32 to vector<1x256xi32>
    %233 = arith.addi %0, %232 : vector<1x256xi32>
    %c0_i32_115 = arith.constant 0 : i32
    %234 = vector.broadcast %c0_i32_115 : i32 to vector<1x256xi32>
    %235 = arith.cmpi sge, %233, %234 : vector<1x256xi32>
    %c-3_i32_116 = arith.constant -3 : i32
    %236 = vector.broadcast %c-3_i32_116 : i32 to vector<1x256xi32>
    %237 = arith.addi %0, %236 : vector<1x256xi32>
    %c16_i32_117 = arith.constant 16 : i32
    %238 = vector.broadcast %c16_i32_117 : i32 to vector<1x256xi32>
    %239 = arith.cmpi slt, %237, %238 : vector<1x256xi32>
    %240 = arith.andi %235, %239 : vector<1x256xi1>
    %c0_i32_118 = arith.constant 0 : i32
    %241 = vector.broadcast %c0_i32_118 : i32 to vector<1x256xi32>
    %242 = arith.addi %1, %241 : vector<1x256xi32>
    %c0_i32_119 = arith.constant 0 : i32
    %243 = vector.broadcast %c0_i32_119 : i32 to vector<1x256xi32>
    %244 = arith.cmpi sge, %242, %243 : vector<1x256xi32>
    %245 = arith.andi %240, %244 : vector<1x256xi1>
    %c0_i32_120 = arith.constant 0 : i32
    %246 = vector.broadcast %c0_i32_120 : i32 to vector<1x256xi32>
    %247 = arith.addi %1, %246 : vector<1x256xi32>
    %c16_i32_121 = arith.constant 16 : i32
    %248 = vector.broadcast %c16_i32_121 : i32 to vector<1x256xi32>
    %249 = arith.cmpi slt, %247, %248 : vector<1x256xi32>
    %250 = arith.andi %245, %249 : vector<1x256xi1>
    %cst_122 = arith.constant 0.000000e+00 : f32
    %251 = vector.shape_cast %250 : vector<1x256xi1> to vector<1x256xi1>
    %252 = vector.broadcast %251 : vector<1x256xi1> to vector<32x256xi1>
    %253 = vector.broadcast %cst_122 : f32 to vector<32x256xf32>
    %254 = arith.select %252, %231, %253 : vector<32x256xi1>, vector<32x256xf32>
    %cst_123 = arith.constant dense<0.000000e+00> : vector<32x256xf32>
    %255 = tpu.matmul %228, %254, %cst_123 {dimension_numbers = #tpu.dot_dimension_numbers<[1], [0], [0], [1], [0, 0, 1, 1], [], []>} : vector<32x32xf32>, vector<32x256xf32>, vector<32x256xf32> -> vector<32x256xf32>
    %256 = arith.addf %226, %255 : vector<32x256xf32>
    %c2_124 = arith.constant 2 : index
    %c0_125 = arith.constant 0 : index
    %c0_126 = arith.constant 0 : index
    %257 = vector.load %arg16[%c2_124, %c0_125, %c0_126] : memref<9x32x32xf32, #tpu.memory_space<vmem>>, vector<1x32x32xf32>
    %258 = vector.shape_cast %257 : vector<1x32x32xf32> to vector<32x32xf32>
    %259 = vector.extract_strided_slice %197 {offsets = [0, 211], sizes = [32, 45], strides = [1, 1]} : vector<32x256xf32> to vector<32x45xf32>
    %260 = vector.extract_strided_slice %197 {offsets = [0, 0], sizes = [32, 211], strides = [1, 1]} : vector<32x256xf32> to vector<32x211xf32>
    %261 = tpu.concatenate %259, %260 in 1 : vector<32x45xf32>, vector<32x211xf32> -> vector<32x256xf32>
    %c-3_i32_127 = arith.constant -3 : i32
    %262 = vector.broadcast %c-3_i32_127 : i32 to vector<1x256xi32>
    %263 = arith.addi %0, %262 : vector<1x256xi32>
    %c0_i32_128 = arith.constant 0 : i32
    %264 = vector.broadcast %c0_i32_128 : i32 to vector<1x256xi32>
    %265 = arith.cmpi sge, %263, %264 : vector<1x256xi32>
    %c-3_i32_129 = arith.constant -3 : i32
    %266 = vector.broadcast %c-3_i32_129 : i32 to vector<1x256xi32>
    %267 = arith.addi %0, %266 : vector<1x256xi32>
    %c16_i32_130 = arith.constant 16 : i32
    %268 = vector.broadcast %c16_i32_130 : i32 to vector<1x256xi32>
    %269 = arith.cmpi slt, %267, %268 : vector<1x256xi32>
    %270 = arith.andi %265, %269 : vector<1x256xi1>
    %c3_i32 = arith.constant 3 : i32
    %271 = vector.broadcast %c3_i32 : i32 to vector<1x256xi32>
    %272 = arith.addi %1, %271 : vector<1x256xi32>
    %c0_i32_131 = arith.constant 0 : i32
    %273 = vector.broadcast %c0_i32_131 : i32 to vector<1x256xi32>
    %274 = arith.cmpi sge, %272, %273 : vector<1x256xi32>
    %275 = arith.andi %270, %274 : vector<1x256xi1>
    %c3_i32_132 = arith.constant 3 : i32
    %276 = vector.broadcast %c3_i32_132 : i32 to vector<1x256xi32>
    %277 = arith.addi %1, %276 : vector<1x256xi32>
    %c16_i32_133 = arith.constant 16 : i32
    %278 = vector.broadcast %c16_i32_133 : i32 to vector<1x256xi32>
    %279 = arith.cmpi slt, %277, %278 : vector<1x256xi32>
    %280 = arith.andi %275, %279 : vector<1x256xi1>
    %cst_134 = arith.constant 0.000000e+00 : f32
    %281 = vector.shape_cast %280 : vector<1x256xi1> to vector<1x256xi1>
    %282 = vector.broadcast %281 : vector<1x256xi1> to vector<32x256xi1>
    %283 = vector.broadcast %cst_134 : f32 to vector<32x256xf32>
    %284 = arith.select %282, %261, %283 : vector<32x256xi1>, vector<32x256xf32>
    %cst_135 = arith.constant dense<0.000000e+00> : vector<32x256xf32>
    %285 = tpu.matmul %258, %284, %cst_135 {dimension_numbers = #tpu.dot_dimension_numbers<[1], [0], [0], [1], [0, 0, 1, 1], [], []>} : vector<32x32xf32>, vector<32x256xf32>, vector<32x256xf32> -> vector<32x256xf32>
    %286 = arith.addf %256, %285 : vector<32x256xf32>
    %c3 = arith.constant 3 : index
    %c0_136 = arith.constant 0 : index
    %c0_137 = arith.constant 0 : index
    %287 = vector.load %arg16[%c3, %c0_136, %c0_137] : memref<9x32x32xf32, #tpu.memory_space<vmem>>, vector<1x32x32xf32>
    %288 = vector.shape_cast %287 : vector<1x32x32xf32> to vector<32x32xf32>
    %289 = vector.extract_strided_slice %197 {offsets = [0, 253], sizes = [32, 3], strides = [1, 1]} : vector<32x256xf32> to vector<32x3xf32>
    %290 = vector.extract_strided_slice %197 {offsets = [0, 0], sizes = [32, 253], strides = [1, 1]} : vector<32x256xf32> to vector<32x253xf32>
    %291 = tpu.concatenate %289, %290 in 1 : vector<32x3xf32>, vector<32x253xf32> -> vector<32x256xf32>
    %c0_i32_138 = arith.constant 0 : i32
    %292 = vector.broadcast %c0_i32_138 : i32 to vector<1x256xi32>
    %293 = arith.addi %0, %292 : vector<1x256xi32>
    %c0_i32_139 = arith.constant 0 : i32
    %294 = vector.broadcast %c0_i32_139 : i32 to vector<1x256xi32>
    %295 = arith.cmpi sge, %293, %294 : vector<1x256xi32>
    %c0_i32_140 = arith.constant 0 : i32
    %296 = vector.broadcast %c0_i32_140 : i32 to vector<1x256xi32>
    %297 = arith.addi %0, %296 : vector<1x256xi32>
    %c16_i32_141 = arith.constant 16 : i32
    %298 = vector.broadcast %c16_i32_141 : i32 to vector<1x256xi32>
    %299 = arith.cmpi slt, %297, %298 : vector<1x256xi32>
    %300 = arith.andi %295, %299 : vector<1x256xi1>
    %c-3_i32_142 = arith.constant -3 : i32
    %301 = vector.broadcast %c-3_i32_142 : i32 to vector<1x256xi32>
    %302 = arith.addi %1, %301 : vector<1x256xi32>
    %c0_i32_143 = arith.constant 0 : i32
    %303 = vector.broadcast %c0_i32_143 : i32 to vector<1x256xi32>
    %304 = arith.cmpi sge, %302, %303 : vector<1x256xi32>
    %305 = arith.andi %300, %304 : vector<1x256xi1>
    %c-3_i32_144 = arith.constant -3 : i32
    %306 = vector.broadcast %c-3_i32_144 : i32 to vector<1x256xi32>
    %307 = arith.addi %1, %306 : vector<1x256xi32>
    %c16_i32_145 = arith.constant 16 : i32
    %308 = vector.broadcast %c16_i32_145 : i32 to vector<1x256xi32>
    %309 = arith.cmpi slt, %307, %308 : vector<1x256xi32>
    %310 = arith.andi %305, %309 : vector<1x256xi1>
    %cst_146 = arith.constant 0.000000e+00 : f32
    %311 = vector.shape_cast %310 : vector<1x256xi1> to vector<1x256xi1>
    %312 = vector.broadcast %311 : vector<1x256xi1> to vector<32x256xi1>
    %313 = vector.broadcast %cst_146 : f32 to vector<32x256xf32>
    %314 = arith.select %312, %291, %313 : vector<32x256xi1>, vector<32x256xf32>
    %cst_147 = arith.constant dense<0.000000e+00> : vector<32x256xf32>
    %315 = tpu.matmul %288, %314, %cst_147 {dimension_numbers = #tpu.dot_dimension_numbers<[1], [0], [0], [1], [0, 0, 1, 1], [], []>} : vector<32x32xf32>, vector<32x256xf32>, vector<32x256xf32> -> vector<32x256xf32>
    %316 = arith.addf %286, %315 : vector<32x256xf32>
    %c4 = arith.constant 4 : index
    %c0_148 = arith.constant 0 : index
    %c0_149 = arith.constant 0 : index
    %317 = vector.load %arg16[%c4, %c0_148, %c0_149] : memref<9x32x32xf32, #tpu.memory_space<vmem>>, vector<1x32x32xf32>
    %318 = vector.shape_cast %317 : vector<1x32x32xf32> to vector<32x32xf32>
    %cst_150 = arith.constant dense<0.000000e+00> : vector<32x256xf32>
    %319 = tpu.matmul %318, %197, %cst_150 {dimension_numbers = #tpu.dot_dimension_numbers<[1], [0], [0], [1], [0, 0, 1, 1], [], []>} : vector<32x32xf32>, vector<32x256xf32>, vector<32x256xf32> -> vector<32x256xf32>
    %320 = arith.addf %316, %319 : vector<32x256xf32>
    %c5 = arith.constant 5 : index
    %c0_151 = arith.constant 0 : index
    %c0_152 = arith.constant 0 : index
    %321 = vector.load %arg16[%c5, %c0_151, %c0_152] : memref<9x32x32xf32, #tpu.memory_space<vmem>>, vector<1x32x32xf32>
    %322 = vector.shape_cast %321 : vector<1x32x32xf32> to vector<32x32xf32>
    %323 = vector.extract_strided_slice %197 {offsets = [0, 3], sizes = [32, 253], strides = [1, 1]} : vector<32x256xf32> to vector<32x253xf32>
    %324 = vector.extract_strided_slice %197 {offsets = [0, 0], sizes = [32, 3], strides = [1, 1]} : vector<32x256xf32> to vector<32x3xf32>
    %325 = tpu.concatenate %323, %324 in 1 : vector<32x253xf32>, vector<32x3xf32> -> vector<32x256xf32>
    %c0_i32_153 = arith.constant 0 : i32
    %326 = vector.broadcast %c0_i32_153 : i32 to vector<1x256xi32>
    %327 = arith.addi %0, %326 : vector<1x256xi32>
    %c0_i32_154 = arith.constant 0 : i32
    %328 = vector.broadcast %c0_i32_154 : i32 to vector<1x256xi32>
    %329 = arith.cmpi sge, %327, %328 : vector<1x256xi32>
    %c0_i32_155 = arith.constant 0 : i32
    %330 = vector.broadcast %c0_i32_155 : i32 to vector<1x256xi32>
    %331 = arith.addi %0, %330 : vector<1x256xi32>
    %c16_i32_156 = arith.constant 16 : i32
    %332 = vector.broadcast %c16_i32_156 : i32 to vector<1x256xi32>
    %333 = arith.cmpi slt, %331, %332 : vector<1x256xi32>
    %334 = arith.andi %329, %333 : vector<1x256xi1>
    %c3_i32_157 = arith.constant 3 : i32
    %335 = vector.broadcast %c3_i32_157 : i32 to vector<1x256xi32>
    %336 = arith.addi %1, %335 : vector<1x256xi32>
    %c0_i32_158 = arith.constant 0 : i32
    %337 = vector.broadcast %c0_i32_158 : i32 to vector<1x256xi32>
    %338 = arith.cmpi sge, %336, %337 : vector<1x256xi32>
    %339 = arith.andi %334, %338 : vector<1x256xi1>
    %c3_i32_159 = arith.constant 3 : i32
    %340 = vector.broadcast %c3_i32_159 : i32 to vector<1x256xi32>
    %341 = arith.addi %1, %340 : vector<1x256xi32>
    %c16_i32_160 = arith.constant 16 : i32
    %342 = vector.broadcast %c16_i32_160 : i32 to vector<1x256xi32>
    %343 = arith.cmpi slt, %341, %342 : vector<1x256xi32>
    %344 = arith.andi %339, %343 : vector<1x256xi1>
    %cst_161 = arith.constant 0.000000e+00 : f32
    %345 = vector.shape_cast %344 : vector<1x256xi1> to vector<1x256xi1>
    %346 = vector.broadcast %345 : vector<1x256xi1> to vector<32x256xi1>
    %347 = vector.broadcast %cst_161 : f32 to vector<32x256xf32>
    %348 = arith.select %346, %325, %347 : vector<32x256xi1>, vector<32x256xf32>
    %cst_162 = arith.constant dense<0.000000e+00> : vector<32x256xf32>
    %349 = tpu.matmul %322, %348, %cst_162 {dimension_numbers = #tpu.dot_dimension_numbers<[1], [0], [0], [1], [0, 0, 1, 1], [], []>} : vector<32x32xf32>, vector<32x256xf32>, vector<32x256xf32> -> vector<32x256xf32>
    %350 = arith.addf %320, %349 : vector<32x256xf32>
    %c6 = arith.constant 6 : index
    %c0_163 = arith.constant 0 : index
    %c0_164 = arith.constant 0 : index
    %351 = vector.load %arg16[%c6, %c0_163, %c0_164] : memref<9x32x32xf32, #tpu.memory_space<vmem>>, vector<1x32x32xf32>
    %352 = vector.shape_cast %351 : vector<1x32x32xf32> to vector<32x32xf32>
    %353 = vector.extract_strided_slice %197 {offsets = [0, 45], sizes = [32, 211], strides = [1, 1]} : vector<32x256xf32> to vector<32x211xf32>
    %354 = vector.extract_strided_slice %197 {offsets = [0, 0], sizes = [32, 45], strides = [1, 1]} : vector<32x256xf32> to vector<32x45xf32>
    %355 = tpu.concatenate %353, %354 in 1 : vector<32x211xf32>, vector<32x45xf32> -> vector<32x256xf32>
    %c3_i32_165 = arith.constant 3 : i32
    %356 = vector.broadcast %c3_i32_165 : i32 to vector<1x256xi32>
    %357 = arith.addi %0, %356 : vector<1x256xi32>
    %c0_i32_166 = arith.constant 0 : i32
    %358 = vector.broadcast %c0_i32_166 : i32 to vector<1x256xi32>
    %359 = arith.cmpi sge, %357, %358 : vector<1x256xi32>
    %c3_i32_167 = arith.constant 3 : i32
    %360 = vector.broadcast %c3_i32_167 : i32 to vector<1x256xi32>
    %361 = arith.addi %0, %360 : vector<1x256xi32>
    %c16_i32_168 = arith.constant 16 : i32
    %362 = vector.broadcast %c16_i32_168 : i32 to vector<1x256xi32>
    %363 = arith.cmpi slt, %361, %362 : vector<1x256xi32>
    %364 = arith.andi %359, %363 : vector<1x256xi1>
    %c-3_i32_169 = arith.constant -3 : i32
    %365 = vector.broadcast %c-3_i32_169 : i32 to vector<1x256xi32>
    %366 = arith.addi %1, %365 : vector<1x256xi32>
    %c0_i32_170 = arith.constant 0 : i32
    %367 = vector.broadcast %c0_i32_170 : i32 to vector<1x256xi32>
    %368 = arith.cmpi sge, %366, %367 : vector<1x256xi32>
    %369 = arith.andi %364, %368 : vector<1x256xi1>
    %c-3_i32_171 = arith.constant -3 : i32
    %370 = vector.broadcast %c-3_i32_171 : i32 to vector<1x256xi32>
    %371 = arith.addi %1, %370 : vector<1x256xi32>
    %c16_i32_172 = arith.constant 16 : i32
    %372 = vector.broadcast %c16_i32_172 : i32 to vector<1x256xi32>
    %373 = arith.cmpi slt, %371, %372 : vector<1x256xi32>
    %374 = arith.andi %369, %373 : vector<1x256xi1>
    %cst_173 = arith.constant 0.000000e+00 : f32
    %375 = vector.shape_cast %374 : vector<1x256xi1> to vector<1x256xi1>
    %376 = vector.broadcast %375 : vector<1x256xi1> to vector<32x256xi1>
    %377 = vector.broadcast %cst_173 : f32 to vector<32x256xf32>
    %378 = arith.select %376, %355, %377 : vector<32x256xi1>, vector<32x256xf32>
    %cst_174 = arith.constant dense<0.000000e+00> : vector<32x256xf32>
    %379 = tpu.matmul %352, %378, %cst_174 {dimension_numbers = #tpu.dot_dimension_numbers<[1], [0], [0], [1], [0, 0, 1, 1], [], []>} : vector<32x32xf32>, vector<32x256xf32>, vector<32x256xf32> -> vector<32x256xf32>
    %380 = arith.addf %350, %379 : vector<32x256xf32>
    %c7 = arith.constant 7 : index
    %c0_175 = arith.constant 0 : index
    %c0_176 = arith.constant 0 : index
    %381 = vector.load %arg16[%c7, %c0_175, %c0_176] : memref<9x32x32xf32, #tpu.memory_space<vmem>>, vector<1x32x32xf32>
    %382 = vector.shape_cast %381 : vector<1x32x32xf32> to vector<32x32xf32>
    %383 = vector.extract_strided_slice %197 {offsets = [0, 48], sizes = [32, 208], strides = [1, 1]} : vector<32x256xf32> to vector<32x208xf32>
    %384 = vector.extract_strided_slice %197 {offsets = [0, 0], sizes = [32, 48], strides = [1, 1]} : vector<32x256xf32> to vector<32x48xf32>
    %385 = tpu.concatenate %383, %384 in 1 : vector<32x208xf32>, vector<32x48xf32> -> vector<32x256xf32>
    %c3_i32_177 = arith.constant 3 : i32
    %386 = vector.broadcast %c3_i32_177 : i32 to vector<1x256xi32>
    %387 = arith.addi %0, %386 : vector<1x256xi32>
    %c0_i32_178 = arith.constant 0 : i32
    %388 = vector.broadcast %c0_i32_178 : i32 to vector<1x256xi32>
    %389 = arith.cmpi sge, %387, %388 : vector<1x256xi32>
    %c3_i32_179 = arith.constant 3 : i32
    %390 = vector.broadcast %c3_i32_179 : i32 to vector<1x256xi32>
    %391 = arith.addi %0, %390 : vector<1x256xi32>
    %c16_i32_180 = arith.constant 16 : i32
    %392 = vector.broadcast %c16_i32_180 : i32 to vector<1x256xi32>
    %393 = arith.cmpi slt, %391, %392 : vector<1x256xi32>
    %394 = arith.andi %389, %393 : vector<1x256xi1>
    %c0_i32_181 = arith.constant 0 : i32
    %395 = vector.broadcast %c0_i32_181 : i32 to vector<1x256xi32>
    %396 = arith.addi %1, %395 : vector<1x256xi32>
    %c0_i32_182 = arith.constant 0 : i32
    %397 = vector.broadcast %c0_i32_182 : i32 to vector<1x256xi32>
    %398 = arith.cmpi sge, %396, %397 : vector<1x256xi32>
    %399 = arith.andi %394, %398 : vector<1x256xi1>
    %c0_i32_183 = arith.constant 0 : i32
    %400 = vector.broadcast %c0_i32_183 : i32 to vector<1x256xi32>
    %401 = arith.addi %1, %400 : vector<1x256xi32>
    %c16_i32_184 = arith.constant 16 : i32
    %402 = vector.broadcast %c16_i32_184 : i32 to vector<1x256xi32>
    %403 = arith.cmpi slt, %401, %402 : vector<1x256xi32>
    %404 = arith.andi %399, %403 : vector<1x256xi1>
    %cst_185 = arith.constant 0.000000e+00 : f32
    %405 = vector.shape_cast %404 : vector<1x256xi1> to vector<1x256xi1>
    %406 = vector.broadcast %405 : vector<1x256xi1> to vector<32x256xi1>
    %407 = vector.broadcast %cst_185 : f32 to vector<32x256xf32>
    %408 = arith.select %406, %385, %407 : vector<32x256xi1>, vector<32x256xf32>
    %cst_186 = arith.constant dense<0.000000e+00> : vector<32x256xf32>
    %409 = tpu.matmul %382, %408, %cst_186 {dimension_numbers = #tpu.dot_dimension_numbers<[1], [0], [0], [1], [0, 0, 1, 1], [], []>} : vector<32x32xf32>, vector<32x256xf32>, vector<32x256xf32> -> vector<32x256xf32>
    %410 = arith.addf %380, %409 : vector<32x256xf32>
    %c8 = arith.constant 8 : index
    %c0_187 = arith.constant 0 : index
    %c0_188 = arith.constant 0 : index
    %411 = vector.load %arg16[%c8, %c0_187, %c0_188] : memref<9x32x32xf32, #tpu.memory_space<vmem>>, vector<1x32x32xf32>
    %412 = vector.shape_cast %411 : vector<1x32x32xf32> to vector<32x32xf32>
    %413 = vector.extract_strided_slice %197 {offsets = [0, 51], sizes = [32, 205], strides = [1, 1]} : vector<32x256xf32> to vector<32x205xf32>
    %414 = vector.extract_strided_slice %197 {offsets = [0, 0], sizes = [32, 51], strides = [1, 1]} : vector<32x256xf32> to vector<32x51xf32>
    %415 = tpu.concatenate %413, %414 in 1 : vector<32x205xf32>, vector<32x51xf32> -> vector<32x256xf32>
    %c3_i32_189 = arith.constant 3 : i32
    %416 = vector.broadcast %c3_i32_189 : i32 to vector<1x256xi32>
    %417 = arith.addi %0, %416 : vector<1x256xi32>
    %c0_i32_190 = arith.constant 0 : i32
    %418 = vector.broadcast %c0_i32_190 : i32 to vector<1x256xi32>
    %419 = arith.cmpi sge, %417, %418 : vector<1x256xi32>
    %c3_i32_191 = arith.constant 3 : i32
    %420 = vector.broadcast %c3_i32_191 : i32 to vector<1x256xi32>
    %421 = arith.addi %0, %420 : vector<1x256xi32>
    %c16_i32_192 = arith.constant 16 : i32
    %422 = vector.broadcast %c16_i32_192 : i32 to vector<1x256xi32>
    %423 = arith.cmpi slt, %421, %422 : vector<1x256xi32>
    %424 = arith.andi %419, %423 : vector<1x256xi1>
    %c3_i32_193 = arith.constant 3 : i32
    %425 = vector.broadcast %c3_i32_193 : i32 to vector<1x256xi32>
    %426 = arith.addi %1, %425 : vector<1x256xi32>
    %c0_i32_194 = arith.constant 0 : i32
    %427 = vector.broadcast %c0_i32_194 : i32 to vector<1x256xi32>
    %428 = arith.cmpi sge, %426, %427 : vector<1x256xi32>
    %429 = arith.andi %424, %428 : vector<1x256xi1>
    %c3_i32_195 = arith.constant 3 : i32
    %430 = vector.broadcast %c3_i32_195 : i32 to vector<1x256xi32>
    %431 = arith.addi %1, %430 : vector<1x256xi32>
    %c16_i32_196 = arith.constant 16 : i32
    %432 = vector.broadcast %c16_i32_196 : i32 to vector<1x256xi32>
    %433 = arith.cmpi slt, %431, %432 : vector<1x256xi32>
    %434 = arith.andi %429, %433 : vector<1x256xi1>
    %cst_197 = arith.constant 0.000000e+00 : f32
    %435 = vector.shape_cast %434 : vector<1x256xi1> to vector<1x256xi1>
    %436 = vector.broadcast %435 : vector<1x256xi1> to vector<32x256xi1>
    %437 = vector.broadcast %cst_197 : f32 to vector<32x256xf32>
    %438 = arith.select %436, %415, %437 : vector<32x256xi1>, vector<32x256xf32>
    %cst_198 = arith.constant dense<0.000000e+00> : vector<32x256xf32>
    %439 = tpu.matmul %412, %438, %cst_198 {dimension_numbers = #tpu.dot_dimension_numbers<[1], [0], [0], [1], [0, 0, 1, 1], [], []>} : vector<32x32xf32>, vector<32x256xf32>, vector<32x256xf32> -> vector<32x256xf32>
    %440 = arith.addf %410, %439 : vector<32x256xf32>
    %c0_199 = arith.constant 0 : index
    %c0_200 = arith.constant 0 : index
    %441 = vector.load %arg17[%c0_199, %c0_200] : memref<32x1xf32, #tpu.memory_space<vmem>>, vector<32x1xf32>
    %442 = vector.broadcast %441 : vector<32x1xf32> to vector<32x256xf32>
    %443 = arith.addf %440, %442 : vector<32x256xf32>
    %cst_201 = arith.constant 0.000000e+00 : f32
    %444 = vector.broadcast %cst_201 : f32 to vector<32x256xf32>
    %445 = arith.maximumf %443, %444 : vector<32x256xf32>
    %c0_202 = arith.constant 0 : index
    %c0_203 = arith.constant 0 : index
    %c0_204 = arith.constant 0 : index
    %446 = vector.load %arg19[%c0_202, %c0_203, %c0_204] : memref<1x32x256xf32, #tpu.memory_space<vmem>>, vector<1x32x256xf32>
    %447 = vector.shape_cast %446 : vector<1x32x256xf32> to vector<32x256xf32>
    %448 = vector.shape_cast %445 : vector<32x256xf32> to vector<1x32x256xf32>
    tpu.vector_store %arg19[%c0_202, %c0_203, %c0_204], %448 {strides = array<i32>} : memref<1x32x256xf32, #tpu.memory_space<vmem>>, vector<1x32x256xf32>,
    return
  }
  func.func @transform_0(%arg0: i32) -> (i32, i32, i32) {
    %c0_i32 = arith.constant 0 : i32
    %c0_i32_0 = arith.constant 0 : i32
    %c0_i32_1 = arith.constant 0 : i32
    return %arg0, %c0_i32, %c0_i32_0 : i32, i32, i32
  }
  func.func @transform_1(%arg0: i32) -> (i32, i32) {
    %c0_i32 = arith.constant 0 : i32
    %c0_i32_0 = arith.constant 0 : i32
    %c0_i32_1 = arith.constant 0 : i32
    return %c0_i32, %c0_i32_0 : i32, i32
  }
  func.func @transform_2(%arg0: i32) -> (i32, i32) {
    %c0_i32 = arith.constant 0 : i32
    %c0_i32_0 = arith.constant 0 : i32
    %c0_i32_1 = arith.constant 0 : i32
    return %c0_i32, %c0_i32_0 : i32, i32
  }
  func.func @transform_3(%arg0: i32) -> (i32, i32) {
    %c0_i32 = arith.constant 0 : i32
    %c0_i32_0 = arith.constant 0 : i32
    %c0_i32_1 = arith.constant 0 : i32
    return %c0_i32, %c0_i32_0 : i32, i32
  }
  func.func @transform_4(%arg0: i32) -> (i32, i32) {
    %c0_i32 = arith.constant 0 : i32
    %c0_i32_0 = arith.constant 0 : i32
    %c0_i32_1 = arith.constant 0 : i32
    return %c0_i32, %c0_i32_0 : i32, i32
  }
  func.func @transform_5(%arg0: i32) -> (i32, i32, i32) {
    %c0_i32 = arith.constant 0 : i32
    %c0_i32_0 = arith.constant 0 : i32
    %c0_i32_1 = arith.constant 0 : i32
    %c0_i32_2 = arith.constant 0 : i32
    return %c0_i32, %c0_i32_0, %c0_i32_1 : i32, i32, i32
  }
  func.func @transform_6(%arg0: i32) -> (i32, i32) {
    %c0_i32 = arith.constant 0 : i32
    %c0_i32_0 = arith.constant 0 : i32
    %c0_i32_1 = arith.constant 0 : i32
    return %c0_i32, %c0_i32_0 : i32, i32
  }
  func.func @transform_7(%arg0: i32) -> (i32, i32, i32) {
    %c0_i32 = arith.constant 0 : i32
    %c0_i32_0 = arith.constant 0 : i32
    %c0_i32_1 = arith.constant 0 : i32
    %c0_i32_2 = arith.constant 0 : i32
    return %c0_i32, %c0_i32_0, %c0_i32_1 : i32, i32, i32
  }
  func.func @transform_8(%arg0: i32) -> (i32, i32) {
    %c0_i32 = arith.constant 0 : i32
    %c0_i32_0 = arith.constant 0 : i32
    %c0_i32_1 = arith.constant 0 : i32
    return %c0_i32, %c0_i32_0 : i32, i32
  }
  func.func @transform_9(%arg0: i32) -> (i32, i32) {
    %c0_i32 = arith.constant 0 : i32
    %c0_i32_0 = arith.constant 0 : i32
    %c0_i32_1 = arith.constant 0 : i32
    return %c0_i32, %c0_i32_0 : i32, i32
  }
  func.func @transform_10(%arg0: i32) -> (i32, i32) {
    %c0_i32 = arith.constant 0 : i32
    %c0_i32_0 = arith.constant 0 : i32
    %c0_i32_1 = arith.constant 0 : i32
    return %c0_i32, %c0_i32_0 : i32, i32
  }
  func.func @transform_11(%arg0: i32) -> (i32, i32) {
    %c0_i32 = arith.constant 0 : i32
    %c0_i32_0 = arith.constant 0 : i32
    %c0_i32_1 = arith.constant 0 : i32
    return %c0_i32, %c0_i32_0 : i32, i32
  }
  func.func @transform_12(%arg0: i32) -> (i32, i32) {
    %c0_i32 = arith.constant 0 : i32
    %c0_i32_0 = arith.constant 0 : i32
    %c0_i32_1 = arith.constant 0 : i32
    return %c0_i32, %c0_i32_0 : i32, i32
  }
  func.func @transform_13(%arg0: i32) -> (i32, i32) {
    %c0_i32 = arith.constant 0 : i32
    %c0_i32_0 = arith.constant 0 : i32
    %c0_i32_1 = arith.constant 0 : i32
    return %c0_i32, %c0_i32_0 : i32, i32
  }
  func.func @transform_14(%arg0: i32) -> (i32, i32) {
    %c0_i32 = arith.constant 0 : i32
    %c0_i32_0 = arith.constant 0 : i32
    %c0_i32_1 = arith.constant 0 : i32
    return %c0_i32, %c0_i32_0 : i32, i32
  }
  func.func @transform_15(%arg0: i32) -> (i32, i32, i32) {
    %c0_i32 = arith.constant 0 : i32
    %c0_i32_0 = arith.constant 0 : i32
    %c0_i32_1 = arith.constant 0 : i32
    %c0_i32_2 = arith.constant 0 : i32
    return %c0_i32, %c0_i32_0, %c0_i32_1 : i32, i32, i32
  }
  func.func @transform_16(%arg0: i32) -> (i32, i32) {
    %c0_i32 = arith.constant 0 : i32
    %c0_i32_0 = arith.constant 0 : i32
    %c0_i32_1 = arith.constant 0 : i32
    return %c0_i32, %c0_i32_0 : i32, i32
  }
  func.func @transform_17(%arg0: i32) -> i32 {
    %c0_i32 = arith.constant 0 : i32
    %c0_i32_0 = arith.constant 0 : i32
    return %c0_i32 : i32
  }
  func.func @transform_18(%arg0: i32) -> (i32, i32, i32) {
    %c0_i32 = arith.constant 0 : i32
    %c0_i32_0 = arith.constant 0 : i32
    %c0_i32_1 = arith.constant 0 : i32
    return %arg0, %c0_i32, %c0_i32_0 : i32, i32, i32
  }
}

</mosaic_0001>

<bundles_post_ra>
// kernel: _lambda_.1
= control target key start
LH: loop header
LB: loop body
LE: loop exit
PB: predicated region body
PF: predicated region fallthrough
CT: control target
= control target key end

     0   :  { %s7862_s0 = inlined_call_operand.vmem [shape: f32[2,4,256], index: 0, kind: input, shape index: {}]   ;;  %s7863_s1 = inlined_call_operand.vmem [shape: s32[1,256], index: 1, kind: input, shape index: {}]   ;;  %s7864_s2 = inlined_call_operand.vmem [shape: s32[1,256], index: 2, kind: input, shape index: {}]   ;;  %s7865_s3 = inlined_call_operand.vmem [shape: f32[32,4], index: 3, kind: input, shape index: {}]   ;;  %s7866_s4 = inlined_call_operand.vmem [shape: f32[32,1], index: 4, kind: input, shape index: {}, may-alias: {4,6,8,14,16}]   ;;  %s7867_s5 = inlined_call_operand.vmem [shape: f32[3,32,32], index: 5, kind: input, shape index: {}]   ;;  %s7868_s6 = inlined_call_operand.vmem [shape: f32[32,1], index: 6, kind: input, shape index: {}, may-alias: {4,6,8,14,16}]   ;;  %s7869_s7 = inlined_call_operand.vmem [shape: f32[3,32,32], index: 7, kind: input, shape index: {}]   ;;  %s7870_s8 = inlined_call_operand.vmem [shape: f32[32,1], index: 8, kind: input, shape index: {}, may-alias: {4,6,8,14,16}]   ;;  %s7871_s9 = inlined_call_operand.hbm [shape: f32[8,32], index: 9, kind: input, shape index: {}]   ;;  %s7872_s10 = inlined_call_operand.vmem [shape: f32[8,1], index: 10, kind: input, shape index: {}, may-alias: {10,12}]   ;;  %s7873_s11 = inlined_call_operand.vmem [shape: f32[8,32], index: 11, kind: input, shape index: {}]   ;;  %s7874_s12 = inlined_call_operand.vmem [shape: f32[8,1], index: 12, kind: input, shape index: {}, may-alias: {10,12}]   ;;  %s7875_s13 = inlined_call_operand.hbm [shape: f32[32,32], index: 13, kind: input, shape index: {}]   ;;  %s7876_s14 = inlined_call_operand.vmem [shape: f32[32,1], index: 14, kind: input, shape index: {}, may-alias: {4,6,8,14,16}]   ;;  %s7877_s15 = inlined_call_operand.hbm [shape: f32[9,32,32], index: 15, kind: input, shape index: {}]   ;;  %s7878_s16 = inlined_call_operand.vmem [shape: f32[32,1], index: 16, kind: input, shape index: {}, may-alias: {4,6,8,14,16}]   ;;  %s7879_s17 = inlined_call_operand.hbm [shape: f32[2], index: 17, kind: input, shape index: {}]   ;;  %s7880_s18 = inlined_call_operand.vmem [shape: f32[2,32,256], index: 18, kind: output, shape index: {}]  }
   0x1   :  { %7936 = sst [smem:[#allocation50_spill]] %s7862_s0 }
   0x2   :  { %7937 = sst [smem:[#allocation51_spill]] %s7863_s1 }
   0x3   :  { %7938 = sst [smem:[#allocation52_spill]] %s7864_s2 }
   0x4   :  { %7939 = sst [smem:[#allocation53_spill]] %s7876_s14 }
   0x5   :  { %7940 = sst [smem:[#allocation54_spill]] %s7878_s16 }
   0x6   :  { %7941 = sst [smem:[#allocation55_spill]] %s7880_s18 }
   0x7   :  { %23 = vsyncpa [#allocation3], 0 }
   0x8   :  { %24 = vsyncpa [#allocation6], 0 }
   0x9   :  { %25 = vsyncpa [#allocation4], 0  ;;  %s6252_s27 = smov 0  }
   0xa LB: > { %7942 = sst [smem:[#allocation12_spill]] %s6134_s27  ;;  %s6136_s28 = smov [#allocation5]   ;;  %s6134_s27 = sphi %s6252_s27, %s31_s27  }
   0xb   : > { %s501_s29 = sshll.u32 %s6136_s28, 4  ;;  %s6258_s30 = sadd.s32 4294967295, %s6134_s27   ;;  %s6267_s29 = int_to_ptr.vmem [resolvable:$true] %s501_s29 }
   0xc   : > { %p4884_p0 = scmp.ge.s32.totalorder %s6134_s27, 1  ;;  %p445_p1 = scmp.lt.s32.totalorder %s6134_s27, 3 }
   0xd   : > { %p5589_p2 = scmp.eq.s32.totalorder %s6258_s30, 0  ;;  %s6137_s19 = smov [#allocation2]  }
   0xe   : > { %p6263_p3 = pnand %p4884_p0, %p445_p1  ;;  %s482_s1 = sshll.u32 %s6137_s19, 4  ;;  %s6277_s1 = int_to_ptr.vmem [resolvable:$true] %s482_s1 }
   0xf   : > { %s6138_s21 = smov [#allocation7]   ;;  %s6019_s24 = scalar_lea.hbm %s7875_s13, 512 }
  0x10   : > { %p5576_p4 = pneg %p6263_p3  ;;  %s517_s22 = sshll.u32 %s6138_s21, 4  ;;  %s6279_s22 = int_to_ptr.vmem [resolvable:$true] %s517_s22 }
  0x11   : > { %p6020_p6 = scmp.ne.s32.totalorder %s7875_s13, %s6019_s24  ;;  %p6026_p10 = scmp.lt.u32.totalorder %s6019_s24, %s7875_s13 }
  0x12   : > { %p6273_p5 = pnand %p5589_p2, %p5576_p4 }
  0x14   : > { %p6289_p7 = pneg %p6273_p5 }
  0x16   : > { %p6022_p8 = pnand %p6289_p7, %p6020_p6 }
  0x18   : > { %p6023_p9 = pneg %p6022_p8 }
  0x1a   : > { %p6028_p11 = pnand %p6026_p10, %p6023_p9 }
  0x1c   : > { %6031 = shalt.err (!%p6028_p11)
}
  0x1d   : > { %s6032_s2 = scalar_lea.vmem %s6267_s29, 512  ;;  %p6040_p1 = scmp.lt.s32.totalorder %s6267_s29, %s6267_s29 }
  0x1e   : > { %p6033_p12 = scmp.ne.s32.totalorder %s6267_s29, %s6032_s2  ;;  %p6041_p4 = scmp.lt.s32.totalorder %s6032_s2, %s6032_s2 }
  0x20   : > { %p6035_p13 = pnand %p6033_p12, %p6289_p7  ;;  %p6042_p6 = por %p6041_p4, %p6040_p1 }
  0x22   : > { %p6036_p0 = pneg %p6035_p13 }
  0x24   : > { %p6043_p8 = pnand %p6042_p6, %p6036_p0 }
  0x26   : > { %6046 = shalt.err (!%p6043_p8)
}
  0x27   : > { %s6139_s23 = smov 128   ;;  %s6140_s24 = smov 8  }
  0x28   : > { %5582 = dma.hbm_to_vmem [thread:$0]  (!%p6273_p5), %s7875_s13, 512, %s6267_s29, [#allocation6], %s6139_s23, %s6139_s23, %s6140_s24  }
  0x29   : > { %s6047_s2 = scalar_lea.hbm %s7871_s9, 128 }
  0x2a   : > { %p6048_p9 = scmp.ne.s32.totalorder %s7871_s9, %s6047_s2  ;;  %p6054_p12 = scmp.lt.u32.totalorder %s6047_s2, %s7871_s9 }
  0x2c   : > { %p6050_p10 = pnand %p6048_p9, %p6289_p7 }
  0x2e   : > { %p6051_p11 = pneg %p6050_p10 }
  0x30   : > { %p6056_p13 = pnand %p6054_p12, %p6051_p11 }
  0x32   : > { %6059 = shalt.err (!%p6056_p13)
}
  0x33   : > { %s6060_s29 = scalar_lea.vmem %s6277_s1, 128  ;;  %p6068_p6 = scmp.lt.s32.totalorder %s6277_s1, %s6277_s1 }
  0x34   : > { %p6061_p0 = scmp.ne.s32.totalorder %s6277_s1, %s6060_s29  ;;  %p6069_p8 = scmp.lt.s32.totalorder %s6060_s29, %s6060_s29 }
  0x36   : > { %p6063_p1 = pnand %p6061_p0, %p6289_p7  ;;  %p6070_p9 = por %p6069_p8, %p6068_p6 }
  0x38   : > { %p6064_p4 = pneg %p6063_p1 }
  0x3a   : > { %p6071_p10 = pnand %p6070_p9, %p6064_p4 }
  0x3c   : > { %6074 = shalt.err (!%p6071_p10)
}
  0x3d   : > { %5579 = dma.hbm_to_vmem [thread:$0]  (!%p6273_p5), %s7871_s9, 128, %s6277_s1, [#allocation3]  }
  0x3e   : > { %s6075_s25 = scalar_lea.hbm %s7877_s15, 4608 }
  0x3f   : > { %p6076_p11 = scmp.ne.s32.totalorder %s7877_s15, %s6075_s25  ;;  %p6082_p0 = scmp.lt.u32.totalorder %s6075_s25, %s7877_s15 }
  0x41   : > { %p6078_p12 = pnand %p6076_p11, %p6289_p7 }
  0x43   : > { %p6079_p13 = pneg %p6078_p12 }
  0x45   : > { %p6084_p1 = pnand %p6082_p0, %p6079_p13 }
  0x47   : > { %6087 = shalt.err (!%p6084_p1)
}
  0x48   : > { %s6088_s1 = scalar_lea.vmem %s6279_s22, 4608  ;;  %p6096_p9 = scmp.lt.s32.totalorder %s6279_s22, %s6279_s22 }
  0x49   : > { %p6089_p4 = scmp.ne.s32.totalorder %s6279_s22, %s6088_s1  ;;  %p6097_p10 = scmp.lt.s32.totalorder %s6088_s1, %s6088_s1 }
  0x4b   : > { %p6091_p6 = pnand %p6089_p4, %p6289_p7  ;;  %p6098_p11 = por %p6097_p10, %p6096_p9 }
  0x4d   : > { %p6092_p8 = pneg %p6091_p6 }
  0x4f   : > { %p6099_p12 = pnand %p6098_p11, %p6092_p8 }
  0x51   : > { %6102 = shalt.err (!%p6099_p12)
}
  0x52   : > { %5585 = dma.hbm_to_vmem [thread:$0]  (!%p6273_p5), %s7877_s15, 4608, %s6279_s22, [#allocation6], %s6139_s23, %s6139_s23, %s6140_s24  }
  0x53   : > { %s6103_s27 = scalar_lea.hbm %s7879_s17, 16 }
  0x54   : > { %p6104_p13 = scmp.ne.s32.totalorder %s7879_s17, %s6103_s27  ;;  %p6110_p4 = scmp.lt.u32.totalorder %s6103_s27, %s7879_s17 }
  0x56   : > { %p6106_p0 = pnand %p6104_p13, %p6289_p7 }
  0x58   : > { %p6107_p1 = pneg %p6106_p0 }
  0x5a   : > { %p6112_p6 = pnand %p6110_p4, %p6107_p1 }
  0x5c   : > { %6115 = shalt.err (!%p6112_p6)
}
  0x5d   : > { %s6141_s2 = smov [#allocation8]   ;;  %553 = sbr.rel (%p6263_p3) target bundleno = 3351 (0xd17), region = 92 }
  0x5e   : > { %5588 = dma.hbm_to_smem (!%p6273_p5), %s7879_s17, 16, %s6141_s2, [#allocation4]  }
  0x64   : > { %6121 = dma.done.wait (%p5589_p2), [#allocation3], 128  }
  0x65   : > { %6123 = vsyncadd (%p5589_p2), [#allocation3], 4294967168 }
  0x66   : > { %6125 = dma.done.wait (%p5589_p2), [#allocation6], 5120  }
  0x67   : > { %6127 = vsyncadd (%p5589_p2), [#allocation6], 4294962176 }
  0x68   : > { %6129 = dma.done.wait (%p5589_p2), [#allocation4], 16  }
  0x69   : > { %6131 = vsyncadd (%p5589_p2), [#allocation4], 4294967280 }
  0x6a   : > { %571 = sfence }
  0x6b   : > { %p620_p3 = scmp.lt.s32.totalorder %s6258_s30, 1  ;;  %v7888_v0 = vmov 0.0   ;;  %v637_v1 = vld [vmem:[%s7866_s4] sm:$0xff]  ;;  %v7886_v2 = vmov 0   ;;  %v639_v3 = vld [vmem:[%s7866_s4 + $0x10] sm:$0xff]  ;;  %v638_v4 = vld [vmem:[%s7866_s4 + $0x8] sm:$0xff] }
  0x6c   : > { %745 = vmatprep.mubr.f32.mxu0 %v7888_v0  ;;  %1850 = vmatprep.mubr.f32.mxu1 %v7888_v0  ;;  %v640_v5 = vld [vmem:[%s7866_s4 + $0x18] sm:$0xff]  ;;  %s7946_s26 = sld [smem:[#allocation50_spill]]  ;;  %vm676_vm0 = vcmask 1043456   ;;  %v632_v8 = vld [vmem:[%s7865_s3] sm:$0xff]  ;;  %vm663_vm1 = vcmask 31744   ;;  %v633_v9 = vld [vmem:[%s7865_s3 + $0x8] sm:$0xff] }
  0x6d   : > { %s8087_s30 = smov (!%p620_p3, %s6258_s30), 1  ;;  %5626 = vset.pattern.permute.xlu0 %v7886_v2  ;;  %5627 = vset.pattern.permute.xlu1 %v7886_v2  ;;  %v634_v10 = vld [vmem:[%s7865_s3 + $0x10] sm:$0xff]  ;;  %v635_v11 = vld [vmem:[%s7865_s3 + $0x18] sm:$0xff]  ;;  %v4905_v52 = vld [vmem:[%s7867_s5 + $0x20] sm:$0xff]  ;;  %vm859_vm2 = vcmask 261120   ;;  %s6145_s16 = smov 127  }
  0x6e   : > { %643 = vperm.xlu0 %5626, %v637_v1   ;;  %653 = vperm.xlu1 %5627, %v639_v3   ;;  %s5122_s1 = sshll.u32 %s8087_s30, 3  ;;  %v4906_v53 = vld [vmem:[%s7867_s5 + $0x28] sm:$0xff]  ;;  %v1237_v55 = vld [vmem:[%s7868_s6] sm:$0xff]  ;;  %v4907_v56 = vld [vmem:[%s7867_s5 + $0x30] sm:$0xff]  ;;  %s7949_s25 = sld [smem:[#allocation51_spill]]  ;;  %v7950_v63 = vmov 0  ;;  %v836_v1 = vlaneseq }
  0x6f   : > { %v1238_v54 = vld [vmem:[%s7868_s6 + $0x8] sm:$0xff]  ;;  %v1240_v57 = vld [vmem:[%s7868_s6 + $0x18] sm:$0xff]  ;;  %v1239_v58 = vld [vmem:[%s7868_s6 + $0x10] sm:$0xff]  ;;  %vm810_vm14 = vcmask 7168   ;;  %s6147_s22 = smov 112   ;;  %s7996_s18 = sld [smem:[#allocation53_spill]] }
  0x70   : > { %v4908_v59 = vld [vmem:[%s7867_s5 + $0x38] sm:$0xff]  ;;  %v837_v3 = vshrl.u32 %v836_v1, 7  ;;  %s3197_s23 = sld [smem:[#allocation8]]  ;;  %s5019_s0 = sld [smem:[#allocation8 + $0x1]] }
  0x71   : > { %s6149_s20 = smov 48   ;;  %s6150_s28 = smov 51  }
  0x72   : > { %s624_s19 = scalar_lea.vmem %s7946_s26, %s5122_s1  ;;  %648 = vperm.xlu0 %5626, %v638_v4   ;;  %658 = vperm.xlu1 %5627, %v640_v5   ;;  %s6144_s1 = smov 1   ;;  %v6484_v5 = vsub.s32 1, %v837_v3 }
  0x73   : > { %v636_v6 = vld [vmem:[%s624_s19] sm:$0xff]  ;;  %s6146_s19 = smov 16   ;;  %s6151_s24 = smov 45  }
  0x74   : > { %v662_v7 = vcombine.high %v636_v6, %v636_v6  ;;  %v6472_v61 = vld [vmem:[%s7949_s25] sm:$0x3]  ;;  %7953 = vst [vmem:[#allocation15_spill] sm:$0xff] %v6484_v5  ;;  %s6153_s29 = smov 125   ;;  %s6154_s14 = smov 83  }
  0x75   : > { %vm827_vm3 = vcmp.ge.s32.totalorder %v6472_v61, 0  ;;  %vm828_vm4 = vcmp.lt.s32.totalorder %v6472_v61, 16  ;;  %s6155_s27 = smov 80   ;;  %s6156_s26 = smov 77  }
  0x76   : > { %4899 = vmatprep.subr.msk.mxu0 %vm676_vm0, %v662_v7  ;;  %vm6477_vm5 = vmand %vm827_vm3, %vm828_vm4  ;;  %v6487_v7 = vsub.s32 0, %v837_v3  ;;  %vm1083_vm4 = vcmask 1039360   ;;  %s8040_s2 = sld [smem:[#allocation54_spill]] }
  0x77   : > { %4900 = vmatpush1.msk.msra.mxu0 %vm676_vm0, %v636_v6  ;;  %v7951_v63 = vsel %vm6477_vm5, 4294967295, %v7950_v63 }
  0x78   : > { %4901 = vmatmul.mubr.msk.f32.vlgmr.msra.gmra.mrb[0].mxu0 %vm663_vm1, %v632_v8  ;;  %7952 = vst [vmem:[#allocation14_spill] sm:$0xff] %v7951_v63  ;;  %7954 = vst [vmem:[#allocation16_spill] sm:$0xff] %v6487_v7 }
  0x79   : > { %751 = vmatprep.mubr.f32.mxu0 %v7888_v0 }
  0x7c   : > { %4902 = vmatmul.mubr.msk.f32.gmra.mrb[2].mxu0 %vm663_vm1, %v633_v9 }
  0x7d   : > { %757 = vmatprep.mubr.f32.mxu0 %v7888_v0 }
  0x80   : > { %4903 = vmatmul.mubr.msk.f32.gmra.mrb[4].mxu0 %vm663_vm1, %v634_v10 }
  0x81   : > { %763 = vmatprep.mubr.f32.mxu0 %v7888_v0 }
  0x84   : > { %4904 = vmatmul.mubr.msk.f32.gmra.mrb[6].mxu0 %vm663_vm1, %v635_v11 }
  0x85   : > { %936 = vmatprep.mubr.f32.mxu0 %v7888_v0 }
  0xed   : > { %v644_v12 = vpop.permute.xlu0 %643  ;;  %v654_v23 = vpop.permute.xlu1 %653 }
  0xf1   : > { %v649_v16 = vpop.permute.xlu0 %648  ;;  %v659_v38 = vpop.permute.xlu1 %658 }
 0x14b   : > { %v747_v13 = vpop.f32.mrb[0].mxu0 }
 0x14c   : > { %v748_v14 = vadd.f32 %v747_v13, %v644_v12  ;;  %v749_v15 = vpop.f32.mrb[1].mxu0 }
 0x14d   : > { %v750_v17 = vadd.f32 %v749_v15, %v644_v12 }
 0x14e   : > { %v770_v18 = vmax.f32 %v748_v14, 0.0  ;;  %v4927_v14 = vld [vmem:[%s7867_s5 + $0x50] sm:$0xff] }
 0x14f   : > { %v771_v19 = vmax.f32 %v750_v17, 0.0  ;;  %v753_v20 = vpop.f32.mrb[2].mxu0 }
 0x150   : > { %v754_v21 = vadd.f32 %v753_v20, %v649_v16  ;;  %v755_v22 = vpop.f32.mrb[3].mxu0 }
 0x151   : > { %v756_v24 = vadd.f32 %v755_v22, %v649_v16  ;;  %v5648_v25 = vpack.i.bf16 %v771_v19, %v770_v18 }
 0x152   : > { %v772_v26 = vmax.f32 %v754_v21, 0.0 }
 0x153   : > { %v773_v27 = vmax.f32 %v756_v24, 0.0  ;;  %v759_v28 = vpop.f32.mrb[4].mxu0 }
 0x154   : > { %v5126_v29 = vpack.c.bf16 %v772_v26, %v770_v18  ;;  %v760_v30 = vadd.f32 %v759_v28, %v654_v23  ;;  %v761_v31 = vpop.f32.mrb[5].mxu0  ;;  %v5628_v32 = vpack.i.bf16 %v772_v26, %v770_v18 }
 0x155   : > { %v762_v33 = vadd.f32 %v761_v31, %v654_v23  ;;  %v5633_v34 = vpack.i.bf16 %v773_v27, %v771_v19  ;;  %v5124_v35 = vpack.c.bf16 %v773_v27, %v771_v19  ;;  %v5653_v36 = vpack.i.bf16 %v773_v27, %v772_v26 }
 0x156   : > { %v774_v37 = vmax.f32 %v760_v30, 0.0  ;;  %5629 = vrot.lane.b32.xlu1 %v5628_v32, %s6144_s1 }
 0x157   : > { %v775_v39 = vmax.f32 %v762_v33, 0.0  ;;  %v765_v40 = vpop.f32.mrb[6].mxu0  ;;  %5634 = vrot.lane.b32.xlu0 %v5633_v34, %s6144_s1  ;;  %5125 = vmatprep.subr.bf16.mxu0 %v5124_v35 }
 0x158   : > { %v766_v41 = vadd.f32 %v765_v40, %v659_v38  ;;  %v767_v42 = vpop.f32.mrb[7].mxu0  ;;  %5127 = vmatpush1.bf16.msra.mxu0 %v5126_v29 }
 0x159   : > { %v768_v43 = vadd.f32 %v767_v42, %v659_v38  ;;  %v5658_v44 = vpack.i.bf16 %v775_v39, %v774_v37 }
 0x15a   : > { %v776_v45 = vmax.f32 %v766_v41, 0.0 }
 0x15b   : > { %v777_v46 = vmax.f32 %v768_v43, 0.0 }
 0x15c   : > { %v5130_v47 = vpack.c.bf16 %v776_v45, %v774_v37  ;;  %v5643_v48 = vpack.i.bf16 %v776_v45, %v774_v37 }
 0x15d   : > { %v5638_v49 = vpack.i.bf16 %v777_v46, %v775_v39  ;;  %v5128_v50 = vpack.c.bf16 %v777_v46, %v775_v39  ;;  %v5663_v51 = vpack.i.bf16 %v777_v46, %v776_v45 }
 0x15e   : > { %5644 = vrot.lane.b32.xlu1 %v5643_v48, %s6144_s1 }
 0x15f   : > { %5639 = vrot.lane.b32.xlu0 %v5638_v49, %s6144_s1  ;;  %5129 = vmatprep.subr.bf16.mxu0 %v5128_v50  ;;  %s6152_s1 = smov 3  }
 0x160   : > { %5131 = vmatpush1.bf16.msra.mxu0 %v5130_v47 }
 0x162   : > { %5654 = vrot.lane.b32.xlu1 %v5653_v36, %s6145_s16 }
 0x163   : > { %5649 = vrot.lane.b32.xlu0 %v5648_v25, %s6145_s16  ;;  %4909 = vmatmul.mubr.msk.f32.vlgmr.msra.gmra.mrb[8].mxu0 %vm859_vm2, %v4905_v52  ;;  %v778_v52 = vld [vmem:[%s7867_s5] sm:$0xff] }
 0x164   : > { %942 = vmatprep.mubr.f32.mxu0 %v7888_v0 }
 0x166   : > { %5664 = vrot.lane.b32.xlu1 %v5663_v51, %s6145_s16 }
 0x167   : > { %5659 = vrot.lane.b32.xlu0 %v5658_v44, %s6145_s16  ;;  %4910 = vmatmul.mubr.msk.f32.gmra.mrb[10].mxu0 %vm859_vm2, %v4906_v53  ;;  %s7947_s16 = sld [smem:[#allocation52_spill]] }
 0x168   : > { %948 = vmatprep.mubr.f32.mxu0 %v7888_v0 }
 0x16a   : > { %1248 = vperm.xlu1 %5627, %v1238_v54  }
 0x16b   : > { %1243 = vperm.xlu0 %5626, %v1237_v55   ;;  %4911 = vmatmul.mubr.msk.f32.gmra.mrb[12].mxu0 %vm859_vm2, %v4907_v56 }
 0x16c   : > { %954 = vmatprep.mubr.f32.mxu0 %v7888_v0 }
 0x16d   : > { %v6467_v60 = vld [vmem:[%s7947_s16] sm:$0x3] }
 0x16e   : > { %1258 = vperm.xlu1 %5627, %v1240_v57   ;;  %7948 = vst [vmem:[#allocation13_spill] sm:$0xff] %v6467_v60  ;;  %v830_v62 = vadd.s32 4294967295, %v6467_v60  ;;  %v1104_v4 = vadd.s32 1, %v6467_v60 }
 0x16f   : > { %1253 = vperm.xlu0 %5626, %v1239_v58   ;;  %4912 = vmatmul.mubr.msk.f32.gmra.mrb[14].mxu0 %vm859_vm2, %v4908_v59 }
 0x170   : > { %1037 = vmatprep.mubr.f32.mxu0 %v7888_v0  ;;  %vm831_vm6 = vcmp.ge.s32.totalorder %v830_v62, 0  ;;  %vm833_vm8 = vcmp.lt.s32.totalorder %v830_v62, 16  ;;  %vm1105_vm10 = vcmp.ge.s32.totalorder %v1104_v4, 0  ;;  %vm1107_vm12 = vcmp.lt.s32.totalorder %v1104_v4, 16 }
 0x171   : > { %vm832_vm7 = vmand %vm6477_vm5, %vm831_vm6 }
 0x172   : > { %vm834_vm9 = vmand %vm832_vm7, %vm833_vm8 }
 0x173   : > { %v835_v6 = vsel %vm834_vm9, 1, %v7886_v2  ;;  %vm1106_vm11 = vmand %vm6477_vm5, %vm1105_vm10 }
 0x174   : > { %v843_v8 = vrot.slane %v835_v6, %v6484_v5  ;;  %v839_v9 = vrot.slane %v835_v6, %v6487_v7  ;;  %vm1108_vm13 = vmand %vm1106_vm11, %vm1107_vm12  ;;  %v779_v6 = vld [vmem:[%s7867_s5 + $0x8] sm:$0xff] }
 0x175   : > { %v1109_v18 = vsel %vm1108_vm13, 1, %v7886_v2  ;;  %vm1330_vm13 = vcmp.ge.s32.totalorder %v6467_v60, 0 }
 0x176   : > { %vm6493_vm15 = vcmp.eq.s32.totalorder %v843_v8, 1  ;;  %vm6497_vm0 = vcmp.eq.s32.totalorder %v839_v9, 1  ;;  %v1117_v25 = vrot.slane %v1109_v18, %v6484_v5  ;;  %v1113_v32 = vrot.slane %v1109_v18, %v6487_v7 }
 0x177   : > { %vm5133_vm1 = vmpackc.low %vm6493_vm15, %vm6493_vm15  ;;  %vm7935_vm15 = vcmp.lt.s32.totalorder %v6467_v60, 16 }
 0x178   : > { %vm5136_vm3 = vmpackc.low %vm6497_vm0, %vm6497_vm0  ;;  %vm6524_vm6 = vcmp.eq.s32.totalorder %v1117_v25, 1  ;;  %vm6532_vm7 = vcmp.eq.s32.totalorder %v1113_v32, 1 }
 0x179   : > { %vm5145_vm8 = vmpackc.low %vm6524_vm6, %vm6524_vm6 }
 0x17a   : > { %vm5148_vm9 = vmpackc.low %vm6532_vm7, %vm6532_vm7 }
 0x1c8   : > { %v5630_v10 = vpop.permute.xlu1 %5629 }
 0x1c9   : > { %v5632_v11 = vunpack.i.h.bf16 %v5630_v10  ;;  %v5631_v12 = vunpack.i.l.bf16 %v5630_v10  ;;  %v5635_v13 = vpop.permute.xlu0 %5634  ;;  %v780_v10 = vld [vmem:[%s7867_s5 + $0x10] sm:$0xff] }
 0x1ca   : > { %v5637_v15 = vunpack.i.h.bf16 %v5635_v13  ;;  %v5636_v16 = vunpack.i.l.bf16 %v5635_v13  ;;  %v4926_v13 = vld [vmem:[%s7867_s5 + $0x48] sm:$0xff] }
 0x1cc   : > { %v811_v19 = vsel %vm810_vm14, %v5631_v12, %v5636_v16  ;;  %v812_v20 = vsel %vm810_vm14, %v5632_v11, %v5637_v15  ;;  %v823_v21 = vsel %vm810_vm14, %v5636_v16, %v5631_v12  ;;  %v824_v22 = vsel %vm810_vm14, %v5637_v15, %v5632_v11  ;;  %v781_v11 = vld [vmem:[%s7867_s5 + $0x18] sm:$0xff]  ;;  %v4925_v12 = vld [vmem:[%s7867_s5 + $0x40] sm:$0xff] }
 0x1cd   : > { %v5135_v23 = vpack.c.bf16 %v824_v22, %v823_v21  ;;  %v5132_v24 = vpack.c.bf16 %v812_v20, %v811_v19  ;;  %v4928_v15 = vld [vmem:[%s7867_s5 + $0x58] sm:$0xff] }
 0x1cf   : > { %5134 = vmatprep.subr.msk.bf16.mxu0 %vm5133_vm1, %v5132_v24 }
 0x1d0   : > { %v5645_v26 = vpop.permute.xlu1 %5644  ;;  %5137 = vmatpush1.bf16.msk.msra.mxu0 %vm5136_vm3, %v5135_v23 }
 0x1d1   : > { %v5647_v27 = vunpack.i.h.bf16 %v5645_v26  ;;  %v5646_v28 = vunpack.i.l.bf16 %v5645_v26  ;;  %v5640_v29 = vpop.permute.xlu0 %5639 }
 0x1d2   : > { %v5642_v30 = vunpack.i.h.bf16 %v5640_v29  ;;  %v5641_v31 = vunpack.i.l.bf16 %v5640_v29 }
 0x1d4   : > { %v813_v34 = vsel %vm810_vm14, %v5646_v28, %v5641_v31  ;;  %v814_v35 = vsel %vm810_vm14, %v5647_v27, %v5642_v30  ;;  %v825_v36 = vsel %vm810_vm14, %v5641_v31, %v5646_v28  ;;  %v826_v37 = vsel %vm810_vm14, %v5642_v30, %v5647_v27  ;;  %v5655_v38 = vpop.permute.xlu1 %5654 }
 0x1d5   : > { %v5141_v39 = vpack.c.bf16 %v826_v37, %v825_v36  ;;  %v5657_v40 = vunpack.i.h.bf16 %v5655_v38  ;;  %v5656_v41 = vunpack.i.l.bf16 %v5655_v38  ;;  %v5650_v42 = vpop.permute.xlu0 %5649  ;;  %v5138_v43 = vpack.c.bf16 %v814_v35, %v813_v34 }
 0x1d6   : > { %v5652_v44 = vunpack.i.h.bf16 %v5650_v42  ;;  %v5651_v45 = vunpack.i.l.bf16 %v5650_v42 }
 0x1d7   : > { %v1085_v47 = vsel %vm1083_vm4, %v5656_v41, %v5657_v40  ;;  %v1101_v48 = vsel %vm1083_vm4, %v5657_v40, %v5656_v41  ;;  %5140 = vmatprep.subr.msk.bf16.mxu0 %vm5133_vm1, %v5138_v43 }
 0x1d8   : > { %v1084_v49 = vsel %vm1083_vm4, %v5651_v45, %v5652_v44  ;;  %v1100_v50 = vsel %vm1083_vm4, %v5652_v44, %v5651_v45  ;;  %v5665_v51 = vpop.permute.xlu1 %5664  ;;  %5143 = vmatpush1.bf16.msk.msra.mxu0 %vm5136_vm3, %v5141_v39 }
 0x1d9   : > { %v5147_v53 = vpack.c.bf16 %v1085_v47, %v1084_v49  ;;  %v5667_v54 = vunpack.i.h.bf16 %v5665_v51  ;;  %v5666_v55 = vunpack.i.l.bf16 %v5665_v51  ;;  %v5660_v56 = vpop.permute.xlu0 %5659  ;;  %v5144_v57 = vpack.c.bf16 %v1101_v48, %v1100_v50 }
 0x1da   : > { %v5662_v58 = vunpack.i.h.bf16 %v5660_v56  ;;  %v5661_v59 = vunpack.i.l.bf16 %v5660_v56  ;;  %v4941_v56 = vld [vmem:[%s7869_s7 + $0x20] sm:$0xff] }
 0x1db   : > { %v1087_v62 = vsel %vm1083_vm4, %v5666_v55, %v5667_v54  ;;  %v1103_v1 = vsel %vm1083_vm4, %v5667_v54, %v5666_v55  ;;  %4921 = vmatmul.mubr.msk.f32.vlgmr.msra.gmra.mrb[8].mxu0 %vm859_vm2, %v778_v52  ;;  %5146 = vmatprep.subr.msk.bf16.mxu0 %vm5145_vm8, %v5144_v57  ;;  %v4942_v57 = vld [vmem:[%s7869_s7 + $0x28] sm:$0xff] }
 0x1dc   : > { %v1086_v3 = vsel %vm1083_vm4, %v5661_v59, %v5662_v58  ;;  %v1102_v4 = vsel %vm1083_vm4, %v5662_v58, %v5661_v59  ;;  %5149 = vmatpush1.bf16.msk.msra.mxu0 %vm5148_vm9, %v5147_v53  ;;  %1043 = vmatprep.mubr.f32.mxu0 %v7888_v0  ;;  %v1737_v58 = vld [vmem:[%s7870_s8 + $0x8] sm:$0xff]  ;;  %v1736_v59 = vld [vmem:[%s7870_s8] sm:$0xff] }
 0x1dd   : > { %v5153_v8 = vpack.c.bf16 %v1087_v62, %v1086_v3  ;;  %v5150_v9 = vpack.c.bf16 %v1103_v1, %v1102_v4  ;;  %v4943_v62 = vld [vmem:[%s7869_s7 + $0x30] sm:$0xff]  ;;  %v1739_v1 = vld [vmem:[%s7870_s8 + $0x18] sm:$0xff] }
 0x1de   : > { %v1738_v3 = vld [vmem:[%s7870_s8 + $0x10] sm:$0xff]  ;;  %v4944_v4 = vld [vmem:[%s7869_s7 + $0x38] sm:$0xff] }
 0x1df   : > { %4922 = vmatmul.mubr.msk.f32.gmra.mrb[10].mxu0 %vm859_vm2, %v779_v6  ;;  %5152 = vmatprep.subr.msk.bf16.mxu0 %vm5145_vm8, %v5150_v9  ;;  %v1858_v6 = vld [vmem:[%s7874_s12] sm:$0xff]  ;;  %v1326_v9 = vadd.s32 4294967295, %v6472_v61  ;;  %vm1309_vm8 = vcmask 130048  }
 0x1e0   : > { %5155 = vmatpush1.bf16.msk.msra.mxu0 %vm5148_vm9, %v5153_v8  ;;  %1049 = vmatprep.mubr.f32.mxu0 %v7888_v0  ;;  %v1777_v8 = vld [vmem:[%s7872_s10] sm:$0xff] }
 0x1e1   : > { %vm1327_vm10 = vcmp.ge.s32.totalorder %v1326_v9, 0  ;;  %vm1328_vm11 = vcmp.lt.s32.totalorder %v1326_v9, 16 }
 0x1e2   : > { %vm1329_vm12 = vmand %vm1327_vm10, %vm1328_vm11 }
 0x1e3   : > { %4923 = vmatmul.mubr.msk.f32.gmra.mrb[12].mxu0 %vm859_vm2, %v780_v10  ;;  %v1602_v10 = vadd.s32 1, %v6472_v61  ;;  %vm1331_vm14 = vmand %vm1329_vm12, %vm1330_vm13 }
 0x1e4   : > { %1055 = vmatprep.mubr.f32.mxu0 %v7888_v0  ;;  %vm1333_vm0 = vmand %vm1331_vm14, %vm7935_vm15  ;;  %vm1581_vm14 = vcmask 916480  }
 0x1e5   : > { %vm1603_vm1 = vcmp.ge.s32.totalorder %v1602_v10, 0  ;;  %vm1604_vm3 = vcmp.lt.s32.totalorder %v1602_v10, 16  ;;  %v1278_v10 = vld [vmem:[%s7869_s7 + $0x8] sm:$0xff] }
 0x1e6   : > { %vm1605_vm4 = vmand %vm1603_vm1, %vm1604_vm3 }
 0x1e7   : > { %4924 = vmatmul.mubr.msk.f32.gmra.mrb[14].mxu0 %vm859_vm2, %v781_v11  ;;  %v1334_v11 = vsel %vm1333_vm0, 1, %v7886_v2  ;;  %vm1606_vm6 = vmand %vm1605_vm4, %vm1330_vm13 }
 0x1e8   : > { %1204 = vmatprep.mubr.f32.mxu0 %v7888_v0  ;;  %v1338_v61 = vrot.slane %v1334_v11, %v6487_v7  ;;  %vm1607_vm7 = vmand %vm1606_vm6, %vm7935_vm15  ;;  %vm2131_vm6 = vcmask 64512  }
 0x1e9   : > { %v1249_v22 = vpop.permute.xlu1 %1248 }
 0x1ea   : > { %v1244_v16 = vpop.permute.xlu0 %1243  ;;  %vm6677_vm10 = vcmp.eq.s32.totalorder %v1338_v61, 1  ;;  %v1279_v61 = vld [vmem:[%s7869_s7 + $0x10] sm:$0xff] }
 0x1eb   : > { %4937 = vmatmul.mubr.msk.f32.vlgmr.msra.gmra.mrb[8].mxu0 %vm859_vm2, %v4925_v12  ;;  %v1342_v12 = vrot.slane %v1334_v11, %v6484_v5  ;;  %vm5168_vm12 = vmpackc.low %vm6677_vm10, %vm6677_vm10 }
 0x1ec   : > { %1210 = vmatprep.mubr.f32.mxu0 %v7888_v0 }
 0x1ed   : > { %v1259_v42 = vpop.permute.xlu1 %1258  ;;  %vm6673_vm9 = vcmp.eq.s32.totalorder %v1342_v12, 1 }
 0x1ee   : > { %v1254_v30 = vpop.permute.xlu0 %1253  ;;  %vm5165_vm11 = vmpackc.low %vm6673_vm9, %vm6673_vm9 }
 0x1ef   : > { %4938 = vmatmul.mubr.msk.f32.gmra.mrb[10].mxu0 %vm859_vm2, %v4926_v13 }
 0x1f0   : > { %1216 = vmatprep.mubr.f32.mxu0 %v7888_v0 }
 0x1f3   : > { %4939 = vmatmul.mubr.msk.f32.gmra.mrb[12].mxu0 %vm859_vm2, %v4927_v14 }
 0x1f4   : > { %1222 = vmatprep.mubr.f32.mxu0 %v7888_v0 }
 0x1f7   : > { %4940 = vmatmul.mubr.msk.f32.gmra.mrb[14].mxu0 %vm859_vm2, %v4928_v15 }
 0x1f8   : > { %1434 = vmatprep.mubr.f32.mxu0 %v7888_v0 }
 0x2be   : > { %v1206_v17 = vpop.f32.mrb[8].mxu0 }
 0x2bf   : > { %v1261_v18 = vadd.f32 %v1244_v16, %v1206_v17  ;;  %v1208_v19 = vpop.f32.mrb[9].mxu0  ;;  %v4964_v17 = vld [vmem:[%s7869_s7 + $0x58] sm:$0xff] }
 0x2c0   : > { %v1262_v20 = vadd.f32 %v1244_v16, %v1208_v19 }
 0x2c1   : > { %v1269_v21 = vmax.f32 %v1261_v18, 0.0 }
 0x2c2   : > { %v1270_v23 = vmax.f32 %v1262_v20, 0.0  ;;  %v1212_v24 = vpop.f32.mrb[10].mxu0 }
 0x2c3   : > { %v1263_v25 = vadd.f32 %v1249_v22, %v1212_v24  ;;  %v1214_v26 = vpop.f32.mrb[11].mxu0 }
 0x2c4   : > { %v1264_v27 = vadd.f32 %v1249_v22, %v1214_v26  ;;  %v5688_v28 = vpack.i.bf16 %v1270_v23, %v1269_v21 }
 0x2c5   : > { %v1271_v29 = vmax.f32 %v1263_v25, 0.0 }
 0x2c6   : > { %v1272_v31 = vmax.f32 %v1264_v27, 0.0  ;;  %v1218_v32 = vpop.f32.mrb[12].mxu0 }
 0x2c7   : > { %v5158_v33 = vpack.c.bf16 %v1271_v29, %v1269_v21  ;;  %v1265_v34 = vadd.f32 %v1254_v30, %v1218_v32  ;;  %v1220_v35 = vpop.f32.mrb[13].mxu0  ;;  %v5668_v36 = vpack.i.bf16 %v1271_v29, %v1269_v21  ;;  %v1608_v21 = vsel %vm1607_vm7, 1, %v7886_v2 }
 0x2c8   : > { %v1266_v37 = vadd.f32 %v1254_v30, %v1220_v35  ;;  %v5673_v38 = vpack.i.bf16 %v1272_v31, %v1270_v23  ;;  %v5156_v39 = vpack.c.bf16 %v1272_v31, %v1270_v23  ;;  %v5693_v40 = vpack.i.bf16 %v1272_v31, %v1271_v29 }
 0x2c9   : > { %v1273_v41 = vmax.f32 %v1265_v34, 0.0  ;;  %5669 = vrot.lane.b32.xlu1 %v5668_v36, %s6146_s19  ;;  %v1612_v35 = vrot.slane %v1608_v21, %v6487_v7 }
 0x2ca   : > { %v1274_v43 = vmax.f32 %v1266_v37, 0.0  ;;  %5674 = vrot.lane.b32.xlu0 %v5673_v38, %s6146_s19  ;;  %v1224_v44 = vpop.f32.mrb[14].mxu0  ;;  %5157 = vmatprep.subr.bf16.mxu0 %v5156_v39 }
 0x2cb   : > { %v1267_v45 = vadd.f32 %v1259_v42, %v1224_v44  ;;  %v1226_v46 = vpop.f32.mrb[15].mxu0  ;;  %5159 = vmatpush1.bf16.msra.mxu0 %v5158_v33  ;;  %vm6712_vm1 = vcmp.eq.s32.totalorder %v1612_v35, 1 }
 0x2cc   : > { %v1268_v47 = vadd.f32 %v1259_v42, %v1226_v46  ;;  %v5698_v48 = vpack.i.bf16 %v1274_v43, %v1273_v41  ;;  %vm5180_vm4 = vmpackc.low %vm6712_vm1, %vm6712_vm1 }
 0x2cd   : > { %v1275_v49 = vmax.f32 %v1267_v45, 0.0 }
 0x2ce   : > { %v1276_v50 = vmax.f32 %v1268_v47, 0.0 }
 0x2cf   : > { %v5162_v51 = vpack.c.bf16 %v1275_v49, %v1273_v41  ;;  %v5683_v52 = vpack.i.bf16 %v1275_v49, %v1273_v41 }
 0x2d0   : > { %v5678_v53 = vpack.i.bf16 %v1276_v50, %v1274_v43  ;;  %v5160_v54 = vpack.c.bf16 %v1276_v50, %v1274_v43  ;;  %v5703_v55 = vpack.i.bf16 %v1276_v50, %v1275_v49 }
 0x2d1   : > { %5684 = vrot.lane.b32.xlu1 %v5683_v52, %s6146_s19 }
 0x2d2   : > { %5679 = vrot.lane.b32.xlu0 %v5678_v53, %s6146_s19  ;;  %5161 = vmatprep.subr.bf16.mxu0 %v5160_v54 }
 0x2d3   : > { %5163 = vmatpush1.bf16.msra.mxu0 %v5162_v51 }
 0x2d5   : > { %5694 = vrot.lane.b32.xlu1 %v5693_v40, %s6147_s22 }
 0x2d6   : > { %5689 = vrot.lane.b32.xlu0 %v5688_v28, %s6147_s22  ;;  %4945 = vmatmul.mubr.msk.f32.vlgmr.msra.gmra.mrb[16].mxu0 %vm859_vm2, %v4941_v56  ;;  %v1616_v28 = vrot.slane %v1608_v21, %v6484_v5 }
 0x2d7   : > { %1440 = vmatprep.mubr.f32.mxu0 %v7888_v0 }
 0x2d8   : > { %vm6704_vm0 = vcmp.eq.s32.totalorder %v1616_v28, 1 }
 0x2d9   : > { %5704 = vrot.lane.b32.xlu1 %v5703_v55, %s6147_s22  ;;  %v1277_v55 = vld [vmem:[%s7869_s7] sm:$0xff]  ;;  %vm5177_vm3 = vmpackc.low %vm6704_vm0, %vm6704_vm0 }
 0x2da   : > { %5699 = vrot.lane.b32.xlu0 %v5698_v48, %s6147_s22  ;;  %4946 = vmatmul.mubr.msk.f32.gmra.mrb[18].mxu0 %vm859_vm2, %v4942_v57  ;;  %s8084_s22 = sld [smem:[#allocation55_spill]] }
 0x2db   : > { %1446 = vmatprep.mubr.f32.mxu0 %v7888_v0 }
 0x2dd   : > { %1747 = vperm.xlu1 %5627, %v1737_v58  }
 0x2de   : > { %1742 = vperm.xlu0 %5626, %v1736_v59   ;;  %4947 = vmatmul.mubr.msk.f32.gmra.mrb[20].mxu0 %vm859_vm2, %v4943_v62 }
 0x2df   : > { %1452 = vmatprep.mubr.f32.mxu0 %v7888_v0 }
 0x2e1   : > { %1757 = vperm.xlu1 %5627, %v1739_v1  }
 0x2e2   : > { %1752 = vperm.xlu0 %5626, %v1738_v3   ;;  %4948 = vmatmul.mubr.msk.f32.gmra.mrb[22].mxu0 %vm859_vm2, %v4944_v4 }
 0x2e3   : > { %1535 = vmatprep.mubr.f32.mxu0 %v7888_v0 }
 0x2e5   : > { %1861 = vperm.xlu1 %5627, %v1858_v6  }
 0x2e6   : > { %1780 = vperm.xlu0 %5626, %v1777_v8  }
 0x33b   : > { %v5670_v13 = vpop.permute.xlu1 %5669 }
 0x33c   : > { %v5672_v14 = vunpack.i.h.bf16 %v5670_v13  ;;  %v5671_v15 = vunpack.i.l.bf16 %v5670_v13  ;;  %v5675_v16 = vpop.permute.xlu0 %5674  ;;  %v1280_v13 = vld [vmem:[%s7869_s7 + $0x18] sm:$0xff] }
 0x33d   : > { %v5677_v18 = vunpack.i.h.bf16 %v5675_v16  ;;  %v5676_v19 = vunpack.i.l.bf16 %v5675_v16  ;;  %v4963_v16 = vld [vmem:[%s7869_s7 + $0x50] sm:$0xff] }
 0x33f   : > { %v1311_v22 = vsel %vm1309_vm8, %v5672_v14, %v5677_v18  ;;  %v1323_v23 = vsel %vm1309_vm8, %v5677_v18, %v5672_v14  ;;  %v1310_v24 = vsel %vm1309_vm8, %v5671_v15, %v5676_v19  ;;  %v1322_v25 = vsel %vm1309_vm8, %v5676_v19, %v5671_v15  ;;  %v4961_v14 = vld [vmem:[%s7869_s7 + $0x40] sm:$0xff]  ;;  %v4962_v15 = vld [vmem:[%s7869_s7 + $0x48] sm:$0xff] }
 0x340   : > { %v5167_v26 = vpack.c.bf16 %v1323_v23, %v1322_v25  ;;  %v5164_v27 = vpack.c.bf16 %v1311_v22, %v1310_v24 }
 0x342   : > { %5166 = vmatprep.subr.msk.bf16.mxu0 %vm5165_vm11, %v5164_v27 }
 0x343   : > { %v5685_v29 = vpop.permute.xlu1 %5684  ;;  %5169 = vmatpush1.bf16.msk.msra.mxu0 %vm5168_vm12, %v5167_v26 }
 0x344   : > { %v5687_v30 = vunpack.i.h.bf16 %v5685_v29  ;;  %v5686_v31 = vunpack.i.l.bf16 %v5685_v29  ;;  %v5680_v32 = vpop.permute.xlu0 %5679 }
 0x345   : > { %v5682_v33 = vunpack.i.h.bf16 %v5680_v32  ;;  %v5681_v34 = vunpack.i.l.bf16 %v5680_v32 }
 0x347   : > { %v1313_v37 = vsel %vm1309_vm8, %v5687_v30, %v5682_v33  ;;  %v1325_v38 = vsel %vm1309_vm8, %v5682_v33, %v5687_v30  ;;  %v1312_v39 = vsel %vm1309_vm8, %v5686_v31, %v5681_v34  ;;  %v1324_v40 = vsel %vm1309_vm8, %v5681_v34, %v5686_v31  ;;  %v5695_v41 = vpop.permute.xlu1 %5694 }
 0x348   : > { %v5173_v42 = vpack.c.bf16 %v1325_v38, %v1324_v40  ;;  %v5697_v43 = vunpack.i.h.bf16 %v5695_v41  ;;  %v5696_v44 = vunpack.i.l.bf16 %v5695_v41  ;;  %v5690_v45 = vpop.permute.xlu0 %5689  ;;  %v5170_v46 = vpack.c.bf16 %v1313_v37, %v1312_v39 }
 0x349   : > { %v5692_v47 = vunpack.i.h.bf16 %v5690_v45  ;;  %v5691_v48 = vunpack.i.l.bf16 %v5690_v45 }
 0x34a   : > { %v1583_v50 = vsel %vm1581_vm14, %v5696_v44, %v5697_v43  ;;  %v1599_v51 = vsel %vm1581_vm14, %v5697_v43, %v5696_v44  ;;  %5172 = vmatprep.subr.msk.bf16.mxu0 %vm5165_vm11, %v5170_v46 }
 0x34b   : > { %v1582_v52 = vsel %vm1581_vm14, %v5691_v48, %v5692_v47  ;;  %v1598_v53 = vsel %vm1581_vm14, %v5692_v47, %v5691_v48  ;;  %v5705_v54 = vpop.permute.xlu1 %5704  ;;  %5175 = vmatpush1.bf16.msk.msra.mxu0 %vm5168_vm12, %v5173_v42 }
 0x34c   : > { %v5179_v56 = vpack.c.bf16 %v1583_v50, %v1582_v52  ;;  %v5707_v57 = vunpack.i.h.bf16 %v5705_v54  ;;  %v5706_v58 = vunpack.i.l.bf16 %v5705_v54  ;;  %v5700_v59 = vpop.permute.xlu0 %5699  ;;  %v5176_v62 = vpack.c.bf16 %v1599_v51, %v1598_v53  ;;  %v1776_v50 = vld [vmem:[#allocation2] sm:$0xff] }
 0x34d   : > { %v5702_v1 = vunpack.i.h.bf16 %v5700_v59  ;;  %v5701_v3 = vunpack.i.l.bf16 %v5700_v59  ;;  %v1857_v51 = vld [vmem:[%s7873_s11] sm:$0xff] }
 0x34e   : > { %v1585_v4 = vsel %vm1581_vm14, %v5706_v58, %v5707_v57  ;;  %v1601_v6 = vsel %vm1581_vm14, %v5707_v57, %v5706_v58  ;;  %4957 = vmatmul.mubr.msk.f32.vlgmr.msra.gmra.mrb[16].mxu0 %vm859_vm2, %v1277_v55  ;;  %5178 = vmatprep.subr.msk.bf16.mxu0 %vm5177_vm3, %v5176_v62 }
 0x34f   : > { %v1584_v8 = vsel %vm1581_vm14, %v5701_v3, %v5702_v1  ;;  %v1600_v9 = vsel %vm1581_vm14, %v5702_v1, %v5701_v3  ;;  %5181 = vmatpush1.bf16.msk.msra.mxu0 %vm5180_vm4, %v5179_v56  ;;  %1541 = vmatprep.mubr.f32.mxu0 %v7888_v0  ;;  %vm3343_vm14 = vcmask 392192  }
 0x350   : > { %v5185_v11 = vpack.c.bf16 %v1585_v4, %v1584_v8  ;;  %v5182_v12 = vpack.c.bf16 %v1601_v6, %v1600_v9 }
 0x352   : > { %4958 = vmatmul.mubr.msk.f32.gmra.mrb[18].mxu0 %vm859_vm2, %v1278_v10  ;;  %5184 = vmatprep.subr.msk.bf16.mxu0 %vm5177_vm3, %v5182_v12 }
 0x353   : > { %5187 = vmatpush1.bf16.msk.msra.mxu0 %vm5180_vm4, %v5185_v11  ;;  %1547 = vmatprep.mubr.f32.mxu0 %v7888_v0 }
 0x356   : > { %4959 = vmatmul.mubr.msk.f32.gmra.mrb[20].mxu0 %vm859_vm2, %v1279_v61 }
 0x357   : > { %1553 = vmatprep.mubr.f32.mxu0 %v7888_v0 }
 0x35a   : > { %4960 = vmatmul.mubr.msk.f32.gmra.mrb[22].mxu0 %vm859_vm2, %v1280_v13 }
 0x35b   : > { %1703 = vmatprep.mubr.f32.mxu0 %v7888_v0 }
 0x35c   : > { %v1748_v21 = vpop.permute.xlu1 %1747 }
 0x35d   : > { %v1743_v20 = vpop.permute.xlu0 %1742 }
 0x35e   : > { %4973 = vmatmul.mubr.msk.f32.vlgmr.msra.gmra.mrb[16].mxu0 %vm859_vm2, %v4961_v14 }
 0x35f   : > { %1709 = vmatprep.mubr.f32.mxu0 %v7888_v0 }
 0x360   : > { %v1758_v37 = vpop.permute.xlu1 %1757 }
 0x361   : > { %v1753_v35 = vpop.permute.xlu0 %1752 }
 0x362   : > { %4974 = vmatmul.mubr.msk.f32.gmra.mrb[18].mxu0 %vm859_vm2, %v4962_v15 }
 0x363   : > { %1715 = vmatprep.mubr.f32.mxu0 %v7888_v0 }
 0x364   : > { %v1862_v58 = vpop.permute.xlu1 %1861 }
 0x365   : > { %v1781_v52 = vpop.permute.xlu0 %1780 }
 0x366   : > { %4975 = vmatmul.mubr.msk.f32.gmra.mrb[20].mxu0 %vm859_vm2, %v4963_v16 }
 0x367   : > { %1721 = vmatprep.mubr.f32.mxu0 %v7888_v0 }
 0x36a   : > { %4976 = vmatmul.mubr.msk.f32.gmra.mrb[22].mxu0 %vm859_vm2, %v4964_v17 }
 0x36b   : > { %2042 = vmatprep.mubr.f32.mxu0 %v7888_v0 }
 0x431   : > { %v1705_v18 = vpop.f32.mrb[16].mxu0 }
 0x432   : > { %v1707_v19 = vpop.f32.mrb[17].mxu0  ;;  %v1760_v24 = vadd.f32 %v1743_v20, %v1705_v18 }
 0x433   : > { %v1761_v22 = vadd.f32 %v1743_v20, %v1707_v19 }
 0x434   : > { %v6806_v32 = vmax.f32 %v1760_v24, 0.0 }
 0x435   : > { %v1711_v23 = vpop.f32.mrb[18].mxu0  ;;  %v6802_v29 = vmax.f32 %v1761_v22, 0.0 }
 0x436   : > { %v1762_v25 = vadd.f32 %v1748_v21, %v1711_v23  ;;  %v1713_v26 = vpop.f32.mrb[19].mxu0  ;;  %7974 = vst [vmem:[#allocation20_spill] sm:$0xff] %v6806_v32 }
 0x437   : > { %v1763_v27 = vadd.f32 %v1748_v21, %v1713_v26  ;;  %7972 = vst [vmem:[#allocation18_spill] sm:$0xff] %v6802_v29 }
 0x438   : > { %v6800_v28 = vmax.f32 %v1762_v25, 0.0 }
 0x439   : > { %v6804_v30 = vmax.f32 %v1763_v27, 0.0  ;;  %v1717_v31 = vpop.f32.mrb[20].mxu0 }
 0x43a   : > { %7971 = vst [vmem:[#allocation17_spill] sm:$0xff] %v6800_v28  ;;  %v1719_v33 = vpop.f32.mrb[21].mxu0  ;;  %v6814_v36 = vpack.c.bf16 %v6800_v28, %v6806_v32  ;;  %v1764_v40 = vadd.f32 %v1753_v35, %v1717_v31 }
 0x43b   : > { %7973 = vst [vmem:[#allocation19_spill] sm:$0xff] %v6804_v30  ;;  %v6810_v34 = vpack.c.bf16 %v6804_v30, %v6802_v29  ;;  %v1765_v38 = vadd.f32 %v1753_v35, %v1719_v33 }
 0x43c   : > { %7976 = vst [vmem:[#allocation22_spill] sm:$0xff] %v6814_v36  ;;  %v6826_v47 = vmax.f32 %v1764_v40, 0.0 }
 0x43d   : > { %7975 = vst [vmem:[#allocation21_spill] sm:$0xff] %v6810_v34  ;;  %v1723_v39 = vpop.f32.mrb[22].mxu0  ;;  %5189 = vmatprep.subr.bf16.mxu1 %v6810_v34  ;;  %5205 = vmatprep.subr.bf16.mxu0 %v6810_v34  ;;  %v6822_v45 = vmax.f32 %v1765_v38, 0.0 }
 0x43e   : > { %v1766_v41 = vadd.f32 %v1758_v37, %v1723_v39  ;;  %v1725_v42 = vpop.f32.mrb[23].mxu0  ;;  %5191 = vmatpush1.bf16.msra.mxu1 %v6814_v36  ;;  %5207 = vmatpush1.bf16.msra.mxu0 %v6814_v36  ;;  %7980 = vst [vmem:[#allocation26_spill] sm:$0xff] %v6826_v47 }
 0x43f   : > { %v1767_v43 = vadd.f32 %v1758_v37, %v1725_v42  ;;  %7978 = vst [vmem:[#allocation24_spill] sm:$0xff] %v6822_v45  ;;  %v1938_v42 = vld [vmem:[#allocation5] sm:$0xff] }
 0x440   : > { %v6820_v44 = vmax.f32 %v1766_v41, 0.0 }
 0x441   : > { %v6824_v46 = vmax.f32 %v1767_v43, 0.0  ;;  %v1939_v43 = vld [vmem:[#allocation5 + $0x8] sm:$0xff] }
 0x442   : > { %7977 = vst [vmem:[#allocation23_spill] sm:$0xff] %v6820_v44  ;;  %v6834_v49 = vpack.c.bf16 %v6820_v44, %v6826_v47 }
 0x443   : > { %7979 = vst [vmem:[#allocation25_spill] sm:$0xff] %v6824_v46  ;;  %v6830_v48 = vpack.c.bf16 %v6824_v46, %v6822_v45 }
 0x444   : > { %7982 = vst [vmem:[#allocation28_spill] sm:$0xff] %v6834_v49 }
 0x445   : > { %7981 = vst [vmem:[#allocation27_spill] sm:$0xff] %v6830_v48  ;;  %5193 = vmatprep.subr.bf16.mxu1 %v6830_v48  ;;  %5209 = vmatprep.subr.bf16.mxu0 %v6830_v48 }
 0x446   : > { %5195 = vmatpush1.bf16.msra.mxu1 %v6834_v49  ;;  %5211 = vmatpush1.bf16.msra.mxu0 %v6834_v49 }
 0x447   : > { %5197 = vmatprep.subr.bf16.mxu1 %v6810_v34 }
 0x449   : > { %4977 = vmatmul.mubr.msk.f32.vlgmr.msra.gmra.mrb[0].mxu1 %vm859_vm2, %v1776_v50  ;;  %4979 = vmatmul.mubr.msk.f32.vlgmr.msra.gmra.mrb[24].mxu0 %vm859_vm2, %v1938_v42  ;;  %v1940_v50 = vld [vmem:[#allocation5 + $0x10] sm:$0xff] }
 0x44a   : > { %5199 = vmatpush1.bf16.msra.mxu1 %v6814_v36  ;;  %1931 = vmatprep.mubr.f32.mxu1 %v7888_v0 }
 0x44b   : > { %5201 = vmatprep.subr.bf16.mxu1 %v6830_v48  ;;  %2048 = vmatprep.mubr.f32.mxu0 %v7888_v0 }
 0x44d   : > { %4980 = vmatmul.mubr.msk.f32.gmra.mrb[26].mxu0 %vm859_vm2, %v1939_v43 }
 0x44e   : > { %5203 = vmatpush1.bf16.msra.mxu1 %v6834_v49  ;;  %2054 = vmatprep.mubr.f32.mxu0 %v7888_v0 }
 0x451   : > { %4978 = vmatmul.mubr.msk.f32.vlgmr.msra.gmra.mrb[2].mxu1 %vm859_vm2, %v1857_v51  ;;  %4981 = vmatmul.mubr.msk.f32.gmra.mrb[28].mxu0 %vm859_vm2, %v1940_v50  ;;  %v1941_v51 = vld [vmem:[#allocation5 + $0x18] sm:$0xff] }
 0x452   : > { %2292 = vmatprep.mubr.f32.mxu1 %v7888_v0  ;;  %2060 = vmatprep.mubr.f32.mxu0 %v7888_v0 }
 0x455   : > { %4982 = vmatmul.mubr.msk.f32.gmra.mrb[30].mxu0 %vm859_vm2, %v1941_v51 }
 0x51c   : > { %v1852_v53 = vpop.f32.mrb[0].mxu1 }
 0x51d   : > { %v1853_v54 = vadd.f32 %v1852_v53, %v1781_v52  ;;  %v1854_v55 = vpop.f32.mrb[1].mxu1 }
 0x51e   : > { %v1855_v56 = vadd.f32 %v1854_v55, %v1781_v52 }
 0x51f   : > { %2067 = vxpose.xlu0.b32.start.end [1/1] (short) %v1853_v54, 128 }
 0x520   : > { %2099 = vxpose.xlu1.b32.start.end [1/1] (short) %v1855_v56, 128 }
 0x524   : > { %v1933_v57 = vpop.f32.mrb[2].mxu1 }
 0x525   : > { %v1935_v59 = vpop.f32.mrb[3].mxu1  ;;  %v1934_v1 = vadd.f32 %v1933_v57, %v1862_v58 }
 0x526   : > { %v1936_v62 = vadd.f32 %v1935_v59, %v1862_v58 }
 0x528   : > { %2228 = vmatprep.subr.mxu1 %v1936_v62 }
 0x529   : > { %2229 = vmatpush1.msra.mxu1 %v1934_v1 }
 0x59f   : > { %v2083_v3 = vpop.trf.xlu0 }
 0x5a0   : > { %4983 = vmatmul.mubr.msk.f32.vlgmr.msra.gmra.mrb[4].mxu1 %vm2131_vm6, %v2083_v3  ;;  %v2115_v13 = vpop.trf.xlu1 }
 0x5a1   : > { %2298 = vmatprep.mubr.f32.mxu1 %v7888_v0 }
 0x5a3   : > { %v2084_v4 = vpop.trf.xlu0 }
 0x5a4   : > { %4984 = vmatmul.mubr.msk.f32.gmra.mrb[6].mxu1 %vm2131_vm6, %v2084_v4  ;;  %v2116_v15 = vpop.trf.xlu1 }
 0x5a5   : > { %2304 = vmatprep.mubr.f32.mxu1 %v7888_v0 }
 0x5a7   : > { %v2085_v6 = vpop.trf.xlu0 }
 0x5a8   : > { %4985 = vmatmul.mubr.msk.f32.gmra.mrb[8].mxu1 %vm2131_vm6, %v2085_v6  ;;  %v2117_v18 = vpop.trf.xlu1 }
 0x5a9   : > { %2310 = vmatprep.mubr.f32.mxu1 %v7888_v0 }
 0x5ab   : > { %v2086_v8 = vpop.trf.xlu0 }
 0x5ac   : > { %4986 = vmatmul.mubr.msk.f32.gmra.mrb[10].mxu1 %vm2131_vm6, %v2086_v8  ;;  %v2118_v20 = vpop.trf.xlu1 }
 0x5ad   : > { %2316 = vmatprep.mubr.f32.mxu1 %v7888_v0 }
 0x5af   : > { %v2087_v9 = vpop.trf.xlu0 }
 0x5b0   : > { %4987 = vmatmul.mubr.msk.f32.gmra.mrb[12].mxu1 %vm2131_vm6, %v2087_v9  ;;  %v2119_v23 = vpop.trf.xlu1 }
 0x5b1   : > { %2322 = vmatprep.mubr.f32.mxu1 %v7888_v0 }
 0x5b3   : > { %v2088_v10 = vpop.trf.xlu0 }
 0x5b4   : > { %4988 = vmatmul.mubr.msk.f32.gmra.mrb[14].mxu1 %vm2131_vm6, %v2088_v10  ;;  %v2120_v25 = vpop.trf.xlu1 }
 0x5b5   : > { %2328 = vmatprep.mubr.f32.mxu1 %v7888_v0 }
 0x5b7   : > { %v2089_v11 = vpop.trf.xlu0 }
 0x5b8   : > { %4989 = vmatmul.mubr.msk.f32.gmra.mrb[16].mxu1 %vm2131_vm6, %v2089_v11  ;;  %v2121_v26 = vpop.trf.xlu1 }
 0x5b9   : > { %2334 = vmatprep.mubr.f32.mxu1 %v7888_v0 }
 0x5bb   : > { %v2090_v12 = vpop.trf.xlu0 }
 0x5bc   : > { %4990 = vmatmul.mubr.msk.f32.gmra.mrb[18].mxu1 %vm2131_vm6, %v2090_v12  ;;  %v2122_v27 = vpop.trf.xlu1 }
 0x5bd   : > { %2340 = vmatprep.mubr.f32.mxu1 %v7888_v0 }
 0x5bf   : > { %v2091_v61 = vpop.trf.xlu0 }
 0x5c0   : > { %4991 = vmatmul.mubr.msk.f32.gmra.mrb[20].mxu1 %vm2131_vm6, %v2091_v61  ;;  %v2123_v31 = vpop.trf.xlu1 }
 0x5c1   : > { %2346 = vmatprep.mubr.f32.mxu1 %v7888_v0 }
 0x5c3   : > { %v2092_v14 = vpop.trf.xlu0 }
 0x5c4   : > { %4992 = vmatmul.mubr.msk.f32.gmra.mrb[22].mxu1 %vm2131_vm6, %v2092_v14  ;;  %v2124_v33 = vpop.trf.xlu1 }
 0x5c5   : > { %2352 = vmatprep.mubr.f32.mxu1 %v7888_v0 }
 0x5c7   : > { %v2093_v16 = vpop.trf.xlu0 }
 0x5c8   : > { %4993 = vmatmul.mubr.msk.f32.gmra.mrb[24].mxu1 %vm2131_vm6, %v2093_v16  ;;  %v2125_v35 = vpop.trf.xlu1 }
 0x5c9   : > { %2358 = vmatprep.mubr.f32.mxu1 %v7888_v0 }
 0x5cb   : > { %v2094_v17 = vpop.trf.xlu0 }
 0x5cc   : > { %4994 = vmatmul.mubr.msk.f32.gmra.mrb[26].mxu1 %vm2131_vm6, %v2094_v17  ;;  %v2126_v37 = vpop.trf.xlu1 }
 0x5cd   : > { %2364 = vmatprep.mubr.f32.mxu1 %v7888_v0 }
 0x5cf   : > { %v2095_v19 = vpop.trf.xlu0 }
 0x5d0   : > { %4995 = vmatmul.mubr.msk.f32.gmra.mrb[28].mxu1 %vm2131_vm6, %v2095_v19  ;;  %v2127_v38 = vpop.trf.xlu1 }
 0x5d1   : > { %2370 = vmatprep.mubr.f32.mxu1 %v7888_v0 }
 0x5d3   : > { %v2096_v21 = vpop.trf.xlu0 }
 0x5d4   : > { %4996 = vmatmul.mubr.msk.f32.gmra.mrb[30].mxu1 %vm2131_vm6, %v2096_v21  ;;  %v2128_v39 = vpop.trf.xlu1 }
 0x5d5   : > { %2376 = vmatprep.mubr.f32.mxu1 %v7888_v0 }
 0x5d7   : > { %v2097_v22 = vpop.trf.xlu0 }
 0x5d8   : > { %4997 = vmatmul.mubr.msk.f32.gmra.mrb[32].mxu1 %vm2131_vm6, %v2097_v22  ;;  %v2129_v40 = vpop.trf.xlu1 }
 0x5d9   : > { %2382 = vmatprep.mubr.f32.mxu1 %v7888_v0 }
 0x5db   : > { %v2098_v24 = vpop.trf.xlu0 }
 0x5dc   : > { %4998 = vmatmul.mubr.msk.f32.gmra.mrb[34].mxu1 %vm2131_vm6, %v2098_v24  ;;  %v2130_v41 = vpop.trf.xlu1 }
 0x5dd   : > { %2388 = vmatprep.mubr.f32.mxu1 %v7888_v0 }
 0x5e0   : > { %4999 = vmatmul.mubr.msk.f32.gmra.mrb[36].mxu1 %vm2131_vm6, %v2115_v13 }
 0x5e1   : > { %2394 = vmatprep.mubr.f32.mxu1 %v7888_v0 }
 0x5e4   : > { %5000 = vmatmul.mubr.msk.f32.gmra.mrb[38].mxu1 %vm2131_vm6, %v2116_v15 }
 0x5e5   : > { %2400 = vmatprep.mubr.f32.mxu1 %v7888_v0 }
 0x5e8   : > { %5001 = vmatmul.mubr.msk.f32.gmra.mrb[40].mxu1 %vm2131_vm6, %v2117_v18 }
 0x5e9   : > { %2406 = vmatprep.mubr.f32.mxu1 %v7888_v0 }
 0x5ec   : > { %5002 = vmatmul.mubr.msk.f32.gmra.mrb[42].mxu1 %vm2131_vm6, %v2118_v20 }
 0x5ed   : > { %2412 = vmatprep.mubr.f32.mxu1 %v7888_v0 }
 0x5f0   : > { %5003 = vmatmul.mubr.msk.f32.gmra.mrb[44].mxu1 %vm2131_vm6, %v2119_v23 }
 0x5f1   : > { %2418 = vmatprep.mubr.f32.mxu1 %v7888_v0 }
 0x5f4   : > { %5004 = vmatmul.mubr.msk.f32.gmra.mrb[46].mxu1 %vm2131_vm6, %v2120_v25 }
 0x5f5   : > { %2424 = vmatprep.mubr.f32.mxu1 %v7888_v0 }
 0x5f8   : > { %5005 = vmatmul.mubr.msk.f32.gmra.mrb[48].mxu1 %vm2131_vm6, %v2121_v26 }
 0x5f9   : > { %2430 = vmatprep.mubr.f32.mxu1 %v7888_v0 }
 0x5fc   : > { %5006 = vmatmul.mubr.msk.f32.gmra.mrb[50].mxu1 %vm2131_vm6, %v2122_v27 }
 0x5fd   : > { %2436 = vmatprep.mubr.f32.mxu1 %v7888_v0 }
 0x600   : > { %5007 = vmatmul.mubr.msk.f32.gmra.mrb[52].mxu1 %vm2131_vm6, %v2123_v31 }
 0x601   : > { %2442 = vmatprep.mubr.f32.mxu1 %v7888_v0 }
 0x604   : > { %5008 = vmatmul.mubr.msk.f32.gmra.mrb[54].mxu1 %vm2131_vm6, %v2124_v33 }
 0x605   : > { %2448 = vmatprep.mubr.f32.mxu1 %v7888_v0 }
 0x608   : > { %5009 = vmatmul.mubr.msk.f32.gmra.mrb[56].mxu1 %vm2131_vm6, %v2125_v35 }
 0x609   : > { %2454 = vmatprep.mubr.f32.mxu1 %v7888_v0 }
 0x60c   : > { %5010 = vmatmul.mubr.msk.f32.gmra.mrb[58].mxu1 %vm2131_vm6, %v2126_v37 }
 0x60d   : > { %2460 = vmatprep.mubr.f32.mxu1 %v7888_v0 }
 0x610   : > { %5011 = vmatmul.mubr.msk.f32.gmra.mrb[60].mxu1 %vm2131_vm6, %v2127_v38 }
 0x611   : > { %2466 = vmatprep.mubr.f32.mxu1 %v7888_v0 }
 0x614   : > { %5012 = vmatmul.mubr.msk.f32.gmra.mrb[62].mxu1 %vm2131_vm6, %v2128_v39 }
 0x615   : > { %2472 = vmatprep.mubr.f32.mxu1 %v7888_v0 }
 0x618   : > { %5013 = vmatmul.mubr.msk.f32.gmra.mrb[64].mxu1 %vm2131_vm6, %v2129_v40 }
 0x619   : > { %2478 = vmatprep.mubr.f32.mxu1 %v7888_v0 }
 0x61c   : > { %5014 = vmatmul.mubr.msk.f32.gmra.mrb[66].mxu1 %vm2131_vm6, %v2130_v41 }
 0x673   : > { %v6921_v52 = vpop.f32.mrb[4].mxu1 }
 0x674   : > { %v6923_v53 = vpop.f32.mrb[5].mxu1 }
 0x675   : > { %v2485_v54 = vmax.f32 %v6921_v52, %v6923_v53 }
 0x677   : > { %2486 = vmax.xlane.f32.xlu0 %v2485_v54  ;;  %v6927_v55 = vpop.f32.mrb[6].mxu1 }
 0x678   : > { %v6929_v56 = vpop.f32.mrb[7].mxu1 }
 0x679   : > { %v2488_v57 = vmax.f32 %v6927_v55, %v6929_v56 }
 0x67b   : > { %2489 = vmax.xlane.f32.xlu1 %v2488_v57  ;;  %v6933_v58 = vpop.f32.mrb[8].mxu1 }
 0x67c   : > { %v6935_v59 = vpop.f32.mrb[9].mxu1 }
 0x67d   : > { %v2491_v62 = vmax.f32 %v6933_v58, %v6935_v59 }
 0x67f   : > { %2492 = vmax.xlane.f32.xlu0 %v2491_v62  ;;  %v6939_v1 = vpop.f32.mrb[10].mxu1 }
 0x680   : > { %v6941_v3 = vpop.f32.mrb[11].mxu1 }
 0x681   : > { %v2494_v4 = vmax.f32 %v6939_v1, %v6941_v3 }
 0x683   : > { %2495 = vmax.xlane.f32.xlu0 %v2494_v4  ;;  %v6945_v6 = vpop.f32.mrb[12].mxu1 }
 0x684   : > { %v6947_v8 = vpop.f32.mrb[13].mxu1 }
 0x685   : > { %v2497_v9 = vmax.f32 %v6945_v6, %v6947_v8 }
 0x687   : > { %2498 = vmax.xlane.f32.xlu1 %v2497_v9  ;;  %v6951_v10 = vpop.f32.mrb[14].mxu1 }
 0x688   : > { %v6953_v11 = vpop.f32.mrb[15].mxu1 }
 0x689   : > { %v2500_v12 = vmax.f32 %v6951_v10, %v6953_v11 }
 0x68b   : > { %2501 = vmax.xlane.f32.xlu0 %v2500_v12  ;;  %v6957_v61 = vpop.f32.mrb[16].mxu1 }
 0x68c   : > { %v6959_v13 = vpop.f32.mrb[17].mxu1 }
 0x68d   : > { %v2503_v14 = vmax.f32 %v6957_v61, %v6959_v13 }
 0x68f   : > { %2504 = vmax.xlane.f32.xlu1 %v2503_v14  ;;  %v6963_v15 = vpop.f32.mrb[18].mxu1 }
 0x690   : > { %v6965_v16 = vpop.f32.mrb[19].mxu1 }
 0x691   : > { %v2506_v17 = vmax.f32 %v6963_v15, %v6965_v16 }
 0x693   : > { %2507 = vmax.xlane.f32.xlu0 %v2506_v17  ;;  %v6969_v18 = vpop.f32.mrb[20].mxu1 }
 0x694   : > { %v6971_v19 = vpop.f32.mrb[21].mxu1 }
 0x695   : > { %v2509_v20 = vmax.f32 %v6969_v18, %v6971_v19 }
 0x697   : > { %2510 = vmax.xlane.f32.xlu1 %v2509_v20  ;;  %v6975_v21 = vpop.f32.mrb[22].mxu1 }
 0x698   : > { %v6977_v22 = vpop.f32.mrb[23].mxu1 }
 0x699   : > { %v2512_v23 = vmax.f32 %v6975_v21, %v6977_v22 }
 0x69b   : > { %2513 = vmax.xlane.f32.xlu0 %v2512_v23  ;;  %v6981_v24 = vpop.f32.mrb[24].mxu1 }
 0x69c   : > { %v6983_v25 = vpop.f32.mrb[25].mxu1 }
 0x69d   : > { %v2515_v26 = vmax.f32 %v6981_v24, %v6983_v25 }
 0x69f   : > { %2516 = vmax.xlane.f32.xlu1 %v2515_v26  ;;  %v6987_v27 = vpop.f32.mrb[26].mxu1 }
 0x6a0   : > { %v6989_v31 = vpop.f32.mrb[27].mxu1 }
 0x6a1   : > { %v2518_v33 = vmax.f32 %v6987_v27, %v6989_v31 }
 0x6a3   : > { %2519 = vmax.xlane.f32.xlu0 %v2518_v33  ;;  %v6993_v35 = vpop.f32.mrb[28].mxu1 }
 0x6a4   : > { %v6995_v37 = vpop.f32.mrb[29].mxu1 }
 0x6a5   : > { %v2521_v38 = vmax.f32 %v6993_v35, %v6995_v37 }
 0x6a7   : > { %2522 = vmax.xlane.f32.xlu1 %v2521_v38  ;;  %v6999_v39 = vpop.f32.mrb[30].mxu1 }
 0x6a8   : > { %v7001_v40 = vpop.f32.mrb[31].mxu1 }
 0x6a9   : > { %v2524_v41 = vmax.f32 %v6999_v39, %v7001_v40 }
 0x6ab   : > { %2525 = vmax.xlane.f32.xlu0 %v2524_v41  ;;  %v7005_v42 = vpop.f32.mrb[32].mxu1 }
 0x6ac   : > { %v7007_v43 = vpop.f32.mrb[33].mxu1 }
 0x6ad   : > { %v2527_v50 = vmax.f32 %v7005_v42, %v7007_v43 }
 0x6af   : > { %2528 = vmax.xlane.f32.xlu1 %v2527_v50  ;;  %v7011_v51 = vpop.f32.mrb[34].mxu1 }
 0x6b0   : > { %v7013_v54 = vpop.f32.mrb[35].mxu1 }
 0x6b1   : > { %v2530_v57 = vmax.f32 %v7011_v51, %v7013_v54 }
 0x6b3   : > { %2531 = vmax.xlane.f32.xlu0 %v2530_v57  ;;  %v7017_v62 = vpop.f32.mrb[36].mxu1 }
 0x6b4   : > { %v7019_v4 = vpop.f32.mrb[37].mxu1 }
 0x6b5   : > { %v2533_v9 = vmax.f32 %v7017_v62, %v7019_v4 }
 0x6b7   : > { %2534 = vmax.xlane.f32.xlu1 %v2533_v9  ;;  %v7023_v12 = vpop.f32.mrb[38].mxu1 }
 0x6b8   : > { %v7025_v14 = vpop.f32.mrb[39].mxu1 }
 0x6b9   : > { %v2536_v17 = vmax.f32 %v7023_v12, %v7025_v14 }
 0x6bb   : > { %2537 = vmax.xlane.f32.xlu0 %v2536_v17  ;;  %v7029_v20 = vpop.f32.mrb[40].mxu1 }
 0x6bc   : > { %v7031_v23 = vpop.f32.mrb[41].mxu1 }
 0x6bd   : > { %v2539_v26 = vmax.f32 %v7029_v20, %v7031_v23 }
 0x6bf   : > { %2540 = vmax.xlane.f32.xlu1 %v2539_v26  ;;  %v7035_v33 = vpop.f32.mrb[42].mxu1 }
 0x6c0   : > { %v7037_v38 = vpop.f32.mrb[43].mxu1 }
 0x6c1   : > { %v2542_v41 = vmax.f32 %v7035_v33, %v7037_v38 }
 0x6c3   : > { %2543 = vmax.xlane.f32.xlu0 %v2542_v41  ;;  %v7041_v50 = vpop.f32.mrb[44].mxu1 }
 0x6c4   : > { %v7043_v57 = vpop.f32.mrb[45].mxu1 }
 0x6c5   : > { %v2545_v9 = vmax.f32 %v7041_v50, %v7043_v57 }
 0x6c7   : > { %2546 = vmax.xlane.f32.xlu1 %v2545_v9  ;;  %v7047_v17 = vpop.f32.mrb[46].mxu1 }
 0x6c8   : > { %v7049_v2 = vpop.f32.mrb[47].mxu1 }
 0x6c9   : > { %v2548_v26 = vmax.f32 %v7047_v17, %v7049_v2 }
 0x6cb   : > { %2549 = vmax.xlane.f32.xlu0 %v2548_v26  ;;  %v7053_v0 = vpop.f32.mrb[48].mxu1 }
 0x6cc   : > { %v7055_v63 = vpop.f32.mrb[49].mxu1 }
 0x6cd   : > { %v2551_v41 = vmax.f32 %v7053_v0, %v7055_v63 }
 0x6cf   : > { %2552 = vmax.xlane.f32.xlu1 %v2551_v41  ;;  %v7059_v5 = vpop.f32.mrb[50].mxu1 }
 0x6d0   : > { %v7061_v60 = vpop.f32.mrb[51].mxu1 }
 0x6d1   : > { %v2554_v9 = vmax.f32 %v7059_v5, %v7061_v60 }
 0x6d3   : > { %2555 = vmax.xlane.f32.xlu0 %v2554_v9  ;;  %v7065_v7 = vpop.f32.mrb[52].mxu1 }
 0x6d4   : > { %v7067_v44 = vpop.f32.mrb[53].mxu1 }
 0x6d5   : > { %v2557_v26 = vmax.f32 %v7065_v7, %v7067_v44 }
 0x6d7   : > { %2558 = vmax.xlane.f32.xlu1 %v2557_v26  ;;  %v7071_v46 = vpop.f32.mrb[54].mxu1 }
 0x6d8   : > { %v7073_v47 = vpop.f32.mrb[55].mxu1 }
 0x6d9   : > { %7983 = vst [vmem:[#allocation29_spill] sm:$0xff] %v7073_v47  ;;  %v2560_v41 = vmax.f32 %v7071_v46, %v7073_v47 }
 0x6db   : > { %2561 = vmax.xlane.f32.xlu0 %v2560_v41  ;;  %v7077_v45 = vpop.f32.mrb[56].mxu1 }
 0x6dc   : > { %7984 = vst [vmem:[#allocation30_spill] sm:$0xff] %v7077_v45  ;;  %v7079_v28 = vpop.f32.mrb[57].mxu1 }
 0x6dd   : > { %7985 = vst [vmem:[#allocation31_spill] sm:$0xff] %v7079_v28  ;;  %v2563_v9 = vmax.f32 %v7077_v45, %v7079_v28 }
 0x6df   : > { %2564 = vmax.xlane.f32.xlu1 %v2563_v9  ;;  %v7083_v30 = vpop.f32.mrb[58].mxu1 }
 0x6e0   : > { %7986 = vst [vmem:[#allocation32_spill] sm:$0xff] %v7083_v30  ;;  %v7085_v32 = vpop.f32.mrb[59].mxu1 }
 0x6e1   : > { %7987 = vst [vmem:[#allocation33_spill] sm:$0xff] %v7085_v32  ;;  %v2566_v26 = vmax.f32 %v7083_v30, %v7085_v32 }
 0x6e3   : > { %2567 = vmax.xlane.f32.xlu0 %v2566_v26  ;;  %v7089_v29 = vpop.f32.mrb[60].mxu1 }
 0x6e4   : > { %7988 = vst [vmem:[#allocation34_spill] sm:$0xff] %v7089_v29  ;;  %v7091_v49 = vpop.f32.mrb[61].mxu1 }
 0x6e5   : > { %7989 = vst [vmem:[#allocation35_spill] sm:$0xff] %v7091_v49  ;;  %v2569_v41 = vmax.f32 %v7089_v29, %v7091_v49 }
 0x6e7   : > { %2570 = vmax.xlane.f32.xlu1 %v2569_v41  ;;  %v7095_v48 = vpop.f32.mrb[62].mxu1 }
 0x6e8   : > { %7990 = vst [vmem:[#allocation36_spill] sm:$0xff] %v7095_v48  ;;  %v7097_v36 = vpop.f32.mrb[63].mxu1 }
 0x6e9   : > { %7991 = vst [vmem:[#allocation37_spill] sm:$0xff] %v7097_v36  ;;  %v2572_v9 = vmax.f32 %v7095_v48, %v7097_v36  ;;  %v7116_v36 = vpop.f32.mrb[24].mxu0 }
 0x6ea   : > { %7997 = vst [vmem:[#allocation42_spill] sm:$0xff] %v7116_v36 }
 0x6eb   : > { %2573 = vmax.xlane.f32.xlu0 %v2572_v9  ;;  %v7101_v34 = vpop.f32.mrb[64].mxu1  ;;  %v1942_v9 = vld [vmem:[%s7996_s18] sm:$0xff] }
 0x6ec   : > { %7992 = vst [vmem:[#allocation38_spill] sm:$0xff] %v7101_v34  ;;  %v7103_v32 = vpop.f32.mrb[65].mxu1 }
 0x6ed   : > { %7993 = vst [vmem:[#allocation39_spill] sm:$0xff] %v7103_v32  ;;  %v2575_v26 = vmax.f32 %v7101_v34, %v7103_v32  ;;  %v1944_v32 = vld [vmem:[%s7996_s18 + $0x10] sm:$0xff] }
 0x6ef   : > { %2576 = vmax.xlane.f32.xlu1 %v2575_v26  ;;  %v7107_v30 = vpop.f32.mrb[66].mxu1  ;;  %v7121_v26 = vpop.f32.mrb[25].mxu0 }
 0x6f0   : > { %7994 = vst [vmem:[#allocation40_spill] sm:$0xff] %v7107_v30  ;;  %v7109_v49 = vpop.f32.mrb[67].mxu1  ;;  %7998 = vst [vmem:[#allocation43_spill] sm:$0xff] %v7121_v26  ;;  %v7123_v34 = vpop.f32.mrb[26].mxu0  ;;  %v1943_v26 = vld [vmem:[%s7996_s18 + $0x8] sm:$0xff] }
 0x6f1   : > { %7995 = vst [vmem:[#allocation41_spill] sm:$0xff] %v7109_v49  ;;  %v2578_v41 = vmax.f32 %v7107_v30, %v7109_v49  ;;  %7999 = vst [vmem:[#allocation44_spill] sm:$0xff] %v7123_v34  ;;  %v7125_v48 = vpop.f32.mrb[27].mxu0 }
 0x6f2   : > { %8000 = vst [vmem:[#allocation45_spill] sm:$0xff] %v7125_v48  ;;  %v7132_v36 = vpop.f32.mrb[28].mxu0 }
 0x6f3   : > { %2579 = vmax.xlane.f32.xlu0 %v2578_v41  ;;  %8001 = vst [vmem:[#allocation46_spill] sm:$0xff] %v7132_v36  ;;  %v7137_v29 = vpop.f32.mrb[29].mxu0 }
 0x6f4   : > { %8002 = vst [vmem:[#allocation47_spill] sm:$0xff] %v7137_v29  ;;  %v7139_v48 = vpop.f32.mrb[30].mxu0 }
 0x6f5   : > { %8003 = vst [vmem:[#allocation48_spill] sm:$0xff] %v7139_v48 }
 0x700   : > { %1948 = vperm.xlu1 %5627, %v1942_v9   ;;  %v1945_v9 = vld [vmem:[%s7996_s18 + $0x18] sm:$0xff] }
 0x704   : > { %1958 = vperm.xlu1 %5627, %v1944_v32   ;;  %v2487_v49 = vpop.xlane.xlu0 %2486 }
 0x705   : > { %v2581_v41 = vsub.f32 %v6921_v52, %v2487_v49  ;;  %v2582_v30 = vsub.f32 %v6923_v53, %v2487_v49  ;;  %v7141_v52 = vpop.f32.mrb[31].mxu0 }
 0x706   : > { %8004 = vst [vmem:[#allocation49_spill] sm:$0xff] %v7141_v52 }
 0x707   : > { %v2645_v34 = vmul.f32 1.442695, %v2581_v41  ;;  %v2647_v32 = vmul.f32 1.442695, %v2582_v30 }
 0x708   : > { %v2490_v28 = vpop.xlane.xlu1 %2489  ;;  %1963 = vperm.xlu1 %5627, %v1945_v9  }
 0x709   : > { %v2583_v49 = vsub.f32 %v6927_v55, %v2490_v28  ;;  %v2584_v53 = vsub.f32 %v6929_v56, %v2490_v28  ;;  %1953 = vperm.xlu0 %5626, %v1943_v26   ;;  %5869 = vpow2.f32 %v2645_v34 }
 0x70a   : > { %5871 = vpow2.f32 %v2647_v32 }
 0x70b   : > { %v2649_v36 = vmul.f32 1.442695, %v2583_v49  ;;  %v2651_v45 = vmul.f32 1.442695, %v2584_v53 }
 0x70c   : > { %v2493_v47 = vpop.xlane.xlu0 %2492 }
 0x70d   : > { %5873 = vpow2.f32 %v2649_v36  ;;  %v2585_v41 = vsub.f32 %v6933_v58, %v2493_v47  ;;  %v2586_v48 = vsub.f32 %v6935_v59, %v2493_v47  ;;  %v6148_v59 = vmov 1.0  }
 0x70e   : > { %5875 = vpow2.f32 %v2651_v45  ;;  %2926 = vmatprep.mubr.f32.mxu1 %v6148_v59 }
 0x70f   : > { %v2653_v30 = vmul.f32 1.442695, %v2585_v41  ;;  %v2655_v9 = vmul.f32 1.442695, %v2586_v48 }
 0x710   : > { %v2496_v29 = vpop.xlane.xlu0 %2495 }
 0x711   : > { %v2587_v52 = vsub.f32 %v6939_v1, %v2496_v29  ;;  %v2588_v55 = vsub.f32 %v6941_v3, %v2496_v29  ;;  %5877 = vpow2.f32 %v2653_v30 }
 0x712   : > { %5879 = vpow2.f32 %v2655_v9 }
 0x713   : > { %v2657_v28 = vmul.f32 1.442695, %v2587_v52  ;;  %v2659_v34 = vmul.f32 1.442695, %v2588_v55  ;;  %v5870_v26 = vpop.eup %5869 }
 0x714   : > { %v2499_v56 = vpop.xlane.xlu1 %2498  ;;  %v5872_v47 = vpop.eup %5871 }
 0x715   : > { %5881 = vpow2.f32 %v2657_v28  ;;  %v2589_v36 = vsub.f32 %v6945_v6, %v2499_v56  ;;  %v2590_v58 = vsub.f32 %v6947_v8, %v2499_v56 }
 0x716   : > { %5883 = vpow2.f32 %v2659_v34 }
 0x717   : > { %v5874_v45 = vpop.eup %5873  ;;  %v2661_v48 = vmul.f32 1.442695, %v2589_v36  ;;  %v2663_v29 = vmul.f32 1.442695, %v2590_v58 }
 0x718   : > { %v5876_v1 = vpop.eup %5875  ;;  %v2502_v3 = vpop.xlane.xlu0 %2501  ;;  %v5214_v32 = vpack.c.bf16 %v5874_v45, %v5870_v26 }
 0x719   : > { %v2591_v52 = vsub.f32 %v6951_v10, %v2502_v3  ;;  %v2592_v49 = vsub.f32 %v6953_v11, %v2502_v3  ;;  %v5212_v53 = vpack.c.bf16 %v5876_v1, %v5872_v47  ;;  %5885 = vpow2.f32 %v2661_v48 }
 0x71a   : > { %5887 = vpow2.f32 %v2663_v29 }
 0x71b   : > { %v2665_v6 = vmul.f32 1.442695, %v2591_v52  ;;  %v2667_v41 = vmul.f32 1.442695, %v2592_v49  ;;  %5213 = vmatprep.subr.bf16.mxu0 %v5212_v53  ;;  %5277 = vmatprep.subr.bf16.mxu1 %v5212_v53  ;;  %v5878_v30 = vpop.eup %5877 }
 0x71c   : > { %5215 = vmatpush1.bf16.xpose.msra.mxu0 %v5214_v32  ;;  %5279 = vmatpush1.bf16.xpose.msra.mxu1 %v5214_v32  ;;  %v2505_v8 = vpop.xlane.xlu1 %2504  ;;  %v5880_v28 = vpop.eup %5879 }
 0x71d   : > { %5889 = vpow2.f32 %v2665_v6  ;;  %v2593_v9 = vsub.f32 %v6957_v61, %v2505_v8  ;;  %v2594_v55 = vsub.f32 %v6959_v13, %v2505_v8 }
 0x71e   : > { %5891 = vpow2.f32 %v2667_v41 }
 0x71f   : > { %v5882_v10 = vpop.eup %5881  ;;  %v2669_v11 = vmul.f32 1.442695, %v2593_v9  ;;  %v2671_v56 = vmul.f32 1.442695, %v2594_v55 }
 0x720   : > { %v5884_v34 = vpop.eup %5883  ;;  %v2508_v26 = vpop.xlane.xlu0 %2507  ;;  %v5218_v36 = vpack.c.bf16 %v5882_v10, %v5878_v30 }
 0x721   : > { %v2595_v58 = vsub.f32 %v6963_v15, %v2508_v26  ;;  %v2596_v47 = vsub.f32 %v6965_v16, %v2508_v26  ;;  %v5216_v45 = vpack.c.bf16 %v5884_v34, %v5880_v28  ;;  %5893 = vpow2.f32 %v2669_v11 }
 0x722   : > { %5895 = vpow2.f32 %v2671_v56 }
 0x723   : > { %v2673_v48 = vmul.f32 1.442695, %v2595_v58  ;;  %v2675_v1 = vmul.f32 1.442695, %v2596_v47  ;;  %5217 = vmatprep.subr.bf16.mxu0 %v5216_v45  ;;  %5281 = vmatprep.subr.bf16.mxu1 %v5216_v45  ;;  %v5886_v13 = vpop.eup %5885 }
 0x724   : > { %5219 = vmatpush1.bf16.xpose.msra.mxu0 %v5218_v36  ;;  %5283 = vmatpush1.bf16.xpose.msra.mxu1 %v5218_v36  ;;  %v2511_v61 = vpop.xlane.xlu1 %2510  ;;  %v5888_v32 = vpop.eup %5887 }
 0x725   : > { %5897 = vpow2.f32 %v2673_v48  ;;  %v2597_v29 = vsub.f32 %v6969_v18, %v2511_v61  ;;  %v2598_v3 = vsub.f32 %v6971_v19, %v2511_v61 }
 0x726   : > { %5899 = vpow2.f32 %v2675_v1 }
 0x727   : > { %v5890_v15 = vpop.eup %5889  ;;  %v2677_v16 = vmul.f32 1.442695, %v2597_v29  ;;  %v2679_v49 = vmul.f32 1.442695, %v2598_v3 }
 0x728   : > { %v5892_v52 = vpop.eup %5891  ;;  %v2514_v53 = vpop.xlane.xlu0 %2513  ;;  %v5222_v6 = vpack.c.bf16 %v5890_v15, %v5886_v13 }
 0x729   : > { %v2599_v41 = vsub.f32 %v6975_v21, %v2514_v53  ;;  %v2600_v8 = vsub.f32 %v6977_v22, %v2514_v53  ;;  %v5220_v30 = vpack.c.bf16 %v5892_v52, %v5888_v32  ;;  %5901 = vpow2.f32 %v2677_v16 }
 0x72a   : > { %5903 = vpow2.f32 %v2679_v49 }
 0x72b   : > { %v2681_v9 = vmul.f32 1.442695, %v2599_v41  ;;  %v2683_v55 = vmul.f32 1.442695, %v2600_v8  ;;  %5221 = vmatprep.subr.bf16.mxu0 %v5220_v30  ;;  %5285 = vmatprep.subr.bf16.mxu1 %v5220_v30  ;;  %v5894_v19 = vpop.eup %5893 }
 0x72c   : > { %5223 = vmatpush1.bf16.xpose.msra.mxu0 %v5222_v6  ;;  %5287 = vmatpush1.bf16.xpose.msra.mxu1 %v5222_v6  ;;  %v2517_v18 = vpop.xlane.xlu1 %2516  ;;  %v5896_v11 = vpop.eup %5895 }
 0x72d   : > { %5905 = vpow2.f32 %v2681_v9  ;;  %v2601_v28 = vsub.f32 %v6981_v24, %v2517_v18  ;;  %v2602_v10 = vsub.f32 %v6983_v25, %v2517_v18 }
 0x72e   : > { %5907 = vpow2.f32 %v2683_v55 }
 0x72f   : > { %v5898_v21 = vpop.eup %5897  ;;  %v2685_v22 = vmul.f32 1.442695, %v2601_v28  ;;  %v2687_v56 = vmul.f32 1.442695, %v2602_v10 }
 0x730   : > { %v5900_v34 = vpop.eup %5899  ;;  %v2520_v26 = vpop.xlane.xlu0 %2519  ;;  %v5226_v36 = vpack.c.bf16 %v5898_v21, %v5894_v19 }
 0x731   : > { %v2603_v58 = vsub.f32 %v6987_v27, %v2520_v26  ;;  %v2604_v47 = vsub.f32 %v6989_v31, %v2520_v26  ;;  %v5224_v45 = vpack.c.bf16 %v5900_v34, %v5896_v11  ;;  %5909 = vpow2.f32 %v2685_v22 }
 0x732   : > { %5911 = vpow2.f32 %v2687_v56 }
 0x733   : > { %v2689_v48 = vmul.f32 1.442695, %v2603_v58  ;;  %v2691_v1 = vmul.f32 1.442695, %v2604_v47  ;;  %5225 = vmatprep.subr.bf16.mxu0 %v5224_v45  ;;  %5289 = vmatprep.subr.bf16.mxu1 %v5224_v45  ;;  %v5902_v25 = vpop.eup %5901 }
 0x734   : > { %5227 = vmatpush1.bf16.xpose.msra.mxu0 %v5226_v36  ;;  %5291 = vmatpush1.bf16.xpose.msra.mxu1 %v5226_v36  ;;  %v2523_v24 = vpop.xlane.xlu1 %2522  ;;  %v5904_v29 = vpop.eup %5903 }
 0x735   : > { %5913 = vpow2.f32 %v2689_v48  ;;  %v2605_v61 = vsub.f32 %v6993_v35, %v2523_v24  ;;  %v2606_v13 = vsub.f32 %v6995_v37, %v2523_v24 }
 0x736   : > { %5915 = vpow2.f32 %v2691_v1 }
 0x737   : > { %v5906_v27 = vpop.eup %5905  ;;  %v2693_v31 = vmul.f32 1.442695, %v2605_v61  ;;  %v2695_v32 = vmul.f32 1.442695, %v2606_v13 }
 0x738   : > { %v5908_v3 = vpop.eup %5907  ;;  %v2526_v15 = vpop.xlane.xlu0 %2525  ;;  %v5230_v16 = vpack.c.bf16 %v5906_v27, %v5902_v25 }
 0x739   : > { %v2607_v52 = vsub.f32 %v6999_v39, %v2526_v15  ;;  %v2608_v49 = vsub.f32 %v7001_v40, %v2526_v15  ;;  %v5228_v53 = vpack.c.bf16 %v5908_v3, %v5904_v29  ;;  %5917 = vpow2.f32 %v2693_v31 }
 0x73a   : > { %5919 = vpow2.f32 %v2695_v32 }
 0x73b   : > { %v2697_v6 = vmul.f32 1.442695, %v2607_v52  ;;  %v2699_v41 = vmul.f32 1.442695, %v2608_v49  ;;  %5229 = vmatprep.subr.bf16.mxu0 %v5228_v53  ;;  %5293 = vmatprep.subr.bf16.mxu1 %v5228_v53  ;;  %v5910_v37 = vpop.eup %5909 }
 0x73c   : > { %5231 = vmatpush1.bf16.xpose.msra.mxu0 %v5230_v16  ;;  %5295 = vmatpush1.bf16.xpose.msra.mxu1 %v5230_v16  ;;  %v2529_v35 = vpop.xlane.xlu1 %2528  ;;  %v5912_v9 = vpop.eup %5911 }
 0x73d   : > { %5921 = vpow2.f32 %v2697_v6  ;;  %v2609_v8 = vsub.f32 %v7005_v42, %v2529_v35  ;;  %v2610_v30 = vsub.f32 %v7007_v43, %v2529_v35 }
 0x73e   : > { %5923 = vpow2.f32 %v2699_v41 }
 0x73f   : > { %v5914_v39 = vpop.eup %5913  ;;  %v2701_v40 = vmul.f32 1.442695, %v2609_v8  ;;  %v2703_v18 = vmul.f32 1.442695, %v2610_v30 }
 0x740   : > { %v5916_v55 = vpop.eup %5915  ;;  %v2532_v19 = vpop.xlane.xlu0 %2531  ;;  %v5234_v28 = vpack.c.bf16 %v5914_v39, %v5910_v37 }
 0x741   : > { %v2611_v10 = vsub.f32 %v7011_v51, %v2532_v19  ;;  %v2612_v11 = vsub.f32 %v7013_v54, %v2532_v19  ;;  %v5232_v21 = vpack.c.bf16 %v5916_v55, %v5912_v9  ;;  %5925 = vpow2.f32 %v2701_v40 }
 0x742   : > { %5927 = vpow2.f32 %v2703_v18 }
 0x743   : > { %v2705_v22 = vmul.f32 1.442695, %v2611_v10  ;;  %v2707_v34 = vmul.f32 1.442695, %v2612_v11  ;;  %5233 = vmatprep.subr.bf16.mxu0 %v5232_v21  ;;  %5297 = vmatprep.subr.bf16.mxu1 %v5232_v21  ;;  %v5918_v43 = vpop.eup %5917 }
 0x744   : > { %5235 = vmatpush1.bf16.xpose.msra.mxu0 %v5234_v28  ;;  %5299 = vmatpush1.bf16.xpose.msra.mxu1 %v5234_v28  ;;  %v2535_v42 = vpop.xlane.xlu1 %2534  ;;  %v5920_v36 = vpop.eup %5919 }
 0x745   : > { %5929 = vpow2.f32 %v2705_v22  ;;  %v2613_v56 = vsub.f32 %v7017_v62, %v2535_v42  ;;  %v2614_v26 = vsub.f32 %v7019_v4, %v2535_v42 }
 0x746   : > { %5931 = vpow2.f32 %v2707_v34 }
 0x747   : > { %v5922_v51 = vpop.eup %5921  ;;  %v2709_v54 = vmul.f32 1.442695, %v2613_v56  ;;  %v2711_v47 = vmul.f32 1.442695, %v2614_v26 }
 0x748   : > { %v5924_v58 = vpop.eup %5923  ;;  %v2538_v45 = vpop.xlane.xlu0 %2537  ;;  %v5238_v48 = vpack.c.bf16 %v5922_v51, %v5918_v43 }
 0x749   : > { %v2615_v1 = vsub.f32 %v7023_v12, %v2538_v45  ;;  %v2616_v24 = vsub.f32 %v7025_v14, %v2538_v45  ;;  %v5236_v25 = vpack.c.bf16 %v5924_v58, %v5920_v36  ;;  %5933 = vpow2.f32 %v2709_v54 }
 0x74a   : > { %5935 = vpow2.f32 %v2711_v47 }
 0x74b   : > { %v2713_v61 = vmul.f32 1.442695, %v2615_v1  ;;  %v2715_v13 = vmul.f32 1.442695, %v2616_v24  ;;  %5237 = vmatprep.subr.bf16.mxu0 %v5236_v25  ;;  %5301 = vmatprep.subr.bf16.mxu1 %v5236_v25  ;;  %v5926_v4 = vpop.eup %5925 }
 0x74c   : > { %5239 = vmatpush1.bf16.xpose.msra.mxu0 %v5238_v48  ;;  %5303 = vmatpush1.bf16.xpose.msra.mxu1 %v5238_v48  ;;  %v2541_v62 = vpop.xlane.xlu1 %2540  ;;  %v5928_v31 = vpop.eup %5927 }
 0x74d   : > { %5937 = vpow2.f32 %v2713_v61  ;;  %v2617_v29 = vsub.f32 %v7029_v20, %v2541_v62  ;;  %v2618_v27 = vsub.f32 %v7031_v23, %v2541_v62  ;;  %v8005_v62 = vld [vmem:[#allocation29_spill] sm:$0xff] }
 0x74e   : > { %5939 = vpow2.f32 %v2715_v13 }
 0x74f   : > { %v5930_v12 = vpop.eup %5929  ;;  %v2717_v14 = vmul.f32 1.442695, %v2617_v29  ;;  %v2719_v32 = vmul.f32 1.442695, %v2618_v27 }
 0x750   : > { %v5932_v3 = vpop.eup %5931  ;;  %v2544_v15 = vpop.xlane.xlu0 %2543  ;;  %v5242_v16 = vpack.c.bf16 %v5930_v12, %v5926_v4  ;;  %v8006_v12 = vld [vmem:[#allocation30_spill] sm:$0xff] }
 0x751   : > { %v2619_v52 = vsub.f32 %v7035_v33, %v2544_v15  ;;  %v2620_v49 = vsub.f32 %v7037_v38, %v2544_v15  ;;  %v5240_v53 = vpack.c.bf16 %v5932_v3, %v5928_v31  ;;  %5941 = vpow2.f32 %v2717_v14 }
 0x752   : > { %5943 = vpow2.f32 %v2719_v32 }
 0x753   : > { %v2721_v6 = vmul.f32 1.442695, %v2619_v52  ;;  %v2723_v41 = vmul.f32 1.442695, %v2620_v49  ;;  %5241 = vmatprep.subr.bf16.mxu0 %v5240_v53  ;;  %5305 = vmatprep.subr.bf16.mxu1 %v5240_v53  ;;  %v5934_v23 = vpop.eup %5933 }
 0x754   : > { %5243 = vmatpush1.bf16.xpose.msra.mxu0 %v5242_v16  ;;  %5307 = vmatpush1.bf16.xpose.msra.mxu1 %v5242_v16  ;;  %v2547_v20 = vpop.xlane.xlu1 %2546  ;;  %v5936_v8 = vpop.eup %5935 }
 0x755   : > { %5945 = vpow2.f32 %v2721_v6  ;;  %v2621_v35 = vsub.f32 %v7041_v50, %v2547_v20  ;;  %v2622_v37 = vsub.f32 %v7043_v57, %v2547_v20  ;;  %v8008_v6 = vld [vmem:[#allocation32_spill] sm:$0xff]  ;;  %v8009_v20 = vld [vmem:[#allocation33_spill] sm:$0xff] }
 0x756   : > { %5947 = vpow2.f32 %v2723_v41 }
 0x757   : > { %v5938_v33 = vpop.eup %5937  ;;  %v2725_v38 = vmul.f32 1.442695, %v2621_v35  ;;  %v2727_v9 = vmul.f32 1.442695, %v2622_v37 }
 0x758   : > { %v5940_v30 = vpop.eup %5939  ;;  %v2550_v39 = vpop.xlane.xlu0 %2549  ;;  %v5246_v40 = vpack.c.bf16 %v5938_v33, %v5934_v23 }
 0x759   : > { %v2623_v55 = vsub.f32 %v7047_v17, %v2550_v39  ;;  %v2624_v18 = vsub.f32 %v7049_v2, %v2550_v39  ;;  %v5244_v19 = vpack.c.bf16 %v5940_v30, %v5936_v8  ;;  %5949 = vpow2.f32 %v2725_v38 }
 0x75a   : > { %5951 = vpow2.f32 %v2727_v9  ;;  %v8010_v9 = vld [vmem:[#allocation34_spill] sm:$0xff] }
 0x75b   : > { %v2729_v28 = vmul.f32 1.442695, %v2623_v55  ;;  %v2731_v10 = vmul.f32 1.442695, %v2624_v18  ;;  %5245 = vmatprep.subr.bf16.mxu0 %v5244_v19  ;;  %5309 = vmatprep.subr.bf16.mxu1 %v5244_v19  ;;  %v5942_v57 = vpop.eup %5941  ;;  %v8011_v18 = vld [vmem:[#allocation35_spill] sm:$0xff] }
 0x75c   : > { %5247 = vmatpush1.bf16.xpose.msra.mxu0 %v5246_v40  ;;  %5311 = vmatpush1.bf16.xpose.msra.mxu1 %v5246_v40  ;;  %v2553_v50 = vpop.xlane.xlu1 %2552  ;;  %v5944_v22 = vpop.eup %5943 }
 0x75d   : > { %5953 = vpow2.f32 %v2729_v28  ;;  %v2625_v11 = vsub.f32 %v7053_v0, %v2553_v50  ;;  %v2626_v21 = vsub.f32 %v7055_v63, %v2553_v50 }
 0x75e   : > { %5955 = vpow2.f32 %v2731_v10 }
 0x75f   : > { %v5946_v17 = vpop.eup %5945  ;;  %v2733_v2 = vmul.f32 1.442695, %v2625_v11  ;;  %v2735_v42 = vmul.f32 1.442695, %v2626_v21  ;;  %v8012_v11 = vld [vmem:[#allocation36_spill] sm:$0xff] }
 0x760   : > { %v5948_v34 = vpop.eup %5947  ;;  %v2556_v43 = vpop.xlane.xlu0 %2555  ;;  %v5250_v56 = vpack.c.bf16 %v5946_v17, %v5942_v57 }
 0x761   : > { %v2627_v26 = vsub.f32 %v7059_v5, %v2556_v43  ;;  %v2628_v36 = vsub.f32 %v7061_v60, %v2556_v43  ;;  %v5248_v51 = vpack.c.bf16 %v5948_v34, %v5944_v22  ;;  %5957 = vpow2.f32 %v2733_v2  ;;  %v8013_v22 = vld [vmem:[#allocation37_spill] sm:$0xff] }
 0x762   : > { %5959 = vpow2.f32 %v2735_v42 }
 0x763   : > { %v2737_v54 = vmul.f32 1.442695, %v2627_v26  ;;  %v2739_v58 = vmul.f32 1.442695, %v2628_v36  ;;  %5249 = vmatprep.subr.bf16.mxu0 %v5248_v51  ;;  %5313 = vmatprep.subr.bf16.mxu1 %v5248_v51  ;;  %v5950_v63 = vpop.eup %5949  ;;  %v8014_v26 = vld [vmem:[#allocation38_spill] sm:$0xff]  ;;  %v8015_v51 = vld [vmem:[#allocation39_spill] sm:$0xff] }
 0x764   : > { %5251 = vmatpush1.bf16.xpose.msra.mxu0 %v5250_v56  ;;  %5315 = vmatpush1.bf16.xpose.msra.mxu1 %v5250_v56  ;;  %v2559_v0 = vpop.xlane.xlu1 %2558  ;;  %v5952_v48 = vpop.eup %5951 }
 0x765   : > { %5961 = vpow2.f32 %v2737_v54  ;;  %v2629_v47 = vsub.f32 %v7065_v7, %v2559_v0  ;;  %v2630_v45 = vsub.f32 %v7067_v44, %v2559_v0 }
 0x766   : > { %5963 = vpow2.f32 %v2739_v58 }
 0x767   : > { %v5954_v5 = vpop.eup %5953  ;;  %v2741_v60 = vmul.f32 1.442695, %v2629_v47  ;;  %v2743_v24 = vmul.f32 1.442695, %v2630_v45 }
 0x768   : > { %v5956_v1 = vpop.eup %5955  ;;  %v2562_v25 = vpop.xlane.xlu0 %2561  ;;  %v5254_v61 = vpack.c.bf16 %v5954_v5, %v5950_v63 }
 0x769   : > { %v2631_v13 = vsub.f32 %v7071_v46, %v2562_v25  ;;  %v2632_v4 = vsub.f32 %v8005_v62, %v2562_v25  ;;  %v5252_v29 = vpack.c.bf16 %v5956_v1, %v5952_v48  ;;  %5965 = vpow2.f32 %v2741_v60  ;;  %v8007_v46 = vld [vmem:[#allocation31_spill] sm:$0xff]  ;;  %v8018_v62 = vld [vmem:[#allocation41_spill] sm:$0xff] }
 0x76a   : > { %5967 = vpow2.f32 %v2743_v24  ;;  %v8016_v24 = vld [vmem:[#allocation43_spill] sm:$0xff] }
 0x76b   : > { %v2745_v27 = vmul.f32 1.442695, %v2631_v13  ;;  %v2747_v31 = vmul.f32 1.442695, %v2632_v4  ;;  %5253 = vmatprep.subr.bf16.mxu0 %v5252_v29  ;;  %5317 = vmatprep.subr.bf16.mxu1 %v5252_v29  ;;  %v5958_v44 = vpop.eup %5957 }
 0x76c   : > { %5255 = vmatpush1.bf16.xpose.msra.mxu0 %v5254_v61  ;;  %5319 = vmatpush1.bf16.xpose.msra.mxu1 %v5254_v61  ;;  %v2565_v7 = vpop.xlane.xlu1 %2564  ;;  %v5960_v3 = vpop.eup %5959  ;;  %v8017_v61 = vld [vmem:[#allocation40_spill] sm:$0xff] }
 0x76d   : > { %5969 = vpow2.f32 %v2745_v27  ;;  %v2633_v14 = vsub.f32 %v8006_v12, %v2565_v7  ;;  %v2634_v15 = vsub.f32 %v8007_v46, %v2565_v7 }
 0x76e   : > { %5971 = vpow2.f32 %v2747_v31 }
 0x76f   : > { %v5962_v32 = vpop.eup %5961  ;;  %v2749_v52 = vmul.f32 1.442695, %v2633_v14  ;;  %v2751_v37 = vmul.f32 1.442695, %v2634_v15 }
 0x770   : > { %v5964_v16 = vpop.eup %5963  ;;  %v2568_v49 = vpop.xlane.xlu0 %2567  ;;  %v5258_v53 = vpack.c.bf16 %v5962_v32, %v5958_v44 }
 0x771   : > { %v2635_v41 = vsub.f32 %v8008_v6, %v2568_v49  ;;  %v2636_v23 = vsub.f32 %v8009_v20, %v2568_v49  ;;  %v5256_v35 = vpack.c.bf16 %v5964_v16, %v5960_v3  ;;  %5973 = vpow2.f32 %v2749_v52  ;;  %v8019_v6 = vld [vmem:[#allocation21_spill] sm:$0xff]  ;;  %v8020_v20 = vld [vmem:[#allocation42_spill] sm:$0xff] }
 0x773   : > { %v2753_v8 = vmul.f32 1.442695, %v2635_v41  ;;  %v2755_v33 = vmul.f32 1.442695, %v2636_v23  ;;  %5257 = vmatprep.subr.bf16.mxu0 %v5256_v35  ;;  %5321 = vmatprep.subr.bf16.mxu1 %v5256_v35  ;;  %v5966_v30 = vpop.eup %5965 }
 0x774   : > { %5259 = vmatpush1.bf16.xpose.msra.mxu0 %v5258_v53  ;;  %5323 = vmatpush1.bf16.xpose.msra.mxu1 %v5258_v53  ;;  %v2571_v38 = vpop.xlane.xlu1 %2570  ;;  %v5968_v40 = vpop.eup %5967 }
 0x775   : > { %5975 = vpow2.f32 %v2753_v8  ;;  %v2637_v39 = vsub.f32 %v8010_v9, %v2571_v38  ;;  %v2638_v19 = vsub.f32 %v8011_v18, %v2571_v38  ;;  %v8023_v38 = vld [vmem:[#allocation44_spill] sm:$0xff]  ;;  %v8024_v9 = vld [vmem:[#allocation27_spill] sm:$0xff] }
 0x776   : > { %5977 = vpow2.f32 %v2755_v33  ;;  %v8022_v33 = vld [vmem:[#allocation22_spill] sm:$0xff] }
 0x777   : > { %v5970_v55 = vpop.eup %5969  ;;  %5979 = vpow2.f32 %v2751_v37  ;;  %v2757_v10 = vmul.f32 1.442695, %v2637_v39  ;;  %v2759_v34 = vmul.f32 1.442695, %v2638_v19  ;;  %v8021_v37 = vld [vmem:[#allocation45_spill] sm:$0xff]  ;;  %v8025_v39 = vmov 0.0  }
 0x778   : > { %v5972_v28 = vpop.eup %5971  ;;  %v2574_v50 = vpop.xlane.xlu0 %2573  ;;  %v5262_v57 = vpack.c.bf16 %v5970_v55, %v5966_v30  ;;  %v8027_v19 = vld [vmem:[#allocation46_spill] sm:$0xff] }
 0x779   : > { %v2639_v21 = vsub.f32 %v8012_v11, %v2574_v50  ;;  %v2640_v17 = vsub.f32 %v8013_v22, %v2574_v50  ;;  %v5260_v2 = vpack.c.bf16 %v5972_v28, %v5968_v40  ;;  %5981 = vpow2.f32 %v2757_v10  ;;  %v8026_v40 = vld [vmem:[#allocation47_spill] sm:$0xff]  ;;  %v8028_v10 = vld [vmem:[#allocation49_spill] sm:$0xff]  ;;  %v8032_v22 = vld [vmem:[#allocation20_spill] sm:$0xff] }
 0x77b   : > { %v2761_v42 = vmul.f32 1.442695, %v2639_v21  ;;  %v2763_v43 = vmul.f32 1.442695, %v2640_v17  ;;  %5261 = vmatprep.subr.bf16.mxu0 %v5260_v2  ;;  %5325 = vmatprep.subr.bf16.mxu1 %v5260_v2  ;;  %v5974_v58 = vpop.eup %5973  ;;  %v8031_v21 = vld [vmem:[#allocation18_spill] sm:$0xff]  ;;  %v8033_v17 = vld [vmem:[#allocation19_spill] sm:$0xff] }
 0x77c   : > { %5263 = vmatpush1.bf16.xpose.msra.mxu0 %v5262_v57  ;;  %5327 = vmatpush1.bf16.xpose.msra.mxu1 %v5262_v57  ;;  %v2577_v56 = vpop.xlane.xlu1 %2576  ;;  %v8030_v57 = vld [vmem:[#allocation48_spill] sm:$0xff]  ;;  %v8034_v2 = vld [vmem:[#allocation17_spill] sm:$0xff] }
 0x77d   : > { %5983 = vpow2.f32 %v2761_v42  ;;  %v2641_v36 = vsub.f32 %v8014_v26, %v2577_v56  ;;  %v2642_v54 = vsub.f32 %v8015_v51, %v2577_v56  ;;  %v8036_v42 = vld [vmem:[#allocation26_spill] sm:$0xff]  ;;  %v8038_v56 = vld [vmem:[#allocation23_spill] sm:$0xff]  ;;  %v8039_v51 = vld [vmem:[#allocation16_spill] sm:$0xff] }
 0x77e   : > { %5985 = vpow2.f32 %v2763_v43  ;;  %v8037_v43 = vld [vmem:[#allocation25_spill] sm:$0xff] }
 0x77f   : > { %v5976_v0 = vpop.eup %5975  ;;  %5987 = vpow2.f32 %v2759_v34  ;;  %v2765_v63 = vmul.f32 1.442695, %v2641_v36  ;;  %v2767_v45 = vmul.f32 1.442695, %v2642_v54  ;;  %v8035_v34 = vld [vmem:[#allocation24_spill] sm:$0xff] }
 0x780   : > { %v5978_v47 = vpop.eup %5977  ;;  %v1949_v48 = vpop.permute.xlu1 %1948  ;;  %v5266_v60 = vpack.c.bf16 %v5976_v0, %v5974_v58 }
 0x781   : > { %v2580_v5 = vpop.xlane.xlu0 %2579  ;;  %v5980_v1 = vpop.eup %5979  ;;  %v2047_v25 = vadd.f32 %v8016_v24, %v1949_v48  ;;  %5989 = vpow2.f32 %v2765_v63  ;;  %v2045_v23 = vadd.f32 %v8020_v20, %v1949_v48 }
 0x782   : > { %v2643_v13 = vsub.f32 %v8017_v61, %v2580_v5  ;;  %v2644_v4 = vsub.f32 %v8018_v62, %v2580_v5  ;;  %v5264_v29 = vpack.c.bf16 %v5978_v47, %v5980_v1  ;;  %5991 = vpow2.f32 %v2767_v45 }
 0x783   : > { %2837 = vmatprep.mubr.f32.mxu0 %v2047_v25  ;;  %v5982_v7 = vpop.eup %5981 }
 0x784   : > { %v2769_v27 = vmul.f32 1.442695, %v2643_v13  ;;  %v2771_v31 = vmul.f32 1.442695, %v2644_v4  ;;  %5265 = vmatprep.subr.bf16.mxu0 %v5264_v29  ;;  %5329 = vmatprep.subr.bf16.mxu1 %v5264_v29  ;;  %v1959_v35 = vpop.permute.xlu1 %1958 }
 0x785   : > { %5267 = vmatpush1.bf16.xpose.msra.mxu0 %v5266_v60  ;;  %5331 = vmatpush1.bf16.xpose.msra.mxu1 %v5266_v60  ;;  %v2059_v55 = vadd.f32 %v8026_v40, %v1959_v35  ;;  %v2057_v28 = vadd.f32 %v8027_v19, %v1959_v35 }
 0x786   : > { %5993 = vpow2.f32 %v2769_v27 }
 0x787   : > { %5995 = vpow2.f32 %v2771_v31  ;;  %v5984_v44 = vpop.eup %5983 }
 0x788   : > { %v5986_v12 = vpop.eup %5985  ;;  %v5270_v14 = vpack.c.bf16 %v5984_v44, %v5982_v7  ;;  %v1954_v41 = vpop.permute.xlu0 %1953 }
 0x789   : > { %v5988_v3 = vpop.eup %5987  ;;  %v2053_v8 = vadd.f32 %v8021_v37, %v1954_v41  ;;  %v2051_v30 = vadd.f32 %v8023_v38, %v1954_v41  ;;  %v1964_v18 = vpop.permute.xlu1 %1963 }
 0x78a   : > { %v5268_v32 = vpack.c.bf16 %v5986_v12, %v5988_v3  ;;  %v2065_v50 = vadd.f32 %v8028_v10, %v1964_v18  ;;  %v2063_v11 = vadd.f32 %v8030_v57, %v1964_v18 }
 0x78b   : > { %v5990_v46 = vpop.eup %5989 }
 0x78c   : > { %5269 = vmatprep.subr.bf16.mxu0 %v5268_v32  ;;  %5333 = vmatprep.subr.bf16.mxu1 %v5268_v32  ;;  %v5992_v15 = vpop.eup %5991 }
 0x78d   : > { %5271 = vmatpush1.bf16.xpose.msra.mxu0 %v5270_v14  ;;  %5335 = vmatpush1.bf16.xpose.msra.mxu1 %v5270_v14 }
 0x790   : > { %v5994_v16 = vpop.eup %5993 }
 0x791   : > { %v5996_v52 = vpop.eup %5995  ;;  %v5274_v49 = vpack.c.bf16 %v5994_v16, %v5990_v46 }
 0x792   : > { %v5272_v53 = vpack.c.bf16 %v5996_v52, %v5992_v15 }
 0x794   : > { %5273 = vmatprep.subr.bf16.mxu0 %v5272_v53  ;;  %5337 = vmatprep.subr.bf16.mxu1 %v5272_v53 }
 0x795   : > { %5275 = vmatpush1.bf16.xpose.msra.mxu0 %v5274_v49  ;;  %5339 = vmatpush1.bf16.xpose.msra.mxu1 %v5274_v49 }
 0x796   : > { %5341 = vmatprep.subr.bf16.mxu0 %v8019_v6 }
 0x79c   : > { %2838 = vmatmul.mubr.f32.vlgmr.msra.gmra.mrb[32].mxu0 %v2045_v23  ;;  %2927 = vmatmul.mubr.f32.vlgmr.msra.gmra.mrb[68].mxu1 %v6148_v59  ;;  %v8029_v59 = vld [vmem:[#allocation28_spill] sm:$0xff] }
 0x79d   : > { %2843 = vmatprep.mubr.f32.mxu0 %v2053_v8  ;;  %5343 = vmatpush1.bf16.xpose.msra.mxu0 %v8022_v33 }
 0x79e   : > { %5345 = vmatprep.subr.bf16.mxu0 %v8024_v9  ;;  %3463 = vmatprep.mubr.f32.mxu1 %v8025_v39 }
 0x7a0   : > { %2844 = vmatmul.mubr.f32.gmra.mrb[34].mxu0 %v2051_v30 }
 0x7a1   : > { %2849 = vmatprep.mubr.f32.mxu0 %v2059_v55 }
 0x7a4   : > { %2850 = vmatmul.mubr.f32.gmra.mrb[36].mxu0 %v2057_v28 }
 0x7a5   : > { %2855 = vmatprep.mubr.f32.mxu0 %v2065_v50  ;;  %5347 = vmatpush1.bf16.xpose.msra.mxu0 %v8029_v59 }
 0x7a6   : > { %5349 = vmatprep.subr.bf16.mxu0 %v8019_v6 }
 0x7a8   : > { %2856 = vmatmul.mubr.f32.gmra.mrb[38].mxu0 %v2063_v11 }
 0x7a9   : > { %3015 = vmatprep.mubr.f32.mxu0 %v8031_v21 }
 0x7ac   : > { %3016 = vmatmul.mubr.f32.vlgmr.msra.gmra.mrb[40].mxu0 %v8032_v22 }
 0x7ad   : > { %3020 = vmatprep.mubr.f32.mxu0 %v8033_v17  ;;  %5351 = vmatpush1.bf16.msra.mxu0 %v8022_v33 }
 0x7ae   : > { %5353 = vmatprep.subr.bf16.mxu0 %v8024_v9 }
 0x7b0   : > { %3021 = vmatmul.mubr.f32.gmra.mrb[42].mxu0 %v8034_v2 }
 0x7b1   : > { %3025 = vmatprep.mubr.f32.mxu0 %v8035_v34  ;;  %5355 = vmatpush1.bf16.msra.mxu0 %v8029_v59 }
 0x7b4   : > { %3026 = vmatmul.mubr.f32.gmra.mrb[44].mxu0 %v8036_v42 }
 0x7b5   : > { %3030 = vmatprep.mubr.f32.mxu0 %v8037_v43 }
 0x7b8   : > { %3031 = vmatmul.mubr.f32.gmra.mrb[46].mxu0 %v8038_v56 }
 0x7b9   : > { %3172 = vmatprep.mubr.f32.mxu0 %v8025_v39 }
 0x86f   : > { %v2839_v26 = vpop.f32.mrb[32].mxu0  ;;  %v2928_v36 = vpop.f32.mrb[68].mxu1 }
 0x870   : > { %v2936_v54 = vrot.slane %v2928_v36, %v8039_v51  ;;  %v2841_v58 = vpop.f32.mrb[33].mxu0  ;;  %v2930_v0 = vpop.f32.mrb[69].mxu1 }
 0x871   : > { %v2940_v63 = vrot.slane %v2930_v0, %v8039_v51 }
 0x872   : > { %5997 = vrcp.f32 %v2936_v54 }
 0x873   : > { %5999 = vrcp.f32 %v2940_v63  ;;  %v2845_v47 = vpop.f32.mrb[34].mxu0 }
 0x874   : > { %v2847_v45 = vpop.f32.mrb[35].mxu0 }
 0x877   : > { %v2851_v48 = vpop.f32.mrb[36].mxu0 }
 0x878   : > { %v2853_v5 = vpop.f32.mrb[37].mxu0 }
 0x87b   : > { %v2857_v60 = vpop.f32.mrb[38].mxu0 }
 0x87c   : > { %v5998_v1 = vpop.eup %5997  ;;  %v2859_v24 = vpop.f32.mrb[39].mxu0 }
 0x87d   : > { %v6000_v25 = vpop.eup %5999  ;;  %v7235_v61 = vmul.f32 %v5998_v1, %v2845_v47  ;;  %v7237_v13 = vmul.f32 %v5998_v1, %v2851_v48  ;;  %v7239_v62 = vmul.f32 %v5998_v1, %v2857_v60  ;;  %v7241_v4 = vmul.f32 %v5998_v1, %v2839_v26 }
 0x87e   : > { %v7243_v29 = vmul.f32 %v6000_v25, %v2847_v45  ;;  %v7245_v27 = vmul.f32 %v6000_v25, %v2853_v5  ;;  %v7247_v31 = vmul.f32 %v6000_v25, %v2859_v24  ;;  %v7249_v7 = vmul.f32 %v6000_v25, %v2841_v58 }
 0x87f   : > { %v3017_v44 = vpop.f32.mrb[40].mxu0 }
 0x880   : > { %v3019_v12 = vpop.f32.mrb[41].mxu0  ;;  %v3036_v14 = vsel %vm859_vm2, %v3017_v44, -inf }
 0x881   : > { %3037 = vmax.xlane.f32.xlu0 %v3036_v14 }
 0x883   : > { %v3022_v3 = vpop.f32.mrb[42].mxu0 }
 0x884   : > { %v3024_v32 = vpop.f32.mrb[43].mxu0  ;;  %v3039_v46 = vsel %vm859_vm2, %v3022_v3, -inf }
 0x885   : > { %3040 = vmax.xlane.f32.xlu1 %v3039_v46 }
 0x887   : > { %v3027_v15 = vpop.f32.mrb[44].mxu0 }
 0x888   : > { %v3029_v16 = vpop.f32.mrb[45].mxu0  ;;  %v3042_v52 = vsel %vm859_vm2, %v3027_v15, -inf }
 0x889   : > { %3043 = vmax.xlane.f32.xlu0 %v3042_v52 }
 0x88b   : > { %v3032_v49 = vpop.f32.mrb[46].mxu0 }
 0x88c   : > { %v3034_v53 = vpop.f32.mrb[47].mxu0  ;;  %v3045_v6 = vsel %vm859_vm2, %v3032_v49, -inf }
 0x88d   : > { %3046 = vmax.xlane.f32.xlu0 %v3045_v6  ;;  %v3199_v53 = vstv %s3197_s23  ;;  %v3208_v6 = vstv %s5019_s0 }
 0x90e   : > { %v3038_v41 = vpop.xlane.xlu0 %3037 }
 0x90f   : > { %v3048_v20 = vsub.f32 %v3038_v41, %v3017_v44 }
 0x911   : > { %v3052_v23 = vsel %vm859_vm2, %v3048_v20, -inf }
 0x912   : > { %3053 = vmax.xlane.f32.xlu1 %v3052_v23  ;;  %v3041_v35 = vpop.xlane.xlu1 %3040 }
 0x913   : > { %v3049_v37 = vsub.f32 %v3041_v35, %v3022_v3 }
 0x915   : > { %v3055_v8 = vsel %vm859_vm2, %v3049_v37, -inf }
 0x916   : > { %v3044_v33 = vpop.xlane.xlu0 %3043  ;;  %3056 = vmax.xlane.f32.xlu0 %v3055_v8 }
 0x917   : > { %v3050_v38 = vsub.f32 %v3044_v33, %v3027_v15  ;;  %v3225_v33 = vmul.f32 2.0, %v8032_v22 }
 0x919   : > { %v3058_v30 = vsel %vm859_vm2, %v3050_v38, -inf }
 0x91a   : > { %3059 = vmax.xlane.f32.xlu1 %v3058_v30  ;;  %v3047_v9 = vpop.xlane.xlu0 %3046  ;;  %v3226_v30 = vmul.f32 2.0, %v8031_v21  ;;  %v3230_v21 = vmul.f32 2.0, %v8035_v34  ;;  %v3207_v34 = vmul.f32 %v3199_v53, %v7247_v31 }
 0x91b   : > { %v3051_v40 = vsub.f32 %v3047_v9, %v3032_v49  ;;  %v3227_v9 = vmul.f32 2.0, %v8034_v2  ;;  %v3231_v2 = vmul.f32 2.0, %v8038_v56 }
 0x91d   : > { %v3061_v55 = vsel %vm859_vm2, %v3051_v40, -inf }
 0x91e   : > { %3062 = vmax.xlane.f32.xlu0 %v3061_v55 }
 0x99f   : > { %v3054_v18 = vpop.xlane.xlu1 %3053 }
 0x9a0   : > { %v3064_v19 = vsub.f32 %v3048_v20, %v3054_v18  ;;  %v3200_v20 = vmul.f32 %v3199_v53, %v7241_v4  ;;  %v3228_v18 = vmul.f32 2.0, %v8033_v17 }
 0x9a2   : > { %v3068_v28 = vmul.f32 1.442695, %v3064_v19  ;;  %v3202_v19 = vmul.f32 %v3199_v53, %v7235_v61 }
 0x9a3   : > { %v3057_v10 = vpop.xlane.xlu0 %3056 }
 0x9a4   : > { %6001 = vpow2.f32 %v3068_v28  ;;  %v3065_v50 = vsub.f32 %v3049_v37, %v3057_v10  ;;  %v3201_v37 = vmul.f32 %v3199_v53, %v7249_v7  ;;  %v3229_v7 = vmul.f32 2.0, %v8036_v42 }
 0x9a5   : > { %v3206_v42 = vmul.f32 %v3199_v53, %v7239_v62 }
 0x9a6   : > { %v3070_v59 = vmul.f32 1.442695, %v3065_v50  ;;  %v3203_v50 = vmul.f32 %v3199_v53, %v7243_v29 }
 0x9a7   : > { %v3060_v57 = vpop.xlane.xlu1 %3059 }
 0x9a8   : > { %6003 = vpow2.f32 %v3070_v59  ;;  %v3066_v11 = vsub.f32 %v3050_v38, %v3060_v57  ;;  %v3204_v57 = vmul.f32 %v3199_v53, %v7237_v13 }
 0x9aa   : > { %v3072_v26 = vmul.f32 1.442695, %v3066_v11 }
 0x9ab   : > { %v3063_v36 = vpop.xlane.xlu0 %3062 }
 0x9ac   : > { %6005 = vpow2.f32 %v3072_v26  ;;  %v3067_v54 = vsub.f32 %v3051_v40, %v3063_v36 }
 0x9ae   : > { %v6002_v58 = vpop.eup %6001  ;;  %v3074_v0 = vmul.f32 1.442695, %v3067_v54 }
 0x9af   : > { %v3076_v63 = vsel %vm859_vm2, %v6002_v58, 0.0 }
 0x9b0   : > { %6007 = vpow2.f32 %v3074_v0  ;;  %3077 = vadd.xlane.f32.xlu1 %v3076_v63 }
 0x9b2   : > { %v6004_v47 = vpop.eup %6003 }
 0x9b3   : > { %v3079_v45 = vsel %vm859_vm2, %v6004_v47, 0.0 }
 0x9b4   : > { %3080 = vadd.xlane.f32.xlu0 %v3079_v45 }
 0x9b6   : > { %v6006_v48 = vpop.eup %6005 }
 0x9b7   : > { %v3082_v5 = vsel %vm859_vm2, %v6006_v48, 0.0 }
 0x9b8   : > { %3083 = vadd.xlane.f32.xlu1 %v3082_v5 }
 0x9ba   : > { %v6008_v60 = vpop.eup %6007 }
 0x9bb   : > { %v3085_v1 = vsel %vm859_vm2, %v6008_v60, 0.0 }
 0x9bc   : > { %3086 = vadd.xlane.f32.xlu0 %v3085_v1 }
 0xa3d   : > { %v3078_v24 = vpop.xlane.xlu1 %3077 }
 0xa3e   : > { %6009 = vrcp.f32 %v3078_v24  ;;  %v3232_v24 = vmul.f32 2.0, %v8037_v43 }
 0xa41   : > { %v3081_v25 = vpop.xlane.xlu0 %3080 }
 0xa42   : > { %6011 = vrcp.f32 %v3081_v25 }
 0xa45   : > { %v3084_v44 = vpop.xlane.xlu1 %3083 }
 0xa46   : > { %6013 = vrcp.f32 %v3084_v44 }
 0xa48   : > { %v6010_v12 = vpop.eup %6009 }
 0xa49   : > { %v3089_v14 = vmul.f32 %v6010_v12, %v6002_v58  ;;  %v3087_v3 = vpop.xlane.xlu0 %3086  ;;  %v3205_v58 = vmul.f32 %v3199_v53, %v7245_v27  ;;  %v4736_v53 = vld [vmem:[%s8040_s2] sm:$0xff] }
 0xa4a   : > { %6015 = vrcp.f32 %v3087_v3 }
 0xa4b   : > { %5015 = vmatmul.mubr.msk.f32.vlgmr.msra.gmra.mrb[48].mxu0 %vm859_vm2, %v3089_v14 }
 0xa4c   : > { %v6012_v32 = vpop.eup %6011  ;;  %3178 = vmatprep.mubr.f32.mxu0 %v8025_v39 }
 0xa4d   : > { %v3091_v46 = vmul.f32 %v6012_v32, %v6004_v47 }
 0xa4f   : > { %5016 = vmatmul.mubr.msk.f32.gmra.mrb[50].mxu0 %vm859_vm2, %v3091_v46 }
 0xa50   : > { %v6014_v15 = vpop.eup %6013  ;;  %3184 = vmatprep.mubr.f32.mxu0 %v8025_v39 }
 0xa51   : > { %v3093_v16 = vmul.f32 %v6014_v15, %v6006_v48 }
 0xa53   : > { %5017 = vmatmul.mubr.msk.f32.gmra.mrb[52].mxu0 %vm859_vm2, %v3093_v16 }
 0xa54   : > { %v6016_v52 = vpop.eup %6015  ;;  %3190 = vmatprep.mubr.f32.mxu0 %v8025_v39 }
 0xa55   : > { %v3095_v49 = vmul.f32 %v6016_v52, %v6008_v60 }
 0xa57   : > { %5018 = vmatmul.mubr.msk.f32.gmra.mrb[54].mxu0 %vm859_vm2, %v3095_v49 }
 0xa58   : > { %3457 = vmatprep.mubr.f32.mxu0 %v8025_v39 }
 0xb1e   : > { %v3174_v41 = vpop.f32.mrb[48].mxu0 }
 0xb1f   : > { %v3209_v23 = vmul.f32 %v3208_v6, %v3174_v41  ;;  %v3176_v35 = vpop.f32.mrb[49].mxu0  ;;  %v4737_v41 = vld [vmem:[%s8040_s2 + $0x8] sm:$0xff] }
 0xb20   : > { %v3210_v8 = vmul.f32 %v3208_v6, %v3176_v35 }
 0xb21   : > { %v3217_v38 = vadd.f32 %v3209_v23, %v3200_v20  ;;  %v4739_v20 = vld [vmem:[%s8040_s2 + $0x18] sm:$0xff]  ;;  %v7348_v23 = vld [vmem:[%s7949_s25] sm:$0x3] }
 0xb22   : > { %v3218_v40 = vadd.f32 %v3210_v8, %v3201_v37  ;;  %v3180_v55 = vpop.f32.mrb[50].mxu0  ;;  %v3290_v35 = vadd.s32 4294967293, %v7348_v23  ;;  %v8043_v8 = vld [vmem:[#allocation13_spill] sm:$0xff] }
 0xb23   : > { %v7278_v28 = vadd.f32 %v3225_v33, %v3217_v38  ;;  %v3211_v4 = vmul.f32 %v3208_v6, %v3180_v55  ;;  %v3182_v10 = vpop.f32.mrb[51].mxu0  ;;  %v8044_v33 = vmov 0  }
 0xb24   : > { %v7282_v22 = vadd.f32 %v3226_v30, %v3218_v40  ;;  %v3212_v59 = vmul.f32 %v3208_v6, %v3182_v10  ;;  %vm3291_vm7 = vcmp.ge.s32.totalorder %v3290_v35, 0  ;;  %vm3292_vm8 = vcmp.lt.s32.totalorder %v3290_v35, 16  ;;  %v8045_v30 = vld [vmem:[#allocation15_spill] sm:$0xff]  ;;  %v6018_v40 = vld [vmem:[%s7947_s16] sm:$0x3] }
 0xb25   : > { %v3219_v17 = vadd.f32 %v3211_v4, %v3202_v19  ;;  %vm7351_vm9 = vmand %vm3291_vm7, %vm3292_vm8  ;;  %v7366_v55 = vadd.s32 4294967293, %v6018_v40 }
 0xb26   : > { %v3220_v11 = vadd.f32 %v3212_v59, %v3203_v50  ;;  %v3186_v61 = vpop.f32.mrb[52].mxu0  ;;  %v7289_v26 = vpack.i.bf16 %v7282_v22, %v7278_v28  ;;  %vm3360_vm10 = vmand %vm7351_vm9, %vm1330_vm13 }
 0xb27   : > { %v7292_v36 = vadd.f32 %v3227_v9, %v3219_v17  ;;  %v3213_v29 = vmul.f32 %v3208_v6, %v3186_v61  ;;  %v3188_v54 = vpop.f32.mrb[53].mxu0  ;;  %vm3361_vm11 = vmand %vm3360_vm10, %vm7935_vm15  ;;  %vm3295_vm0 = vcmp.ge.s32.totalorder %v7366_v55, 0  ;;  %vm3297_vm4 = vcmp.lt.s32.totalorder %v7366_v55, 16 }
 0xb28   : > { %v7296_v56 = vadd.f32 %v3228_v18, %v3220_v11  ;;  %v3214_v13 = vmul.f32 %v3208_v6, %v3188_v54  ;;  %v3362_v38 = vsel %vm3361_vm11, 1, %v8044_v33  ;;  %vm3296_vm6 = vmand %vm7351_vm9, %vm3295_vm0 }
 0xb29   : > { %v3221_v0 = vadd.f32 %v3213_v29, %v3204_v57  ;;  %v5708_v63 = vpack.i.bf16 %v7292_v36, %v7278_v28  ;;  %v5406_v46 = vpack.c.bf16 %v7292_v36, %v7278_v28  ;;  %v3370_v9 = vrot.slane %v3362_v38, %v8045_v30  ;;  %vm3298_vm8 = vmand %vm3296_vm6, %vm3297_vm4 }
 0xb2a   : > { %v3222_v47 = vadd.f32 %v3214_v13, %v3205_v58  ;;  %v3192_v45 = vpop.f32.mrb[54].mxu0  ;;  %v5713_v62 = vpack.i.bf16 %v7296_v56, %v7282_v22  ;;  %v5793_v1 = vpack.i.bf16 %v7296_v56, %v7292_v36  ;;  %v5404_v32 = vpack.c.bf16 %v7296_v56, %v7282_v22  ;;  %v3759_v22 = vld [vmem:[#allocation7 + $0x60] sm:$0xff] }
 0xb2b   : > { %v7302_v48 = vadd.f32 %v3229_v7, %v3221_v0  ;;  %v3215_v5 = vmul.f32 %v3208_v6, %v3192_v45  ;;  %5709 = vrot.lane.b32.xlu0 %v5708_v63, %s6149_s20  ;;  %v3194_v27 = vpop.f32.mrb[55].mxu0  ;;  %v3366_v18 = vrot.slane %v3362_v38, %v8039_v51  ;;  %vm3372_vm12 = vcmp.eq.s32.totalorder %v3370_v9, 1 }
 0xb2c   : > { %v7304_v60 = vadd.f32 %v3230_v21, %v3222_v47  ;;  %v3216_v31 = vmul.f32 %v3208_v6, %v3194_v27  ;;  %5714 = vrot.lane.b32.xlu1 %v5713_v62, %s6149_s20  ;;  %v4738_v6 = vld [vmem:[%s8040_s2 + $0x10] sm:$0xff]  ;;  %vm7370_vm3 = vmpackc.low %vm3372_vm12, %vm3372_vm12  ;;  %vm3273_vm6 = vcmask 416768  }
 0xb2d   : > { %v3223_v25 = vadd.f32 %v3215_v5, %v3206_v42  ;;  %vm3371_vm1 = vcmp.eq.s32.totalorder %v3366_v18, 1 }
 0xb2e   : > { %v3224_v44 = vadd.f32 %v3216_v31, %v3207_v34  ;;  %v5798_v12 = vpack.i.bf16 %v7304_v60, %v7302_v48  ;;  %vm7385_vm7 = vmpackc.low %vm3371_vm1, %vm3371_vm1  ;;  %v3299_v34 = vsel %vm3298_vm8, 1, %v8044_v33 }
 0xb2f   : > { %v7311_v14 = vadd.f32 %v3231_v2, %v3223_v25  ;;  %5729 = vrot.lane.b32.xlu0 %v5713_v62, %s6150_s28  ;;  %v7375_v2 = vadd.s32 3, %v6018_v40  ;;  %v3303_v27 = vrot.slane %v3299_v34, %v8039_v51 }
 0xb30   : > { %v7313_v3 = vadd.f32 %v3232_v24, %v3224_v44 }
 0xb31   : > { %v5723_v43 = vpack.i.bf16 %v7311_v14, %v7302_v48  ;;  %v5410_v49 = vpack.c.bf16 %v7311_v14, %v7302_v48  ;;  %vm3626_vm10 = vcmp.ge.s32.totalorder %v7375_v2, 0  ;;  %vm3628_vm12 = vcmp.lt.s32.totalorder %v7375_v2, 16 }
 0xb32   : > { %v5738_v15 = vpack.i.bf16 %v7313_v3, %v7304_v60  ;;  %v5803_v16 = vpack.i.bf16 %v7313_v3, %v7311_v14  ;;  %v5408_v52 = vpack.c.bf16 %v7313_v3, %v7304_v60  ;;  %vm3627_vm11 = vmand %vm7351_vm9, %vm3626_vm10  ;;  %v3761_v60 = vld [vmem:[#allocation7 + $0x70] sm:$0xff]  ;;  %v3762_v14 = vld [vmem:[#allocation7 + $0x78] sm:$0xff] }
 0xb33   : > { %vm3629_vm1 = vmand %vm3627_vm11, %vm3628_vm12  ;;  %vm3608_vm11 = vcmask 367616  }
 0xb34   : > { %5739 = vrot.lane.b32.xlu0 %v5738_v15, %s6150_s28  ;;  %5719 = vrot.lane.b32.xlu1 %v5738_v15, %s6149_s20 }
 0xb38   : > { %5749 = vrot.lane.b32.xlu0 %v5713_v62, %s6151_s24  ;;  %5724 = vrot.lane.b32.xlu1 %v5723_v43, %s6149_s20 }
 0xb3c   : > { %5759 = vrot.lane.b32.xlu0 %v5738_v15, %s6151_s24  ;;  %5734 = vrot.lane.b32.xlu1 %v5708_v63, %s6150_s28 }
 0xb40   : > { %5769 = vrot.lane.b32.xlu0 %v5713_v62, %s6152_s1  ;;  %5744 = vrot.lane.b32.xlu1 %v5723_v43, %s6150_s28 }
 0xb44   : > { %5779 = vrot.lane.b32.xlu0 %v5738_v15, %s6152_s1  ;;  %5754 = vrot.lane.b32.xlu1 %v5708_v63, %s6151_s24 }
 0xb48   : > { %5789 = vrot.lane.b32.xlu0 %v7289_v26, %s6153_s29  ;;  %5764 = vrot.lane.b32.xlu1 %v5723_v43, %s6151_s24 }
 0xb4c   : > { %5799 = vrot.lane.b32.xlu0 %v5798_v12, %s6153_s29  ;;  %5774 = vrot.lane.b32.xlu1 %v5708_v63, %s6152_s1  ;;  %v3307_v63 = vrot.slane %v3299_v34, %v8045_v30 }
 0xb4e   : > { %vm7414_vm9 = vcmp.eq.s32.totalorder %v3307_v63, 1 }
 0xb4f   : > { %vm5369_vm8 = vmpackc.low %vm7414_vm9, %vm7414_vm9 }
 0xb50   : > { %5809 = vrot.lane.b32.xlu0 %v7289_v26, %s6154_s14  ;;  %5784 = vrot.lane.b32.xlu1 %v5723_v43, %s6152_s1 }
 0xb54   : > { %5819 = vrot.lane.b32.xlu0 %v5798_v12, %s6154_s14  ;;  %5794 = vrot.lane.b32.xlu1 %v5793_v1, %s6153_s29 }
 0xb58   : > { %5829 = vrot.lane.b32.xlu0 %v7289_v26, %s6155_s27  ;;  %5804 = vrot.lane.b32.xlu1 %v5803_v16, %s6153_s29 }
 0xb5c   : > { %5839 = vrot.lane.b32.xlu0 %v5798_v12, %s6155_s27  ;;  %5814 = vrot.lane.b32.xlu1 %v5793_v1, %s6154_s14 }
 0xb60   : > { %5849 = vrot.lane.b32.xlu0 %v7289_v26, %s6156_s26  ;;  %5824 = vrot.lane.b32.xlu1 %v5803_v16, %s6154_s14 }
 0xb64   : > { %5859 = vrot.lane.b32.xlu0 %v5798_v12, %s6156_s26  ;;  %5834 = vrot.lane.b32.xlu1 %v5793_v1, %s6155_s27 }
 0xb68   : > { %4742 = vperm.xlu0 %5626, %v4736_v53   ;;  %5844 = vrot.lane.b32.xlu1 %v5803_v16, %s6155_s27 }
 0xb6c   : > { %4752 = vperm.xlu0 %5626, %v4738_v6   ;;  %5854 = vrot.lane.b32.xlu1 %v5793_v1, %s6156_s26 }
 0xb70   : > { %5864 = vrot.lane.b32.xlu1 %v5803_v16, %s6156_s26  ;;  %v7419_v16 = vsel %vm3629_vm1, 1, %v8044_v33  ;;  %s5123_s26 = sshll.u32 %s8087_s30, 6 }
 0xb71   : > { %s7849_s23 = scalar_lea.vmem %s8084_s22, %s5123_s26 }
 0xb74   : > { %4747 = vperm.xlu1 %5627, %v4737_v41  }
 0xb78   : > { %4757 = vperm.xlu1 %5627, %v4739_v20  }
 0xb9d   : > { %v5710_v19 = vpop.permute.xlu0 %5709 }
 0xb9e   : > { %v5712_v4 = vunpack.i.h.bf16 %v5710_v19  ;;  %v5711_v10 = vunpack.i.l.bf16 %v5710_v19  ;;  %v5715_v7 = vpop.permute.xlu1 %5714  ;;  %v3319_v19 = vld [vmem:[#allocation7 + $0x20] sm:$0xff] }
 0xb9f   : > { %v5717_v50 = vunpack.i.h.bf16 %v5715_v7  ;;  %v5716_v59 = vunpack.i.l.bf16 %v5715_v7 }
 0xba1   : > { %v3345_v57 = vsel %vm3343_vm14, %v5712_v4, %v5717_v50  ;;  %v3357_v17 = vsel %vm3343_vm14, %v5717_v50, %v5712_v4  ;;  %v3344_v11 = vsel %vm3343_vm14, %v5711_v10, %v5716_v59  ;;  %v3356_v61 = vsel %vm3343_vm14, %v5716_v59, %v5711_v10  ;;  %v5730_v54 = vpop.permute.xlu0 %5729  ;;  %v3320_v50 = vld [vmem:[#allocation7 + $0x28] sm:$0xff] }
 0xba2   : > { %v5356_v26 = vpack.c.bf16 %v3345_v57, %v3344_v11  ;;  %v5359_v42 = vpack.c.bf16 %v3357_v17, %v3356_v61  ;;  %v5732_v53 = vunpack.i.h.bf16 %v5730_v54  ;;  %v5731_v6 = vunpack.i.l.bf16 %v5730_v54  ;;  %v3587_v61 = vld [vmem:[#allocation7 + $0x58] sm:$0xff] }
 0xba3   : > { %v3638_v59 = vrot.slane %v7419_v16, %v8045_v30 }
 0xba4   : > { %5358 = vmatprep.subr.msk.bf16.mxu0 %vm7370_vm3, %v5356_v26  ;;  %5460 = vmatprep.subr.msk.bf16.mxu1 %vm7370_vm3, %v5356_v26 }
 0xba5   : > { %5361 = vmatpush1.bf16.msk.msra.mxu0 %vm7385_vm7, %v5359_v42  ;;  %5462 = vmatpush1.bf16.msk.msra.mxu1 %vm7385_vm7, %v5359_v42  ;;  %vm7472_vm1 = vcmp.eq.s32.totalorder %v3638_v59, 1 }
 0xba6   : > { %v5720_v58 = vpop.permute.xlu1 %5719  ;;  %v5740_v13 = vpop.permute.xlu0 %5739  ;;  %vm5381_vm15 = vmpackc.low %vm7472_vm1, %vm7472_vm1 }
 0xba7   : > { %v5722_v47 = vunpack.i.h.bf16 %v5720_v58  ;;  %v5721_v45 = vunpack.i.l.bf16 %v5720_v58  ;;  %v5742_v21 = vunpack.i.h.bf16 %v5740_v13  ;;  %v5741_v57 = vunpack.i.l.bf16 %v5740_v13  ;;  %vm4086_vm1 = vmand %vm6477_vm5, %vm3626_vm10 }
 0xbaa   : > { %v5725_v0 = vpop.permute.xlu1 %5724  ;;  %v7421_v35 = vpop.permute.xlu0 %5749 }
 0xbab   : > { %v5727_v62 = vunpack.i.h.bf16 %v5725_v0  ;;  %v5726_v5 = vunpack.i.l.bf16 %v5725_v0 }
 0xbad   : > { %v3346_v31 = vsel %vm3343_vm14, %v5726_v5, %v5721_v45  ;;  %v3347_v1 = vsel %vm3343_vm14, %v5727_v62, %v5722_v47  ;;  %v3358_v24 = vsel %vm3343_vm14, %v5721_v45, %v5726_v5  ;;  %v3359_v25 = vsel %vm3343_vm14, %v5722_v47, %v5727_v62  ;;  %v3321_v47 = vld [vmem:[#allocation7 + $0x30] sm:$0xff] }
 0xbae   : > { %v5362_v44 = vpack.c.bf16 %v3347_v1, %v3346_v31  ;;  %v5365_v12 = vpack.c.bf16 %v3359_v25, %v3358_v24  ;;  %v5735_v43 = vpop.permute.xlu1 %5734  ;;  %vm7427_vm14 = vcmp.eq.s32.totalorder %v3303_v27, 1  ;;  %v5760_v34 = vpop.permute.xlu0 %5759  ;;  %v5752_v62 = vunpack.i.h.bf16 %v7421_v35 }
 0xbaf   : > { %v5737_v41 = vunpack.i.h.bf16 %v5735_v43  ;;  %v5736_v20 = vunpack.i.l.bf16 %v5735_v43  ;;  %v5751_v5 = vunpack.i.l.bf16 %v7421_v35  ;;  %v3634_v1 = vrot.slane %v7419_v16, %v8039_v51  ;;  %v3322_v43 = vld [vmem:[#allocation7 + $0x38] sm:$0xff]  ;;  %v3586_v35 = vld [vmem:[#allocation7 + $0x50] sm:$0xff] }
 0xbb0   : > { %5364 = vmatprep.subr.msk.bf16.mxu0 %vm7370_vm3, %v5362_v44  ;;  %5461 = vmatprep.subr.msk.bf16.mxu1 %vm7370_vm3, %v5362_v44  ;;  %vm5372_vm3 = vmpackc.low %vm7427_vm14, %vm7427_vm14  ;;  %v5762_v16 = vunpack.i.h.bf16 %v5760_v34  ;;  %vm3783_vm14 = vcmask 23552  }
 0xbb1   : > { %v3275_v38 = vsel %vm3273_vm6, %v5737_v41, %v5732_v53  ;;  %v3287_v9 = vsel %vm3273_vm6, %v5732_v53, %v5737_v41  ;;  %v3274_v40 = vsel %vm3273_vm6, %v5736_v20, %v5731_v6  ;;  %v3286_v18 = vsel %vm3273_vm6, %v5731_v6, %v5736_v20  ;;  %5367 = vmatpush1.bf16.msk.msra.mxu0 %vm7385_vm7, %v5365_v12 }
 0xbb2   : > { %v5368_v4 = vpack.c.bf16 %v3275_v38, %v3274_v40  ;;  %v5371_v10 = vpack.c.bf16 %v3287_v9, %v3286_v18  ;;  %5463 = vmatpush1.bf16.msk.msra.mxu1 %vm7385_vm7, %v5365_v12  ;;  %v5745_v7 = vpop.permute.xlu1 %5744  ;;  %vm7456_vm7 = vmand %vm6477_vm5, %vm3295_vm0  ;;  %v5761_v41 = vunpack.i.l.bf16 %v5760_v34  ;;  %v5770_v20 = vpop.permute.xlu0 %5769  ;;  %vm7507_vm9 = vcmp.eq.s32.totalorder %v3634_v1, 1  ;;  %v3932_v1 = vld [vmem:[#allocation7 + $0x88] sm:$0xff] }
 0xbb3   : > { %v5747_v17 = vunpack.i.h.bf16 %v5745_v7  ;;  %v5746_v11 = vunpack.i.l.bf16 %v5745_v7 }
 0xbb4   : > { %5370 = vmatprep.subr.msk.bf16.mxu1 %vm5369_vm8, %v5368_v4  ;;  %5028 = vmatmul.mubr.msk.f32.vlgmr.msra.gmra.mrb[56].mxu0 %vm859_vm2, %v3319_v19  ;;  %v3241_v4 = vld [vmem:[#allocation7] sm:$0xff] }
 0xbb5   : > { %v3277_v42 = vsel %vm3273_vm6, %v5747_v17, %v5742_v21  ;;  %v3289_v29 = vsel %vm3273_vm6, %v5742_v21, %v5747_v17  ;;  %v3276_v54 = vsel %vm3273_vm6, %v5746_v11, %v5741_v57  ;;  %v3288_v58 = vsel %vm3273_vm6, %v5741_v57, %v5746_v11  ;;  %5029 = vmatmul.mubr.msk.f32.vlgmr.msra.gmra.mrb[70].mxu1 %vm859_vm2, %v3320_v50  ;;  %vm3801_vm6 = vmand %vm7456_vm7, %vm3297_vm4 }
 0xbb6   : > { %v5374_v13 = vpack.c.bf16 %v3277_v42, %v3276_v54  ;;  %v5377_v0 = vpack.c.bf16 %v3289_v29, %v3288_v58  ;;  %5373 = vmatpush1.bf16.msk.msra.mxu1 %vm5372_vm3, %v5371_v10  ;;  %v5755_v63 = vpop.permute.xlu1 %5754  ;;  %3469 = vmatprep.mubr.f32.mxu1 %v8025_v39  ;;  %v3802_v15 = vsel %vm3801_vm6, 1, %v8044_v33  ;;  %v5772_v10 = vunpack.i.h.bf16 %v5770_v20  ;;  %v3242_v54 = vld [vmem:[#allocation7 + $0x8] sm:$0xff]  ;;  %vm4087_vm6 = vmand %vm4086_vm1, %vm3628_vm12 }
 0xbb7   : > { %v5757_v27 = vunpack.i.h.bf16 %v5755_v63  ;;  %v5756_v31 = vunpack.i.l.bf16 %v5755_v63  ;;  %v3810_v40 = vrot.slane %v3802_v15, %v8045_v30  ;;  %v5771_v50 = vunpack.i.l.bf16 %v5770_v20 }
 0xbb8   : > { %5376 = vmatprep.subr.msk.bf16.mxu1 %vm5369_vm8, %v5374_v13  ;;  %vm5384_vm8 = vmpackc.low %vm7507_vm9, %vm7507_vm9  ;;  %v3243_v13 = vld [vmem:[#allocation7 + $0x10] sm:$0xff]  ;;  %v3806_v63 = vrot.slane %v3802_v15, %v8039_v51  ;;  %vm4237_vm1 = vcmask 678912  }
 0xbb9   : > { %v3610_v24 = vsel %vm3608_vm11, %v5757_v27, %v5752_v62  ;;  %v3609_v25 = vsel %vm3608_vm11, %v5756_v31, %v5751_v5  ;;  %5030 = vmatmul.mubr.msk.f32.gmra.mrb[72].mxu1 %vm859_vm2, %v3321_v47  ;;  %v3622_v37 = vsel %vm3608_vm11, %v5752_v62, %v5757_v27  ;;  %v3621_v38 = vsel %vm3608_vm11, %v5751_v5, %v5756_v31  ;;  %v5780_v47 = vpop.permute.xlu0 %5779  ;;  %v3244_v5 = vld [vmem:[#allocation7 + $0x18] sm:$0xff] }
 0xbba   : > { %v5380_v44 = vpack.c.bf16 %v3610_v24, %v3609_v25  ;;  %5379 = vmatpush1.bf16.msk.msra.mxu1 %vm5372_vm3, %v5377_v0  ;;  %v5765_v12 = vpop.permute.xlu1 %5764  ;;  %3475 = vmatprep.mubr.f32.mxu1 %v8025_v39  ;;  %v5383_v59 = vpack.c.bf16 %v3622_v37, %v3621_v38  ;;  %vm7524_vm3 = vcmp.eq.s32.totalorder %v3810_v40, 1  ;;  %v5782_v27 = vunpack.i.h.bf16 %v5780_v47 }
 0xbbb   : > { %v5767_v53 = vunpack.i.h.bf16 %v5765_v12  ;;  %v5766_v6 = vunpack.i.l.bf16 %v5765_v12  ;;  %vm5393_vm7 = vmpackc.low %vm7524_vm3, %vm7524_vm3  ;;  %v5781_v31 = vunpack.i.l.bf16 %v5780_v47  ;;  %v4088_v37 = vsel %vm4087_vm6, 1, %v8044_v33 }
 0xbbc   : > { %5382 = vmatprep.subr.msk.bf16.mxu1 %vm5381_vm15, %v5380_v44  ;;  %v4258_v38 = vadd.s32 3, %v7348_v23  ;;  %v4096_v40 = vrot.slane %v4088_v37, %v8045_v30 }
 0xbbd   : > { %v3612_v9 = vsel %vm3608_vm11, %v5767_v53, %v5762_v16  ;;  %5031 = vmatmul.mubr.msk.f32.gmra.mrb[74].mxu1 %vm859_vm2, %v3322_v43  ;;  %v3611_v18 = vsel %vm3608_vm11, %v5766_v6, %v5761_v41  ;;  %v3624_v17 = vsel %vm3608_vm11, %v5762_v16, %v5767_v53  ;;  %v3623_v11 = vsel %vm3608_vm11, %v5761_v41, %v5766_v6  ;;  %v3584_v43 = vld [vmem:[#allocation7 + $0x40] sm:$0xff]  ;;  %v3585_v41 = vld [vmem:[#allocation7 + $0x48] sm:$0xff] }
 0xbbe   : > { %v5775_v19 = vpop.permute.xlu1 %5774  ;;  %3558 = vmatprep.mubr.f32.mxu1 %v8025_v39  ;;  %v5386_v7 = vpack.c.bf16 %v3612_v9, %v3611_v18  ;;  %v5389_v34 = vpack.c.bf16 %v3624_v17, %v3623_v11  ;;  %v5790_v18 = vpop.permute.xlu0 %5789  ;;  %vm4259_vm5 = vcmp.ge.s32.totalorder %v4258_v38, 0  ;;  %vm4260_vm9 = vcmp.lt.s32.totalorder %v4258_v38, 16 }
 0xbbf   : > { %v5777_v21 = vunpack.i.h.bf16 %v5775_v19  ;;  %v5776_v57 = vunpack.i.l.bf16 %v5775_v19  ;;  %v5792_v56 = vunpack.i.h.bf16 %v5790_v18  ;;  %vm7604_vm3 = vmand %vm4259_vm5, %vm4260_vm9 }
 0xbc0   : > { %vm4434_vm5 = vmand %vm7604_vm3, %vm1330_vm13  ;;  %vm8073_vm13 = vcmp.lt.s32.totalorder %v8043_v8, 16 }
 0xbc1   : > { %5040 = vmatmul.mubr.msk.f32.vlgmr.msra.gmra.mrb[76].mxu1 %vm859_vm2, %v3241_v4  ;;  %v3785_v42 = vsel %vm3783_vm14, %v5777_v21, %v5772_v10  ;;  %v3784_v29 = vsel %vm3783_vm14, %v5776_v57, %v5771_v50  ;;  %v3797_v24 = vsel %vm3783_vm14, %v5772_v10, %v5777_v21  ;;  %v3796_v25 = vsel %vm3783_vm14, %v5771_v50, %v5776_v57  ;;  %v3760_v50 = vld [vmem:[#allocation7 + $0x68] sm:$0xff] }
 0xbc2   : > { %5385 = vmatpush1.bf16.msk.msra.mxu1 %vm5384_vm8, %v5383_v59  ;;  %v5392_v58 = vpack.c.bf16 %v3785_v42, %v3784_v29  ;;  %3564 = vmatprep.mubr.f32.mxu1 %v8025_v39  ;;  %v5785_v0 = vpop.permute.xlu1 %5784  ;;  %v5395_v15 = vpack.c.bf16 %v3797_v24, %v3796_v25  ;;  %v5800_v3 = vpop.permute.xlu0 %5799 }
 0xbc3   : > { %5388 = vmatprep.subr.msk.bf16.mxu1 %vm5381_vm15, %v5386_v7  ;;  %v5787_v45 = vunpack.i.h.bf16 %v5785_v0  ;;  %v5786_v62 = vunpack.i.l.bf16 %v5785_v0  ;;  %vm7559_vm15 = vcmp.eq.s32.totalorder %v3806_v63, 1  ;;  %v5802_v57 = vunpack.i.h.bf16 %v5800_v3 }
 0xbc4   : > { %vm5396_vm11 = vmpackc.low %vm7559_vm15, %vm7559_vm15  ;;  %v5801_v17 = vunpack.i.l.bf16 %v5800_v3 }
 0xbc5   : > { %5041 = vmatmul.mubr.msk.f32.gmra.mrb[70].mxu1 %vm859_vm2, %v3242_v54  ;;  %v3787_v44 = vsel %vm3783_vm14, %v5787_v45, %v5782_v27  ;;  %v3786_v12 = vsel %vm3783_vm14, %v5786_v62, %v5781_v31  ;;  %v3799_v16 = vsel %vm3783_vm14, %v5782_v27, %v5787_v45  ;;  %v3798_v53 = vsel %vm3783_vm14, %v5781_v31, %v5786_v62  ;;  %vm4262_vm15 = vmand %vm7604_vm3, %vm3295_vm0 }
 0xbc6   : > { %5391 = vmatpush1.bf16.msk.msra.mxu1 %vm5384_vm8, %v5389_v34  ;;  %3570 = vmatprep.mubr.f32.mxu1 %v8025_v39  ;;  %v5398_v6 = vpack.c.bf16 %v3787_v44, %v3786_v12  ;;  %v5401_v20 = vpack.c.bf16 %v3799_v16, %v3798_v53  ;;  %v5795_v9 = vpop.permute.xlu1 %5794  ;;  %vm7599_vm14 = vcmp.eq.s32.totalorder %v4096_v40, 1  ;;  %vm4065_vm8 = vcmask 1022976   ;;  %vm4263_vm0 = vmand %vm4262_vm15, %vm3297_vm4  ;;  %v5810_v55 = vpop.permute.xlu0 %5809  ;;  %v3931_v34 = vld [vmem:[#allocation7 + $0x80] sm:$0xff] }
 0xbc7   : > { %5394 = vmatprep.subr.msk.bf16.mxu1 %vm5393_vm7, %v5392_v58  ;;  %v5797_v19 = vunpack.i.h.bf16 %v5795_v9  ;;  %v5796_v4 = vunpack.i.l.bf16 %v5795_v9  ;;  %v4084_v0 = vsel %vm4065_vm8, %v5802_v57, %v5801_v17  ;;  %v5812_v63 = vunpack.i.h.bf16 %v5810_v55 }
 0xbc8   : > { %v5811_v47 = vunpack.i.l.bf16 %v5810_v55  ;;  %v4068_v24 = vsel %vm4065_vm8, %v5801_v17, %v5802_v57  ;;  %v4047_v57 = vld [vmem:[#allocation7 + $0xb0] sm:$0xff] }
 0xbc9   : > { %5042 = vmatmul.mubr.msk.f32.gmra.mrb[72].mxu1 %vm859_vm2, %v3243_v13  ;;  %v4083_v7 = vsel %vm4065_vm8, %v5797_v19, %v5796_v4  ;;  %v4067_v26 = vsel %vm4065_vm8, %v5796_v4, %v5797_v19 }
 0xbca   : > { %3576 = vmatprep.mubr.f32.mxu1 %v8025_v39  ;;  %v5805_v36 = vpop.permute.xlu1 %5804  ;;  %v4254_v25 = vsel %vm4237_vm1, %v5812_v63, %v5811_v47  ;;  %v5820_v16 = vpop.permute.xlu0 %5819 }
 0xbcb   : > { %v5806_v48 = vunpack.i.l.bf16 %v5805_v36  ;;  %v5821_v38 = vunpack.i.l.bf16 %v5820_v16 }
 0xbcd   : > { %5043 = vmatmul.mubr.msk.f32.gmra.mrb[74].mxu1 %vm859_vm2, %v3244_v5 }
 0xbce   : > { %3725 = vmatprep.mubr.f32.mxu1 %v8025_v39  ;;  %v5815_v21 = vpop.permute.xlu1 %5814  ;;  %v5830_v40 = vpop.permute.xlu0 %5829 }
 0xbcf   : > { %v5817_v54 = vunpack.i.h.bf16 %v5815_v21  ;;  %v5816_v58 = vunpack.i.l.bf16 %v5815_v21 }
 0xbd1   : > { %5052 = vmatmul.mubr.msk.f32.vlgmr.msra.gmra.mrb[76].mxu1 %vm859_vm2, %v3584_v43  ;;  %v4255_v31 = vsel %vm4237_vm1, %v5817_v54, %v5816_v58 }
 0xbd2   : > { %5397 = vmatpush1.bf16.msk.msra.mxu1 %vm5396_vm11, %v5395_v15  ;;  %3731 = vmatprep.mubr.f32.mxu1 %v8025_v39  ;;  %v5424_v12 = vpack.c.bf16 %v4255_v31, %v4254_v25  ;;  %v5825_v43 = vpop.permute.xlu1 %5824  ;;  %v3933_v15 = vld [vmem:[#allocation7 + $0x90] sm:$0xff]  ;;  %v5840_v17 = vpop.permute.xlu0 %5839 }
 0xbd3   : > { %5400 = vmatprep.subr.msk.bf16.mxu1 %vm5393_vm7, %v5398_v6  ;;  %vm5413_vm7 = vmpackc.low %vm7599_vm14, %vm7599_vm14  ;;  %v5827_v6 = vunpack.i.h.bf16 %v5825_v43 }
 0xbd5   : > { %5053 = vmatmul.mubr.msk.f32.gmra.mrb[70].mxu1 %vm859_vm2, %v3585_v41  ;;  %v5826_v41 = vunpack.i.l.bf16 %v5825_v43 }
 0xbd6   : > { %5403 = vmatpush1.bf16.msk.msra.mxu1 %vm5396_vm11, %v5401_v20  ;;  %3737 = vmatprep.mubr.f32.mxu1 %v8025_v39  ;;  %v3934_v20 = vld [vmem:[#allocation7 + $0x98] sm:$0xff]  ;;  %v5850_v2 = vpop.permute.xlu0 %5849 }
 0xbd7   : > { %5405 = vmatprep.subr.bf16.mxu1 %v5404_v32  ;;  %v5791_v32 = vunpack.i.l.bf16 %v5790_v18  ;;  %v4239_v18 = vsel %vm4237_vm1, %v5816_v58, %v5817_v54  ;;  %v4257_v19 = vsel %vm4237_vm1, %v5827_v6, %v5826_v41  ;;  %v5842_v54 = vunpack.i.h.bf16 %v5840_v17 }
 0xbd8   : > { %v5841_v58 = vunpack.i.l.bf16 %v5840_v17  ;;  %v5852_v27 = vunpack.i.h.bf16 %v5850_v2  ;;  %v5851_v31 = vunpack.i.l.bf16 %v5850_v2 }
 0xbd9   : > { %5054 = vmatmul.mubr.msk.f32.gmra.mrb[72].mxu1 %vm859_vm2, %v3586_v35  ;;  %v4082_v59 = vsel %vm4065_vm8, %v5792_v56, %v5791_v32  ;;  %v4066_v13 = vsel %vm4065_vm8, %v5791_v32, %v5792_v56  ;;  %v5835_v35 = vpop.permute.xlu1 %5834  ;;  %v4045_v56 = vld [vmem:[#allocation7 + $0xa0] sm:$0xff]  ;;  %v4238_v32 = vsel %vm4237_vm1, %v5811_v47, %v5812_v63 }
 0xbda   : > { %3743 = vmatprep.mubr.f32.mxu1 %v8025_v39  ;;  %v5412_v28 = vpack.c.bf16 %v4083_v7, %v4082_v59  ;;  %v5415_v45 = vpack.c.bf16 %v4067_v26, %v4066_v13  ;;  %v5837_v4 = vunpack.i.h.bf16 %v5835_v35  ;;  %v5831_v59 = vunpack.i.l.bf16 %v5830_v40  ;;  %v4048_v26 = vld [vmem:[#allocation7 + $0xb8] sm:$0xff] }
 0xbdd   : > { %5055 = vmatmul.mubr.msk.f32.gmra.mrb[74].mxu1 %vm859_vm2, %v3587_v61  ;;  %v5822_v61 = vunpack.i.h.bf16 %v5820_v16  ;;  %v5845_v21 = vpop.permute.xlu1 %5844 }
 0xbde   : > { %3897 = vmatprep.mubr.f32.mxu1 %v8025_v39  ;;  %v5847_v11 = vunpack.i.h.bf16 %v5845_v21  ;;  %v5846_v55 = vunpack.i.l.bf16 %v5845_v21 }
 0xbdf   : > { %v4256_v7 = vsel %vm4237_vm1, %v5822_v61, %v5821_v38 }
 0xbe1   : > { %5064 = vmatmul.mubr.msk.f32.vlgmr.msra.gmra.mrb[76].mxu1 %vm859_vm2, %v3759_v22  ;;  %v5836_v22 = vunpack.i.l.bf16 %v5835_v35 }
 0xbe2   : > { %5407 = vmatpush1.bf16.msra.mxu1 %v5406_v46  ;;  %3903 = vmatprep.mubr.f32.mxu1 %v8025_v39  ;;  %v4092_v46 = vrot.slane %v4088_v37, %v8039_v51 }
 0xbe3   : > { %5409 = vmatprep.subr.bf16.mxu1 %v5408_v52  ;;  %v5807_v52 = vunpack.i.h.bf16 %v5805_v36  ;;  %v4241_v36 = vsel %vm4237_vm1, %v5826_v41, %v5827_v6 }
 0xbe4   : > { %vm7640_vm11 = vcmp.eq.s32.totalorder %v4092_v46, 1  ;;  %v4046_v46 = vld [vmem:[#allocation7 + $0xa8] sm:$0xff] }
 0xbe5   : > { %5065 = vmatmul.mubr.msk.f32.gmra.mrb[70].mxu1 %vm859_vm2, %v3760_v50  ;;  %v4085_v29 = vsel %vm4065_vm8, %v5807_v52, %v5806_v48  ;;  %vm5416_vm4 = vmpackc.low %vm7640_vm11, %vm7640_vm11  ;;  %v4069_v62 = vsel %vm4065_vm8, %v5806_v48, %v5807_v52  ;;  %v5832_v50 = vunpack.i.h.bf16 %v5830_v40  ;;  %v4240_v52 = vsel %vm4237_vm1, %v5821_v38, %v5822_v61  ;;  %v4220_v61 = vld [vmem:[#allocation7 + $0xd8] sm:$0xff] }
 0xbe6   : > { %5411 = vmatpush1.bf16.msra.mxu1 %v5410_v49  ;;  %3909 = vmatprep.mubr.f32.mxu1 %v8025_v39  ;;  %v4264_v49 = vsel %vm4263_vm0, 1, %v8044_v33  ;;  %v5418_v5 = vpack.c.bf16 %v4085_v29, %v4084_v0  ;;  %v5421_v44 = vpack.c.bf16 %v4069_v62, %v4068_v24  ;;  %vm4435_vm8 = vmand %vm4434_vm5, %vm8073_vm13  ;;  %vm4413_vm0 = vcmask 654336   ;;  %v5855_v29 = vpop.permute.xlu1 %5854 }
 0xbe7   : > { %5414 = vmatprep.subr.msk.bf16.mxu1 %vm5413_vm7, %v5412_v28  ;;  %v4272_v42 = vrot.slane %v4264_v49, %v8045_v30  ;;  %v4268_v53 = vrot.slane %v4264_v49, %v8039_v51  ;;  %v4436_v8 = vsel %vm4435_vm8, 1, %v8044_v33  ;;  %v5427_v28 = vpack.c.bf16 %v4239_v18, %v4238_v32 }
 0xbe8   : > { %v4444_v37 = vrot.slane %v4436_v8, %v8045_v30  ;;  %v4431_v3 = vsel %vm4413_vm0, %v5837_v4, %v5836_v22  ;;  %v4430_v48 = vsel %vm4413_vm0, %v5832_v50, %v5831_v59  ;;  %v4440_v23 = vrot.slane %v4436_v8, %v8039_v51  ;;  %v4219_v8 = vld [vmem:[#allocation7 + $0xd0] sm:$0xff] }
 0xbe9   : > { %5066 = vmatmul.mubr.msk.f32.gmra.mrb[72].mxu1 %vm859_vm2, %v3761_v60  ;;  %vm7656_vm6 = vcmp.eq.s32.totalorder %v4272_v42, 1  ;;  %vm7700_vm14 = vcmp.eq.s32.totalorder %v4268_v53, 1  ;;  %v5430_v60 = vpack.c.bf16 %v4257_v19, %v4256_v7  ;;  %v5436_v49 = vpack.c.bf16 %v4431_v3, %v4430_v48  ;;  %v4393_v19 = vld [vmem:[#allocation7 + $0xe0] sm:$0xff]  ;;  %v4394_v7 = vld [vmem:[#allocation7 + $0xe8] sm:$0xff] }
 0xbea   : > { %3915 = vmatprep.mubr.f32.mxu1 %v8025_v39  ;;  %vm5425_vm9 = vmpackc.low %vm7656_vm6, %vm7656_vm6  ;;  %vm7712_vm15 = vcmp.eq.s32.totalorder %v4444_v37, 1  ;;  %v4415_v13 = vsel %vm4413_vm0, %v5836_v22, %v5837_v4  ;;  %v4433_v63 = vsel %vm4413_vm0, %v5847_v11, %v5846_v55  ;;  %v5857_v47 = vunpack.i.h.bf16 %v5855_v29  ;;  %v5865_v6 = vpop.permute.xlu1 %5864  ;;  %v4566_v3 = vld [vmem:[#allocation7 + $0x108] sm:$0xff] }
 0xbeb   : > { %vm5437_vm11 = vmpackc.low %vm7712_vm15, %vm7712_vm15  ;;  %v4414_v62 = vsel %vm4413_vm0, %v5831_v59, %v5832_v50  ;;  %vm4585_vm1 = vcmask 629760   ;;  %v4416_v43 = vsel %vm4413_vm0, %v5841_v58, %v5842_v54  ;;  %v5867_v35 = vunpack.i.h.bf16 %v5865_v6 }
 0xbec   : > { %v5866_v37 = vunpack.i.l.bf16 %v5865_v6  ;;  %v4586_v4 = vsel %vm4585_vm1, %v5851_v31, %v5852_v27 }
 0xbed   : > { %5067 = vmatmul.mubr.msk.f32.gmra.mrb[74].mxu1 %vm859_vm2, %v3762_v14  ;;  %v5433_v14 = vpack.c.bf16 %v4241_v36, %v4240_v52  ;;  %v4396_v36 = vld [vmem:[#allocation7 + $0xf8] sm:$0xff] }
 0xbee   : > { %4011 = vmatprep.mubr.f32.mxu1 %v8025_v39  ;;  %v4589_v32 = vsel %vm4585_vm1, %v5866_v37, %v5867_v35  ;;  %v4568_v52 = vld [vmem:[#allocation7 + $0x118] sm:$0xff] }
 0xbf1   : > { %5068 = vmatmul.mubr.msk.f32.vlgmr.msra.gmra.mrb[76].mxu1 %vm859_vm2, %v3931_v34 }
 0xbf2   : > { %5417 = vmatpush1.bf16.msk.msra.mxu1 %vm5416_vm4, %v5415_v45  ;;  %4017 = vmatprep.mubr.f32.mxu1 %v8025_v39  ;;  %v5856_v45 = vunpack.i.l.bf16 %v5855_v29 }
 0xbf3   : > { %5420 = vmatprep.subr.msk.bf16.mxu1 %vm5413_vm7, %v5418_v5  ;;  %vm5428_vm7 = vmpackc.low %vm7700_vm14, %vm7700_vm14  ;;  %v4432_v5 = vsel %vm4413_vm0, %v5842_v54, %v5841_v58 }
 0xbf4   : > { %v5442_v24 = vpack.c.bf16 %v4433_v63, %v4432_v5  ;;  %v4587_v18 = vsel %vm4585_vm1, %v5856_v45, %v5857_v47 }
 0xbf5   : > { %5069 = vmatmul.mubr.msk.f32.gmra.mrb[70].mxu1 %vm859_vm2, %v3932_v1  ;;  %v5439_v1 = vpack.c.bf16 %v4415_v13, %v4414_v62 }
 0xbf6   : > { %5423 = vmatpush1.bf16.msk.msra.mxu1 %vm5416_vm4, %v5421_v44  ;;  %4023 = vmatprep.mubr.f32.mxu1 %v8025_v39  ;;  %vm4606_vm4 = vmand %vm7604_vm3, %vm3626_vm10  ;;  %vm7758_vm3 = vcmp.eq.s32.totalorder %v4440_v23, 1  ;;  %v4603_v44 = vsel %vm4585_vm1, %v5857_v47, %v5856_v45 }
 0xbf7   : > { %5426 = vmatprep.subr.msk.bf16.mxu1 %vm5425_vm9, %v5424_v12  ;;  %vm4607_vm10 = vmand %vm4606_vm4, %vm3628_vm12  ;;  %v4218_v12 = vld [vmem:[#allocation7 + $0xc8] sm:$0xff] }
 0xbf8   : > { %v4608_v42 = vsel %vm4607_vm10, 1, %v8044_v33  ;;  %v4217_v33 = vld [vmem:[#allocation7 + $0xc0] sm:$0xff]  ;;  %vm5440_vm12 = vmpackc.low %vm7758_vm3, %vm7758_vm3 }
 0xbf9   : > { %5070 = vmatmul.mubr.msk.f32.gmra.mrb[72].mxu1 %vm859_vm2, %v3933_v15  ;;  %v4616_v0 = vrot.slane %v4608_v42, %v8045_v30  ;;  %v4417_v30 = vsel %vm4413_vm0, %v5846_v55, %v5847_v11  ;;  %v4602_v15 = vsel %vm4585_vm1, %v5852_v27, %v5851_v31  ;;  %v4612_v41 = vrot.slane %v4608_v42, %v8039_v51 }
 0xbfa   : > { %4029 = vmatprep.mubr.f32.mxu1 %v8025_v39  ;;  %v5445_v16 = vpack.c.bf16 %v4417_v30, %v4416_v43  ;;  %v5448_v53 = vpack.c.bf16 %v4603_v44, %v4602_v15  ;;  %v4605_v51 = vsel %vm4585_vm1, %v5867_v35, %v5866_v37 }
 0xbfb   : > { %vm7774_vm6 = vcmp.eq.s32.totalorder %v4616_v0, 1 }
 0xbfc   : > { %vm5449_vm5 = vmpackc.low %vm7774_vm6, %vm7774_vm6 }
 0xbfd   : > { %5071 = vmatmul.mubr.msk.f32.gmra.mrb[74].mxu1 %vm859_vm2, %v3934_v20  ;;  %v5860_v20 = vpop.permute.xlu0 %5859 }
 0xbfe   : > { %4183 = vmatprep.mubr.f32.mxu1 %v8025_v39  ;;  %v5862_v38 = vunpack.i.h.bf16 %v5860_v20  ;;  %v5861_v9 = vunpack.i.l.bf16 %v5860_v20 }
 0xc00   : > { %v4604_v22 = vsel %vm4585_vm1, %v5862_v38, %v5861_v9  ;;  %v4588_v50 = vsel %vm4585_vm1, %v5861_v9, %v5862_v38 }
 0xc01   : > { %5080 = vmatmul.mubr.msk.f32.vlgmr.msra.gmra.mrb[76].mxu1 %vm859_vm2, %v4045_v56  ;;  %v5451_v56 = vpack.c.bf16 %v4587_v18, %v4586_v4  ;;  %v5454_v10 = vpack.c.bf16 %v4605_v51, %v4604_v22  ;;  %v5457_v59 = vpack.c.bf16 %v4589_v32, %v4588_v50  ;;  %v4743_v17 = vpop.permute.xlu0 %4742 }
 0xc02   : > { %5429 = vmatpush1.bf16.msk.msra.mxu1 %vm5428_vm7, %v5427_v28  ;;  %4189 = vmatprep.mubr.f32.mxu1 %v8025_v39  ;;  %v4395_v28 = vld [vmem:[#allocation7 + $0xf0] sm:$0xff] }
 0xc03   : > { %5432 = vmatprep.subr.msk.bf16.mxu1 %vm5425_vm9, %v5430_v60  ;;  %vm7810_vm9 = vcmp.eq.s32.totalorder %v4612_v41, 1  ;;  %v4565_v60 = vld [vmem:[#allocation7 + $0x100] sm:$0xff] }
 0xc04   : > { %vm5452_vm13 = vmpackc.low %vm7810_vm9, %vm7810_vm9 }
 0xc05   : > { %5081 = vmatmul.mubr.msk.f32.gmra.mrb[70].mxu1 %vm859_vm2, %v4046_v46  ;;  %v4567_v46 = vld [vmem:[#allocation7 + $0x110] sm:$0xff]  ;;  %v4753_v13 = vpop.permute.xlu0 %4752 }
 0xc06   : > { %5435 = vmatpush1.bf16.msk.msra.mxu1 %vm5428_vm7, %v5433_v14  ;;  %4195 = vmatprep.mubr.f32.mxu1 %v8025_v39 }
 0xc07   : > { %5438 = vmatprep.subr.msk.bf16.mxu1 %vm5437_vm11, %v5436_v49 }
 0xc09   : > { %5082 = vmatmul.mubr.msk.f32.gmra.mrb[72].mxu1 %vm859_vm2, %v4047_v57 }
 0xc0a   : > { %4201 = vmatprep.mubr.f32.mxu1 %v8025_v39 }
 0xc0d   : > { %5083 = vmatmul.mubr.msk.f32.gmra.mrb[74].mxu1 %vm859_vm2, %v4048_v26 }
 0xc0e   : > { %4359 = vmatprep.mubr.f32.mxu1 %v8025_v39 }
 0xc11   : > { %5092 = vmatmul.mubr.msk.f32.vlgmr.msra.gmra.mrb[76].mxu1 %vm859_vm2, %v4217_v33 }
 0xc12   : > { %5441 = vmatpush1.bf16.msk.msra.mxu1 %vm5440_vm12, %v5439_v1  ;;  %4365 = vmatprep.mubr.f32.mxu1 %v8025_v39 }
 0xc13   : > { %5444 = vmatprep.subr.msk.bf16.mxu1 %vm5437_vm11, %v5442_v24 }
 0xc15   : > { %5093 = vmatmul.mubr.msk.f32.gmra.mrb[70].mxu1 %vm859_vm2, %v4218_v12 }
 0xc16   : > { %5447 = vmatpush1.bf16.msk.msra.mxu1 %vm5440_vm12, %v5445_v16  ;;  %4371 = vmatprep.mubr.f32.mxu1 %v8025_v39 }
 0xc17   : > { %5450 = vmatprep.subr.msk.bf16.mxu1 %vm5449_vm5, %v5448_v53 }
 0xc19   : > { %5094 = vmatmul.mubr.msk.f32.gmra.mrb[72].mxu1 %vm859_vm2, %v4219_v8 }
 0xc1a   : > { %4377 = vmatprep.mubr.f32.mxu1 %v8025_v39 }
 0xc1d   : > { %5095 = vmatmul.mubr.msk.f32.gmra.mrb[74].mxu1 %vm859_vm2, %v4220_v61 }
 0xc1e   : > { %4531 = vmatprep.mubr.f32.mxu1 %v8025_v39 }
 0xc21   : > { %5104 = vmatmul.mubr.msk.f32.vlgmr.msra.gmra.mrb[76].mxu1 %vm859_vm2, %v4393_v19 }
 0xc22   : > { %5453 = vmatpush1.bf16.msk.msra.mxu1 %vm5452_vm13, %v5451_v56  ;;  %4537 = vmatprep.mubr.f32.mxu1 %v8025_v39 }
 0xc23   : > { %5456 = vmatprep.subr.msk.bf16.mxu1 %vm5449_vm5, %v5454_v10 }
 0xc25   : > { %5105 = vmatmul.mubr.msk.f32.gmra.mrb[70].mxu1 %vm859_vm2, %v4394_v7 }
 0xc26   : > { %5459 = vmatpush1.bf16.msk.msra.mxu1 %vm5452_vm13, %v5457_v59  ;;  %4543 = vmatprep.mubr.f32.mxu1 %v8025_v39 }
 0xc29   : > { %5106 = vmatmul.mubr.msk.f32.gmra.mrb[72].mxu1 %vm859_vm2, %v4395_v28 }
 0xc2a   : > { %4549 = vmatprep.mubr.f32.mxu1 %v8025_v39 }
 0xc2d   : > { %5107 = vmatmul.mubr.msk.f32.gmra.mrb[74].mxu1 %vm859_vm2, %v4396_v36 }
 0xc2e   : > { %4703 = vmatprep.mubr.f32.mxu1 %v8025_v39 }
 0xc31   : > { %5116 = vmatmul.mubr.msk.f32.vlgmr.msra.gmra.mrb[76].mxu1 %vm859_vm2, %v4565_v60 }
 0xc32   : > { %4709 = vmatprep.mubr.f32.mxu1 %v8025_v39 }
 0xc35   : > { %5117 = vmatmul.mubr.msk.f32.gmra.mrb[70].mxu1 %vm859_vm2, %v4566_v3 }
 0xc36   : > { %4715 = vmatprep.mubr.f32.mxu1 %v8025_v39 }
 0xc39   : > { %5118 = vmatmul.mubr.msk.f32.gmra.mrb[72].mxu1 %vm859_vm2, %v4567_v46 }
 0xc3a   : > { %4721 = vmatprep.mubr.f32.mxu1 %v8025_v39  ;;  %v4748_v39 = vpop.permute.xlu1 %4747 }
 0xc3d   : > { %5119 = vmatmul.mubr.msk.f32.gmra.mrb[74].mxu1 %vm859_vm2, %v4568_v52 }
 0xc3e   : > { %v4758_v5 = vpop.permute.xlu1 %4757 }
 0xc87   : > { %v3459_v48 = vpop.f32.mrb[56].mxu0 }
 0xc88   : > { %v3461_v14 = vpop.f32.mrb[57].mxu0 }
 0xd04   : > { %v4705_v49 = vpop.f32.mrb[76].mxu1 }
 0xd05   : > { %v5464_v21 = vadd.f32 %v4705_v49, %v3459_v48  ;;  %v4707_v57 = vpop.f32.mrb[77].mxu1 }
 0xd06   : > { %v5465_v23 = vadd.f32 %v4707_v57, %v3461_v14 }
 0xd07   : > { %v4760_v11 = vadd.f32 %v5464_v21, %v4743_v17 }
 0xd08   : > { %v4761_v55 = vadd.f32 %v5465_v23, %v4743_v17  ;;  %v4711_v26 = vpop.f32.mrb[70].mxu1 }
 0xd09   : > { %v4768_v42 = vmax.f32 %v4760_v11, 0.0  ;;  %v4762_v29 = vadd.f32 %v4748_v39, %v4711_v26  ;;  %v4713_v54 = vpop.f32.mrb[71].mxu1 }
 0xd0a   : > { %v4769_v58 = vmax.f32 %v4761_v55, 0.0  ;;  %v4763_v34 = vadd.f32 %v4748_v39, %v4713_v54 }
 0xd0b   : > { %4776 = vst [vmem:[%s7849_s23] sm:$0xff] %v4768_v42  ;;  %v4770_v2 = vmax.f32 %v4762_v29, 0.0 }
 0xd0c   : > { %4777 = vst [vmem:[%s7849_s23 + $0x8] sm:$0xff] %v4769_v58  ;;  %v4771_v0 = vmax.f32 %v4763_v34, 0.0  ;;  %v4717_v63 = vpop.f32.mrb[72].mxu1 }
 0xd0d   : > { %4778 = vst [vmem:[%s7849_s23 + $0x10] sm:$0xff] %v4770_v2  ;;  %v4764_v47 = vadd.f32 %v4753_v13, %v4717_v63  ;;  %v4719_v45 = vpop.f32.mrb[73].mxu1 }
 0xd0e   : > { %4779 = vst [vmem:[%s7849_s23 + $0x18] sm:$0xff] %v4771_v0  ;;  %v4765_v33 = vadd.f32 %v4753_v13, %v4719_v45 }
 0xd0f   : > { %v4772_v62 = vmax.f32 %v4764_v47, 0.0 }
 0xd10   : > { %v4773_v27 = vmax.f32 %v4765_v33, 0.0  ;;  %v4723_v31 = vpop.f32.mrb[74].mxu1 }
 0xd11   : > { %4780 = vst [vmem:[%s7849_s23 + $0x20] sm:$0xff] %v4772_v62  ;;  %v4766_v1 = vadd.f32 %v4758_v5, %v4723_v31  ;;  %v4725_v30 = vpop.f32.mrb[75].mxu1 }
 0xd12   : > { %4781 = vst [vmem:[%s7849_s23 + $0x28] sm:$0xff] %v4773_v27  ;;  %v4767_v24 = vadd.f32 %v4758_v5, %v4725_v30 }
 0xd13   : > { %v4774_v25 = vmax.f32 %v4766_v1, 0.0 }
 0xd14   : > { %v4775_v44 = vmax.f32 %v4767_v24, 0.0 }
 0xd15   : > { %4782 = vst [vmem:[%s7849_s23 + $0x30] sm:$0xff] %v4774_v25 }
 0xd16   : > { %4783 = vst [vmem:[%s7849_s23 + $0x38] sm:$0xff] %v4775_v44 }
 0xd17 PF: > { %s8085_s30 = sld [smem:[#allocation12_spill]] }
 0xd1d   : > { %s31_s27 = sadd.s32 1, %s8085_s30  }
 0xd1e   : > { %p28_p2 = scmp.ge.s32.totalorder %s31_s27, 4  }
 0xd20   :  { %30 = sbr.rel (!%p28_p2) target bundleno = 10 (0xa), region = 152 }
 0xd27   :  { %4805 = vsyncpa [#allocation3], 1 }
 0xd28   :  { %4807 = vsyncpa [#allocation3 + $0x1], 1 }
 0xd29   :  { %4808 = vsyncpa [#allocation6], 1 }
 0xd2a   :  { %4809 = vsyncpa [#allocation4], 1 }
 0xd2b   :  { %4811 = vsyncpa [#allocation4 + $0x1], 1 }

</bundles_post_ra>
